<compile_context>
chip_gen: v5e
topology: v5e:2x2
jax: 0.10.0
libtpu: 0.0.40
codegen_flags: <defaults>
</compile_context>

<pallas_src>
import functools

import jax
import jax.numpy as jnp
from jax.experimental import pallas as pl
from jax.experimental.pallas import tpu as pltpu


# ---------------------------------------------------------------------------
# Kernels
# ---------------------------------------------------------------------------

def _flat_kernel(x_ref, w2t_ref, b2t_ref, e_ref, mwt_ref, rs_ref, g_ref, o_ref,
                 *, tau: float):
    """Lane-dense path for D < 128.

    All (batch, i, j)-sized intermediates live in a transposed/flattened
    (D_j, tb*D_i) layout so the minor (lane) axis is tb*D instead of D; the
    logsumexp over j becomes a sublane (axis-0) reduction.
    """
    x = x_ref[...].astype(jnp.float32)                      # (tb, D)
    tb, d = x.shape
    n = tb * d

    x_flat = x.reshape(1, n)                                # [0, b*D+i] = x[b, i]

    # X2[j, b*D+i] = x[b, j] built on the otherwise-idle MXU:
    #   X2 = x.T @ E  with  E[b', b*D+i] = 1 iff b' == b   (precomputed).
    x2 = jnp.dot(x.T, e_ref[...], preferred_element_type=jnp.float32)   # (D, n)

    # zs[j, b*D+i] = (x[b,i] - x[b,j]) * W[i,j]/tau + bias[i,j]/tau, diag=-inf
    # (1/tau and the diagonal mask are pre-folded into w2t / b2t).
    zs = (x_flat - x2) * w2t_ref[...] + b2t_ref[...]        # (D_j, tb*D_i)

    # tau * logsumexp over j == reduction over axis 0; lanes stay dense.
    m = jnp.max(zs, axis=0, keepdims=True)                  # (1, n), finite (D>=2)
    s = jnp.sum(jnp.exp(zs - m), axis=0, keepdims=True)     # (1, n)
    y_trop = tau * (m + jnp.log(s))                         # (1, n)

    # Mean branch on the MXU:
    #   y_mean[b,i] = x[b,i]*rowsum(MW)[i]/(D-1) - (x @ MW.T/(D-1))[b,i]
    xm = jnp.dot(x, mwt_ref[...], preferred_element_type=jnp.float32)   # (tb, D)
    y_mean = x_flat * rs_ref[...] - xm.reshape(1, n)        # (1, n)

    g = g_ref[...]                                          # (1, n), sigmoid pre-applied
    y = g * y_trop + (1.0 - g) * y_mean                     # (1, n)

    # Single lane-dense store; the x-half of the concat stays in the wrapper.
    o_ref[...] = y.reshape(o_ref.shape).astype(o_ref.dtype)


def _generic_kernel(x_ref, ws_ref, bs_ref, mwt_ref, rs_ref, g_ref, o_ref,
                    *, tau: float):
    """Plain (tb, D, D) layout, used when D >= 128 (already lane-dense)."""
    x = x_ref[...].astype(jnp.float32)                      # (tb, D)
    d = x.shape[1]

    # TODO(synk): for very large D, add a j-chunked online-logsumexp grid axis
    # ("arbitrary") so the (tb, D, D) intermediate never exceeds VMEM.
    diff = x[:, :, None] - x[:, None, :]                    # (tb, D, D)
    zs = diff * ws_ref[...][None] + bs_ref[...][None]       # scaled by 1/tau, diag=-inf
    m = jnp.max(zs, axis=2, keepdims=True)                  # (tb, D, 1)
    s = jnp.sum(jnp.exp(zs - m), axis=2)                    # (tb, D)
    y_trop = tau * (m[..., 0] + jnp.log(s))

    y_mean = x * rs_ref[...] - jnp.dot(x, mwt_ref[...],
                                       preferred_element_type=jnp.float32)

    g = g_ref[...]
    y = g * y_trop + (1.0 - g) * y_mean

    # For D >= 128 both halves are lane-aligned, unmasked stores (the second
    # starts at lane offset D, a multiple of 128).
    o_ref[:, 0:d] = x.astype(o_ref.dtype)
    o_ref[:, d:2 * d] = y.astype(o_ref.dtype)


# ---------------------------------------------------------------------------
# Tiling / spec helpers
# ---------------------------------------------------------------------------

def _vmem_capacity_bytes():
    try:
        info = pltpu.get_tpu_info()
        cap = int(getattr(info, "vmem_capacity_bytes", 0) or 0)
        if cap > 0:
            return cap
    except Exception:
        pass
    return 64 << 20          # conservative default: v7x per-TensorCore VMEM


def _choose_tb(B, D, *, flat_path, vmem_cap):
    """Pick the batch tile.

    Large enough to amortize the ~0.35us/grid-step overhead, small enough that
    the live f32 temporaries fit a generation-aware VMEM budget.  On v7x-class
    chips (64 MiB VMEM, 2 TensorCores) prefer an even number of grid steps so
    dimension_semantics=("parallel",) load-balances both cores; on single-TC
    chips (v5e/v6e) keep the largest tile / fewest steps.
    """
    budget = max(8 << 20, int(vmem_cap * 0.45))
    two_tc = vmem_cap <= (72 << 20)          # 64 MiB VMEM => v7x-class chip

    def vmem_bytes(t):
        n = t * D
        if flat_path:
            # ~3 live (D, n) temporaries + 2 tiled (D, n) constants
            # (single-buffered) + the (t, n) broadcast matrix + row vectors.
            return 4 * (5 * D * n + t * n + 8 * n)
        # ~3 live (t, D, D) temporaries + (D, D) constants + x / out blocks.
        # TODO(synk): if the lowering fuses `diff` into zs this drops to ~2x,
        # admitting a ~1.5x larger tile for the same budget.
        return 4 * (3 * t * D * D + 4 * D * D + 6 * t * D)

    cap_tb = 128 if flat_path else 2048      # keep the MXU broadcast matrix small
    cands = [t for t in range(8, min(B, cap_tb) + 1, 8) if B % t == 0]
    if not cands:
        # TODO(synk): pad/mask ragged batch tiles for B with no multiple-of-8
        # divisor; a full-extent block is always legal, so use it.
        cands = [B]
    fitting = [t for t in cands if vmem_bytes(t) <= budget]
    cands = fitting if fitting else [min(cands)]

    if two_tc:
        even = [t for t in cands if (B // t) % 2 == 0]
        if even:
            return max(even)
    return max(cands)


def _const_spec(shape, single_buffer):
    """BlockSpec for a grid-invariant operand (block index is always 0)."""
    ndim = len(shape)

    def index_map(i):
        return (0,) * ndim

    if single_buffer and hasattr(pl, "Buffered"):
        # Never re-fetched -> no need for the default double buffer.
        return pl.BlockSpec(shape, index_map, pipeline_mode=pl.Buffered(1))
    return pl.BlockSpec(shape, index_map)


# ---------------------------------------------------------------------------
# pallas_call wrappers
# ---------------------------------------------------------------------------

def _run_flat(x, w2t, b2t, e, mwt, rs_t, g_t, tau, tb, vmem_limit):
    B, D = x.shape
    n = tb * D
    kernel = functools.partial(_flat_kernel, tau=float(tau))

    def call(single_buffer):
        return pl.pallas_call(
            kernel,
            out_shape=jax.ShapeDtypeStruct((B // tb, 1, n), x.dtype),
            grid_spec=pltpu.PrefetchScalarGridSpec(
                num_scalar_prefetch=0,
                grid=(B // tb,),
                in_specs=[
                    pl.BlockSpec((tb, D), lambda i: (i, 0)),     # x batch tile
                    _const_spec((D, n), single_buffer),          # tiled W.T / tau
                    _const_spec((D, n), single_buffer),          # tiled bias.T / tau (-inf diag)
                    _const_spec((tb, n), single_buffer),         # MXU broadcast matrix
                    _const_spec((D, D), single_buffer),          # MW.T / (D-1)
                    _const_spec((1, n), single_buffer),          # tiled rowsum(MW)/(D-1)
                    _const_spec((1, n), single_buffer),          # tiled sigmoid(gate)
                ],
                # Flat (1, tb*D) rows -> full-extent, lane-dense output stores.
                out_specs=pl.BlockSpec((1, 1, n), lambda i: (i, 0, 0)),
            ),
            compiler_params=pltpu.CompilerParams(
                dimension_semantics=("parallel",),
                vmem_limit_bytes=vmem_limit,
            ),
        )(x, w2t, b2t, e, mwt, rs_t, g_t)

    if hasattr(pl, "Buffered"):
        try:
            return call(True)
        except Exception:   # Buffered(1) rejected by this jax -> default buffering
            pass
    return call(False)


def _run_generic(x, ws, bs, mwt, rs, g, tau, tb, vmem_limit):
    B, D = x.shape
    kernel = functools.partial(_generic_kernel, tau=float(tau))

    def call(single_buffer):
        return pl.pallas_call(
            kernel,
            out_shape=jax.ShapeDtypeStruct((B, 2 * D), x.dtype),
            grid_spec=pltpu.PrefetchScalarGridSpec(
                num_scalar_prefetch=0,
                grid=(B // tb,),
                in_specs=[
                    pl.BlockSpec((tb, D), lambda i: (i, 0)),     # x batch tile
                    _const_spec((D, D), single_buffer),          # W / tau (diag = 0)
                    _const_spec((D, D), single_buffer),          # bias / tau (diag = -inf)
                    _const_spec((D, D), single_buffer),          # MW.T / (D-1)
                    _const_spec((1, D), single_buffer),          # rowsum(MW) / (D-1)
                    _const_spec((1, D), single_buffer),          # sigmoid(gate)
                ],
                out_specs=pl.BlockSpec((tb, 2 * D), lambda i: (i, 0)),
            ),
            compiler_params=pltpu.CompilerParams(
                dimension_semantics=("parallel",),
                vmem_limit_bytes=vmem_limit,
            ),
        )(x, ws, bs, mwt, rs, g)

    if hasattr(pl, "Buffered"):
        try:
            return call(True)
        except Exception:
            pass
    return call(False)


def gated_tropical_difference_aggregator(x, weights, bias, mean_weights,
                                         gate_params, tau, *, tb=None,
                                         force_generic=False):
    """Forward pass of GatedTropicalDifferenceAggregator.

    x: (B, D); weights/bias/mean_weights: (D, D); gate_params: (D,).
    Returns (B, 2*D) = concat([x, g*y_tropical + (1-g)*y_mean], axis=1).
    """
    B, D = x.shape
    assert weights.shape == (D, D) and bias.shape == (D, D)
    assert mean_weights.shape == (D, D) and gate_params.shape == (D,)
    assert float(tau) > 0.0, "tau must be positive"
    assert D >= 2, "diagonal is masked; D >= 2 required for a finite logsumexp"

    f32 = jnp.float32
    inv_tau = 1.0 / float(tau)
    eye = jnp.eye(D, dtype=bool)

    vmem_cap = _vmem_capacity_bytes()
    # Never hand the compiler the full physical VMEM: keep ~25% headroom for
    # the pipeline buffers and internal scratch (v7x: 64 -> 48 MiB; v5e/v6e:
    # 128 -> 96 MiB).
    vmem_limit = int(max(32 << 20, min(vmem_cap * 3 // 4, 96 << 20)))

    # Pre-folds (O(D^2) work once per call): 1/tau into W and bias, diagonal
    # mask into the constants (-inf into bias, 0 into W so a non-finite weight
    # cannot leak through 0*inf), mean weights pre-transposed/scaled for the
    # MXU, sigmoid(gate) precomputed.
    w_masked = jnp.where(eye, 0.0, weights.astype(f32) * inv_tau)       # (D, D)
    b_masked = jnp.where(eye, -jnp.inf, bias.astype(f32) * inv_tau)     # (D, D)
    inv_nd = 1.0 / max(float(D - 1), 1.0)                               # clamp(min=1)
    mwt = mean_weights.astype(f32).T * inv_nd                           # (D, D)
    rowsum = (jnp.sum(mean_weights.astype(f32), axis=1) * inv_nd).reshape(1, D)
    g = jax.nn.sigmoid(gate_params.astype(f32)).reshape(1, D)

    use_flat = (D < 128) and not force_generic
    if tb is None:
        tb_sel = _choose_tb(B, D, flat_path=use_flat, vmem_cap=vmem_cap)
        if use_flat and 4 * tb_sel * tb_sel * D > vmem_cap // 4:
            # The (tb, tb*D) MXU broadcast matrix would dominate VMEM (only for
            # awkward batch sizes with no small divisor) -> plain layout.
            use_flat = False
            tb_sel = _choose_tb(B, D, flat_path=False, vmem_cap=vmem_cap)
    else:
        tb_sel = tb
    assert B % tb_sel == 0

    if use_flat:
        n = tb_sel * D
        # Tiled / transposed constants in the (D_j, tb*D_i) layout.
        w2t = jnp.tile(w_masked.T, (1, tb_sel))             # [j, b*D+i] = W[i,j]/tau
        b2t = jnp.tile(b_masked.T, (1, tb_sel))             # diag -> -inf
        rs_t = jnp.tile(rowsum, (1, tb_sel))                # (1, n)
        g_t = jnp.tile(g, (1, tb_sel))                      # (1, n)
        e = jnp.kron(jnp.eye(tb_sel, dtype=f32),
                     jnp.ones((1, D), f32))                 # (tb, n) broadcast matrix
        try:
            y_flat = _run_flat(x, w2t, b2t, e, mwt, rs_t, g_t, tau, tb_sel,
                               vmem_limit)
            y = y_flat.reshape(B, D)                        # contiguous -> free reshape
            return jnp.concatenate([x, y], axis=1)
        except Exception:
            # If this jax/Mosaic version rejects part of the lane-dense
            # lowering, fall back to the plain-layout kernel below.
            if tb is None:
                tb_sel = _choose_tb(B, D, flat_path=False, vmem_cap=vmem_cap)

    return _run_generic(x, w_masked, b_masked, mwt, rowsum, g, tau, tb_sel,
                        vmem_limit)


# ---------------------------------------------------------------------------
# Pure-JAX reference (mirror of the PyTorch forward)
# ---------------------------------------------------------------------------

def _reference(x, weights, bias, mean_weights, gate_params, tau):
    B, D = x.shape
    eye = jnp.eye(D, dtype=bool)
    diff = x[:, :, None] - x[:, None, :]
    z = diff * weights[None] + bias[None]
    z = jnp.where(eye[None], -jnp.inf, z)
    y_trop = tau * jax.nn.logsumexp(z / tau, axis=2)
    wm = jnp.where(eye[None], 0.0, diff * mean_weights[None])
    y_mean = wm.sum(axis=2) / jnp.maximum(jnp.float32(D - 1), 1.0)
    g = jax.nn.sigmoid(gate_params)[None]
    y = g * y_trop + (1.0 - g) * y_mean
    return jnp.concatenate([x, y], axis=1)


if __name__ == "__main__":
    B, D = 16, 32
    tau_tropical = 0.2   # module default; learn_tau_tropical=False -> static scalar

    key = jax.random.PRNGKey(0)
    kx, kw, kb, km, kg = jax.random.split(key, 5)

    x = jax.random.normal(kx, (B, D), dtype=jnp.float32)
    weights = jax.random.normal(kw, (D, D), dtype=jnp.float32) * 0.02
    bias = jax.random.normal(kb, (D, D), dtype=jnp.float32) * 0.02
    mean_weights = jax.random.normal(km, (D, D), dtype=jnp.float32) * 0.02
    gate_params = jax.random.normal(kg, (D,), dtype=jnp.float32) * 0.5

    y_ref = _reference(x, weights, bias, mean_weights, gate_params, tau_tropical)

    # Lane-dense path (D < 128 -> flat (D_j, tb*D_i) layout).
    y = gated_tropical_difference_aggregator(
        x, weights, bias, mean_weights, gate_params, tau_tropical)
    y = jax.block_until_ready(y)
    assert y.shape == (B, 2 * D)
    err = float(jnp.max(jnp.abs(y - y_ref)))
    assert jnp.allclose(y, y_ref, atol=1e-4, rtol=1e-4), \
        f"lane-dense path max abs err = {err}"

    # Plain-layout path (the D >= 128 kernel), forced, so it stays exercised.
    y2 = gated_tropical_difference_aggregator(
        x, weights, bias, mean_weights, gate_params, tau_tropical,
        force_generic=True)
    y2 = jax.block_until_ready(y2)
    err2 = float(jnp.max(jnp.abs(y2 - y_ref)))
    assert jnp.allclose(y2, y_ref, atol=1e-4, rtol=1e-4), \
        f"plain-layout path max abs err = {err2}"

    print("KERNEL_OK")
</pallas_src>

<mosaic_0001>
module attributes {stable_mosaic.version = 11 : i64} {
  func.func @_flat_kernel(%arg0: i32, %arg1: memref<8x32xf32, #tpu.memory_space<vmem>>, %arg2: memref<32x256xf32, #tpu.memory_space<vmem>>, %arg3: memref<32x256xf32, #tpu.memory_space<vmem>>, %arg4: memref<8x256xf32, #tpu.memory_space<vmem>>, %arg5: memref<32x32xf32, #tpu.memory_space<vmem>>, %arg6: memref<1x256xf32, #tpu.memory_space<vmem>>, %arg7: memref<1x256xf32, #tpu.memory_space<vmem>>, %arg8: memref<1x1x256xf32, #tpu.memory_space<vmem>>) attributes {dimension_semantics = [#tpu.dimension_semantics<parallel>], iteration_bounds = array<i64: 2>, scalar_prefetch = 0 : i64, scratch_operands = 0 : i64, tpu.core_type = #tpu.core_type<tc>, window_params = [{transform_indices = @transform_0, window_bounds = array<i64: 8, 32>}, {pipeline_mode = #tpu.pipeline_mode<synchronous>, transform_indices = @transform_1, window_bounds = array<i64: 32, 256>}, {pipeline_mode = #tpu.pipeline_mode<synchronous>, transform_indices = @transform_2, window_bounds = array<i64: 32, 256>}, {pipeline_mode = #tpu.pipeline_mode<synchronous>, transform_indices = @transform_3, window_bounds = array<i64: 8, 256>}, {pipeline_mode = #tpu.pipeline_mode<synchronous>, transform_indices = @transform_4, window_bounds = array<i64: 32, 32>}, {pipeline_mode = #tpu.pipeline_mode<synchronous>, transform_indices = @transform_5, window_bounds = array<i64: 1, 256>}, {pipeline_mode = #tpu.pipeline_mode<synchronous>, transform_indices = @transform_6, window_bounds = array<i64: 1, 256>}, {transform_indices = @transform_7, window_bounds = array<i64: 1, 1, 256>}]} {
    %c0 = arith.constant 0 : index
    %c0_0 = arith.constant 0 : index
    %0 = vector.load %arg1[%c0, %c0_0] : memref<8x32xf32, #tpu.memory_space<vmem>>, vector<8x32xf32>
    %1 = vector.shape_cast %0 : vector<8x32xf32> to vector<1x256xf32>
    %2 = tpu.transpose %0, [1, 0] : vector<8x32xf32> -> vector<32x8xf32>
    %c0_1 = arith.constant 0 : index
    %c0_2 = arith.constant 0 : index
    %3 = vector.load %arg4[%c0_1, %c0_2] : memref<8x256xf32, #tpu.memory_space<vmem>>, vector<8x256xf32>
    %cst = arith.constant dense<0.000000e+00> : vector<32x256xf32>
    %4 = tpu.matmul %2, %3, %cst {dimension_numbers = #tpu.dot_dimension_numbers<[1], [0], [0], [1], [0, 0, 1, 1], [], []>} : vector<32x8xf32>, vector<8x256xf32>, vector<32x256xf32> -> vector<32x256xf32>
    %5 = vector.broadcast %1 : vector<1x256xf32> to vector<32x256xf32>
    %6 = arith.subf %5, %4 : vector<32x256xf32>
    %c0_3 = arith.constant 0 : index
    %c0_4 = arith.constant 0 : index
    %7 = vector.load %arg2[%c0_3, %c0_4] : memref<32x256xf32, #tpu.memory_space<vmem>>, vector<32x256xf32>
    %8 = arith.mulf %6, %7 : vector<32x256xf32>
    %c0_5 = arith.constant 0 : index
    %c0_6 = arith.constant 0 : index
    %9 = vector.load %arg3[%c0_5, %c0_6] : memref<32x256xf32, #tpu.memory_space<vmem>>, vector<32x256xf32>
    %10 = arith.addf %8, %9 : vector<32x256xf32>
    %cst_7 = arith.constant dense<0xFF800000> : vector<256xf32>
    %11 = vector.multi_reduction <maximumf>, %10, %cst_7 [0] : vector<32x256xf32> to vector<256xf32>
    %12 = vector.shape_cast %11 : vector<256xf32> to vector<1x256xf32>
    %13 = vector.broadcast %12 : vector<1x256xf32> to vector<32x256xf32>
    %14 = arith.subf %10, %13 : vector<32x256xf32>
    %15 = math.exp %14 : vector<32x256xf32>
    %cst_8 = arith.constant dense<0.000000e+00> : vector<256xf32>
    %16 = vector.multi_reduction <add>, %15, %cst_8 [0] : vector<32x256xf32> to vector<256xf32>
    %17 = vector.shape_cast %16 : vector<256xf32> to vector<1x256xf32>
    %18 = math.log %17 : vector<1x256xf32>
    %19 = arith.addf %12, %18 : vector<1x256xf32>
    %cst_9 = arith.constant 2.000000e-01 : f32
    %20 = vector.broadcast %cst_9 : f32 to vector<1x256xf32>
    %21 = arith.mulf %20, %19 : vector<1x256xf32>
    %c0_10 = arith.constant 0 : index
    %c0_11 = arith.constant 0 : index
    %22 = vector.load %arg5[%c0_10, %c0_11] : memref<32x32xf32, #tpu.memory_space<vmem>>, vector<32x32xf32>
    %cst_12 = arith.constant dense<0.000000e+00> : vector<8x32xf32>
    %23 = tpu.matmul %0, %22, %cst_12 {dimension_numbers = #tpu.dot_dimension_numbers<[1], [0], [0], [1], [0, 0, 1, 1], [], []>} : vector<8x32xf32>, vector<32x32xf32>, vector<8x32xf32> -> vector<8x32xf32>
    %c0_13 = arith.constant 0 : index
    %c0_14 = arith.constant 0 : index
    %24 = vector.load %arg6[%c0_13, %c0_14] : memref<1x256xf32, #tpu.memory_space<vmem>>, vector<1x256xf32>
    %25 = arith.mulf %1, %24 : vector<1x256xf32>
    %26 = vector.shape_cast %23 : vector<8x32xf32> to vector<1x256xf32>
    %27 = arith.subf %25, %26 : vector<1x256xf32>
    %c0_15 = arith.constant 0 : index
    %c0_16 = arith.constant 0 : index
    %28 = vector.load %arg7[%c0_15, %c0_16] : memref<1x256xf32, #tpu.memory_space<vmem>>, vector<1x256xf32>
    %29 = arith.mulf %28, %21 : vector<1x256xf32>
    %cst_17 = arith.constant 1.000000e+00 : f32
    %30 = vector.broadcast %cst_17 : f32 to vector<1x256xf32>
    %31 = arith.subf %30, %28 : vector<1x256xf32>
    %32 = arith.mulf %31, %27 : vector<1x256xf32>
    %33 = arith.addf %29, %32 : vector<1x256xf32>
    %34 = vector.shape_cast %33 : vector<1x256xf32> to vector<1x1x256xf32>
    %c0_18 = arith.constant 0 : index
    %c0_19 = arith.constant 0 : index
    %c0_20 = arith.constant 0 : index
    %35 = vector.load %arg8[%c0_18, %c0_19, %c0_20] : memref<1x1x256xf32, #tpu.memory_space<vmem>>, vector<1x1x256xf32>
    tpu.vector_store %arg8[%c0_18, %c0_19, %c0_20], %34 {strides = array<i32>} : memref<1x1x256xf32, #tpu.memory_space<vmem>>, vector<1x1x256xf32>,
    return
  }
  func.func @transform_0(%arg0: i32) -> (i32, i32) {
    %c0_i32 = arith.constant 0 : i32
    %c0_i32_0 = arith.constant 0 : i32
    return %arg0, %c0_i32 : i32, i32
  }
  func.func @transform_1(%arg0: i32) -> (i32, i32) {
    %c0_i32 = arith.constant 0 : i32
    %c0_i32_0 = arith.constant 0 : i32
    %c0_i32_1 = arith.constant 0 : i32
    return %c0_i32, %c0_i32_0 : i32, i32
  }
  func.func @transform_2(%arg0: i32) -> (i32, i32) {
    %c0_i32 = arith.constant 0 : i32
    %c0_i32_0 = arith.constant 0 : i32
    %c0_i32_1 = arith.constant 0 : i32
    return %c0_i32, %c0_i32_0 : i32, i32
  }
  func.func @transform_3(%arg0: i32) -> (i32, i32) {
    %c0_i32 = arith.constant 0 : i32
    %c0_i32_0 = arith.constant 0 : i32
    %c0_i32_1 = arith.constant 0 : i32
    return %c0_i32, %c0_i32_0 : i32, i32
  }
  func.func @transform_4(%arg0: i32) -> (i32, i32) {
    %c0_i32 = arith.constant 0 : i32
    %c0_i32_0 = arith.constant 0 : i32
    %c0_i32_1 = arith.constant 0 : i32
    return %c0_i32, %c0_i32_0 : i32, i32
  }
  func.func @transform_5(%arg0: i32) -> (i32, i32) {
    %c0_i32 = arith.constant 0 : i32
    %c0_i32_0 = arith.constant 0 : i32
    %c0_i32_1 = arith.constant 0 : i32
    return %c0_i32, %c0_i32_0 : i32, i32
  }
  func.func @transform_6(%arg0: i32) -> (i32, i32) {
    %c0_i32 = arith.constant 0 : i32
    %c0_i32_0 = arith.constant 0 : i32
    %c0_i32_1 = arith.constant 0 : i32
    return %c0_i32, %c0_i32_0 : i32, i32
  }
  func.func @transform_7(%arg0: i32) -> (i32, i32, i32) {
    %c0_i32 = arith.constant 0 : i32
    %c0_i32_0 = arith.constant 0 : i32
    %c0_i32_1 = arith.constant 0 : i32
    return %arg0, %c0_i32, %c0_i32_0 : i32, i32, i32
  }
}

module attributes {stable_mosaic.version = 11 : i64} {
  func.func @_flat_kernel(%arg0: i32, %arg1: memref<8x32xf32, #tpu.memory_space<vmem>>, %arg2: memref<32x256xf32, #tpu.memory_space<vmem>>, %arg3: memref<32x256xf32, #tpu.memory_space<vmem>>, %arg4: memref<8x256xf32, #tpu.memory_space<vmem>>, %arg5: memref<32x32xf32, #tpu.memory_space<vmem>>, %arg6: memref<1x256xf32, #tpu.memory_space<vmem>>, %arg7: memref<1x256xf32, #tpu.memory_space<vmem>>, %arg8: memref<1x1x256xf32, #tpu.memory_space<vmem>>) attributes {dimension_semantics = [#tpu.dimension_semantics<parallel>], iteration_bounds = array<i64: 2>, scalar_prefetch = 0 : i64, scratch_operands = 0 : i64, tpu.core_type = #tpu.core_type<tc>, window_params = [{transform_indices = @transform_0, window_bounds = array<i64: 8, 32>}, {pipeline_mode = #tpu.pipeline_mode<synchronous>, transform_indices = @transform_1, window_bounds = array<i64: 32, 256>}, {pipeline_mode = #tpu.pipeline_mode<synchronous>, transform_indices = @transform_2, window_bounds = array<i64: 32, 256>}, {pipeline_mode = #tpu.pipeline_mode<synchronous>, transform_indices = @transform_3, window_bounds = array<i64: 8, 256>}, {pipeline_mode = #tpu.pipeline_mode<synchronous>, transform_indices = @transform_4, window_bounds = array<i64: 32, 32>}, {pipeline_mode = #tpu.pipeline_mode<synchronous>, transform_indices = @transform_5, window_bounds = array<i64: 1, 256>}, {pipeline_mode = #tpu.pipeline_mode<synchronous>, transform_indices = @transform_6, window_bounds = array<i64: 1, 256>}, {transform_indices = @transform_7, window_bounds = array<i64: 1, 1, 256>}]} {
    %c0 = arith.constant 0 : index
    %c0_0 = arith.constant 0 : index
    %0 = vector.load %arg1[%c0, %c0_0] : memref<8x32xf32, #tpu.memory_space<vmem>>, vector<8x32xf32>
    %1 = vector.shape_cast %0 : vector<8x32xf32> to vector<1x256xf32>
    %2 = tpu.transpose %0, [1, 0] : vector<8x32xf32> -> vector<32x8xf32>
    %c0_1 = arith.constant 0 : index
    %c0_2 = arith.constant 0 : index
    %3 = vector.load %arg4[%c0_1, %c0_2] : memref<8x256xf32, #tpu.memory_space<vmem>>, vector<8x256xf32>
    %cst = arith.constant dense<0.000000e+00> : vector<32x256xf32>
    %4 = tpu.matmul %2, %3, %cst {dimension_numbers = #tpu.dot_dimension_numbers<[1], [0], [0], [1], [0, 0, 1, 1], [], []>} : vector<32x8xf32>, vector<8x256xf32>, vector<32x256xf32> -> vector<32x256xf32>
    %5 = vector.broadcast %1 : vector<1x256xf32> to vector<32x256xf32>
    %6 = arith.subf %5, %4 : vector<32x256xf32>
    %c0_3 = arith.constant 0 : index
    %c0_4 = arith.constant 0 : index
    %7 = vector.load %arg2[%c0_3, %c0_4] : memref<32x256xf32, #tpu.memory_space<vmem>>, vector<32x256xf32>
    %8 = arith.mulf %6, %7 : vector<32x256xf32>
    %c0_5 = arith.constant 0 : index
    %c0_6 = arith.constant 0 : index
    %9 = vector.load %arg3[%c0_5, %c0_6] : memref<32x256xf32, #tpu.memory_space<vmem>>, vector<32x256xf32>
    %10 = arith.addf %8, %9 : vector<32x256xf32>
    %cst_7 = arith.constant dense<0xFF800000> : vector<256xf32>
    %11 = vector.multi_reduction <maximumf>, %10, %cst_7 [0] : vector<32x256xf32> to vector<256xf32>
    %12 = vector.shape_cast %11 : vector<256xf32> to vector<1x256xf32>
    %13 = vector.broadcast %12 : vector<1x256xf32> to vector<32x256xf32>
    %14 = arith.subf %10, %13 : vector<32x256xf32>
    %15 = math.exp %14 : vector<32x256xf32>
    %cst_8 = arith.constant dense<0.000000e+00> : vector<256xf32>
    %16 = vector.multi_reduction <add>, %15, %cst_8 [0] : vector<32x256xf32> to vector<256xf32>
    %17 = vector.shape_cast %16 : vector<256xf32> to vector<1x256xf32>
    %18 = math.log %17 : vector<1x256xf32>
    %19 = arith.addf %12, %18 : vector<1x256xf32>
    %cst_9 = arith.constant 2.000000e-01 : f32
    %20 = vector.broadcast %cst_9 : f32 to vector<1x256xf32>
    %21 = arith.mulf %20, %19 : vector<1x256xf32>
    %c0_10 = arith.constant 0 : index
    %c0_11 = arith.constant 0 : index
    %22 = vector.load %arg5[%c0_10, %c0_11] : memref<32x32xf32, #tpu.memory_space<vmem>>, vector<32x32xf32>
    %cst_12 = arith.constant dense<0.000000e+00> : vector<8x32xf32>
    %23 = tpu.matmul %0, %22, %cst_12 {dimension_numbers = #tpu.dot_dimension_numbers<[1], [0], [0], [1], [0, 0, 1, 1], [], []>} : vector<8x32xf32>, vector<32x32xf32>, vector<8x32xf32> -> vector<8x32xf32>
    %c0_13 = arith.constant 0 : index
    %c0_14 = arith.constant 0 : index
    %24 = vector.load %arg6[%c0_13, %c0_14] : memref<1x256xf32, #tpu.memory_space<vmem>>, vector<1x256xf32>
    %25 = arith.mulf %1, %24 : vector<1x256xf32>
    %26 = vector.shape_cast %23 : vector<8x32xf32> to vector<1x256xf32>
    %27 = arith.subf %25, %26 : vector<1x256xf32>
    %c0_15 = arith.constant 0 : index
    %c0_16 = arith.constant 0 : index
    %28 = vector.load %arg7[%c0_15, %c0_16] : memref<1x256xf32, #tpu.memory_space<vmem>>, vector<1x256xf32>
    %29 = arith.mulf %28, %21 : vector<1x256xf32>
    %cst_17 = arith.constant 1.000000e+00 : f32
    %30 = vector.broadcast %cst_17 : f32 to vector<1x256xf32>
    %31 = arith.subf %30, %28 : vector<1x256xf32>
    %32 = arith.mulf %31, %27 : vector<1x256xf32>
    %33 = arith.addf %29, %32 : vector<1x256xf32>
    %34 = vector.shape_cast %33 : vector<1x256xf32> to vector<1x1x256xf32>
    %c0_18 = arith.constant 0 : index
    %c0_19 = arith.constant 0 : index
    %c0_20 = arith.constant 0 : index
    %35 = vector.load %arg8[%c0_18, %c0_19, %c0_20] : memref<1x1x256xf32, #tpu.memory_space<vmem>>, vector<1x1x256xf32>
    tpu.vector_store %arg8[%c0_18, %c0_19, %c0_20], %34 {strides = array<i32>} : memref<1x1x256xf32, #tpu.memory_space<vmem>>, vector<1x1x256xf32>,
    return
  }
  func.func @transform_0(%arg0: i32) -> (i32, i32) {
    %c0_i32 = arith.constant 0 : i32
    %c0_i32_0 = arith.constant 0 : i32
    return %arg0, %c0_i32 : i32, i32
  }
  func.func @transform_1(%arg0: i32) -> (i32, i32) {
    %c0_i32 = arith.constant 0 : i32
    %c0_i32_0 = arith.constant 0 : i32
    %c0_i32_1 = arith.constant 0 : i32
    return %c0_i32, %c0_i32_0 : i32, i32
  }
  func.func @transform_2(%arg0: i32) -> (i32, i32) {
    %c0_i32 = arith.constant 0 : i32
    %c0_i32_0 = arith.constant 0 : i32
    %c0_i32_1 = arith.constant 0 : i32
    return %c0_i32, %c0_i32_0 : i32, i32
  }
  func.func @transform_3(%arg0: i32) -> (i32, i32) {
    %c0_i32 = arith.constant 0 : i32
    %c0_i32_0 = arith.constant 0 : i32
    %c0_i32_1 = arith.constant 0 : i32
    return %c0_i32, %c0_i32_0 : i32, i32
  }
  func.func @transform_4(%arg0: i32) -> (i32, i32) {
    %c0_i32 = arith.constant 0 : i32
    %c0_i32_0 = arith.constant 0 : i32
    %c0_i32_1 = arith.constant 0 : i32
    return %c0_i32, %c0_i32_0 : i32, i32
  }
  func.func @transform_5(%arg0: i32) -> (i32, i32) {
    %c0_i32 = arith.constant 0 : i32
    %c0_i32_0 = arith.constant 0 : i32
    %c0_i32_1 = arith.constant 0 : i32
    return %c0_i32, %c0_i32_0 : i32, i32
  }
  func.func @transform_6(%arg0: i32) -> (i32, i32) {
    %c0_i32 = arith.constant 0 : i32
    %c0_i32_0 = arith.constant 0 : i32
    %c0_i32_1 = arith.constant 0 : i32
    return %c0_i32, %c0_i32_0 : i32, i32
  }
  func.func @transform_7(%arg0: i32) -> (i32, i32, i32) {
    %c0_i32 = arith.constant 0 : i32
    %c0_i32_0 = arith.constant 0 : i32
    %c0_i32_1 = arith.constant 0 : i32
    return %arg0, %c0_i32, %c0_i32_0 : i32, i32, i32
  }
}

module attributes {stable_mosaic.version = 11 : i64} {
  func.func @_generic_kernel(%arg0: i32, %arg1: memref<8x32xf32, #tpu.memory_space<vmem>>, %arg2: memref<32x32xf32, #tpu.memory_space<vmem>>, %arg3: memref<32x32xf32, #tpu.memory_space<vmem>>, %arg4: memref<32x32xf32, #tpu.memory_space<vmem>>, %arg5: memref<1x32xf32, #tpu.memory_space<vmem>>, %arg6: memref<1x32xf32, #tpu.memory_space<vmem>>, %arg7: memref<8x64xf32, #tpu.memory_space<vmem>>) attributes {dimension_semantics = [#tpu.dimension_semantics<parallel>], iteration_bounds = array<i64: 2>, scalar_prefetch = 0 : i64, scratch_operands = 0 : i64, tpu.core_type = #tpu.core_type<tc>, window_params = [{transform_indices = @transform_0, window_bounds = array<i64: 8, 32>}, {pipeline_mode = #tpu.pipeline_mode<synchronous>, transform_indices = @transform_1, window_bounds = array<i64: 32, 32>}, {pipeline_mode = #tpu.pipeline_mode<synchronous>, transform_indices = @transform_2, window_bounds = array<i64: 32, 32>}, {pipeline_mode = #tpu.pipeline_mode<synchronous>, transform_indices = @transform_3, window_bounds = array<i64: 32, 32>}, {pipeline_mode = #tpu.pipeline_mode<synchronous>, transform_indices = @transform_4, window_bounds = array<i64: 1, 32>}, {pipeline_mode = #tpu.pipeline_mode<synchronous>, transform_indices = @transform_5, window_bounds = array<i64: 1, 32>}, {transform_indices = @transform_6, window_bounds = array<i64: 8, 64>}]} {
    %c0 = arith.constant 0 : index
    %c0_0 = arith.constant 0 : index
    %0 = vector.load %arg1[%c0, %c0_0] : memref<8x32xf32, #tpu.memory_space<vmem>>, vector<8x32xf32>
    %1 = vector.shape_cast %0 : vector<8x32xf32> to vector<8x32x1xf32>
    %2 = vector.shape_cast %0 : vector<8x32xf32> to vector<8x1x32xf32>
    %3 = vector.broadcast %1 : vector<8x32x1xf32> to vector<8x32x32xf32>
    %4 = vector.broadcast %2 : vector<8x1x32xf32> to vector<8x32x32xf32>
    %5 = arith.subf %3, %4 : vector<8x32x32xf32>
    %c0_1 = arith.constant 0 : index
    %c0_2 = arith.constant 0 : index
    %6 = vector.load %arg2[%c0_1, %c0_2] : memref<32x32xf32, #tpu.memory_space<vmem>>, vector<32x32xf32>
    %7 = vector.shape_cast %6 : vector<32x32xf32> to vector<1x32x32xf32>
    %8 = vector.broadcast %7 : vector<1x32x32xf32> to vector<8x32x32xf32>
    %9 = arith.mulf %5, %8 : vector<8x32x32xf32>
    %c0_3 = arith.constant 0 : index
    %c0_4 = arith.constant 0 : index
    %10 = vector.load %arg3[%c0_3, %c0_4] : memref<32x32xf32, #tpu.memory_space<vmem>>, vector<32x32xf32>
    %11 = vector.shape_cast %10 : vector<32x32xf32> to vector<1x32x32xf32>
    %12 = vector.broadcast %11 : vector<1x32x32xf32> to vector<8x32x32xf32>
    %13 = arith.addf %9, %12 : vector<8x32x32xf32>
    %cst = arith.constant dense<0xFF800000> : vector<8x32xf32>
    %14 = vector.multi_reduction <maximumf>, %13, %cst [2] : vector<8x32x32xf32> to vector<8x32xf32>
    %15 = vector.shape_cast %14 : vector<8x32xf32> to vector<8x32x1xf32>
    %16 = vector.broadcast %15 : vector<8x32x1xf32> to vector<8x32x32xf32>
    %17 = arith.subf %13, %16 : vector<8x32x32xf32>
    %18 = math.exp %17 : vector<8x32x32xf32>
    %cst_5 = arith.constant dense<0.000000e+00> : vector<8x32xf32>
    %19 = vector.multi_reduction <add>, %18, %cst_5 [2] : vector<8x32x32xf32> to vector<8x32xf32>
    %20 = vector.shape_cast %15 : vector<8x32x1xf32> to vector<8x32xf32>
    %21 = math.log %19 : vector<8x32xf32>
    %22 = arith.addf %20, %21 : vector<8x32xf32>
    %cst_6 = arith.constant 2.000000e-01 : f32
    %23 = vector.broadcast %cst_6 : f32 to vector<8x32xf32>
    %24 = arith.mulf %23, %22 : vector<8x32xf32>
    %c0_7 = arith.constant 0 : index
    %c0_8 = arith.constant 0 : index
    %25 = vector.load %arg5[%c0_7, %c0_8] : memref<1x32xf32, #tpu.memory_space<vmem>>, vector<1x32xf32>
    %26 = vector.broadcast %25 : vector<1x32xf32> to vector<8x32xf32>
    %27 = arith.mulf %0, %26 : vector<8x32xf32>
    %c0_9 = arith.constant 0 : index
    %c0_10 = arith.constant 0 : index
    %28 = vector.load %arg4[%c0_9, %c0_10] : memref<32x32xf32, #tpu.memory_space<vmem>>, vector<32x32xf32>
    %cst_11 = arith.constant dense<0.000000e+00> : vector<8x32xf32>
    %29 = tpu.matmul %0, %28, %cst_11 {dimension_numbers = #tpu.dot_dimension_numbers<[1], [0], [0], [1], [0, 0, 1, 1], [], []>} : vector<8x32xf32>, vector<32x32xf32>, vector<8x32xf32> -> vector<8x32xf32>
    %30 = arith.subf %27, %29 : vector<8x32xf32>
    %c0_12 = arith.constant 0 : index
    %c0_13 = arith.constant 0 : index
    %31 = vector.load %arg6[%c0_12, %c0_13] : memref<1x32xf32, #tpu.memory_space<vmem>>, vector<1x32xf32>
    %32 = vector.broadcast %31 : vector<1x32xf32> to vector<8x32xf32>
    %33 = arith.mulf %32, %24 : vector<8x32xf32>
    %cst_14 = arith.constant 1.000000e+00 : f32
    %34 = vector.broadcast %cst_14 : f32 to vector<1x32xf32>
    %35 = arith.subf %34, %31 : vector<1x32xf32>
    %36 = vector.broadcast %35 : vector<1x32xf32> to vector<8x32xf32>
    %37 = arith.mulf %36, %30 : vector<8x32xf32>
    %38 = arith.addf %33, %37 : vector<8x32xf32>
    %c0_15 = arith.constant 0 : index
    %c0_16 = arith.constant 0 : index
    %39 = vector.load %arg7[%c0_15, %c0_16] : memref<8x64xf32, #tpu.memory_space<vmem>>, vector<8x32xf32>
    tpu.vector_store %arg7[%c0_15, %c0_16], %0 {strides = array<i32>} : memref<8x64xf32, #tpu.memory_space<vmem>>, vector<8x32xf32>,
    %c0_17 = arith.constant 0 : index
    %c32 = arith.constant 32 : index
    %40 = vector.load %arg7[%c0_17, %c32] : memref<8x64xf32, #tpu.memory_space<vmem>>, vector<8x32xf32>
    tpu.vector_store %arg7[%c0_17, %c32], %38 {strides = array<i32>} : memref<8x64xf32, #tpu.memory_space<vmem>>, vector<8x32xf32>,
    return
  }
  func.func @transform_0(%arg0: i32) -> (i32, i32) {
    %c0_i32 = arith.constant 0 : i32
    %c0_i32_0 = arith.constant 0 : i32
    return %arg0, %c0_i32 : i32, i32
  }
  func.func @transform_1(%arg0: i32) -> (i32, i32) {
    %c0_i32 = arith.constant 0 : i32
    %c0_i32_0 = arith.constant 0 : i32
    %c0_i32_1 = arith.constant 0 : i32
    return %c0_i32, %c0_i32_0 : i32, i32
  }
  func.func @transform_2(%arg0: i32) -> (i32, i32) {
    %c0_i32 = arith.constant 0 : i32
    %c0_i32_0 = arith.constant 0 : i32
    %c0_i32_1 = arith.constant 0 : i32
    return %c0_i32, %c0_i32_0 : i32, i32
  }
  func.func @transform_3(%arg0: i32) -> (i32, i32) {
    %c0_i32 = arith.constant 0 : i32
    %c0_i32_0 = arith.constant 0 : i32
    %c0_i32_1 = arith.constant 0 : i32
    return %c0_i32, %c0_i32_0 : i32, i32
  }
  func.func @transform_4(%arg0: i32) -> (i32, i32) {
    %c0_i32 = arith.constant 0 : i32
    %c0_i32_0 = arith.constant 0 : i32
    %c0_i32_1 = arith.constant 0 : i32
    return %c0_i32, %c0_i32_0 : i32, i32
  }
  func.func @transform_5(%arg0: i32) -> (i32, i32) {
    %c0_i32 = arith.constant 0 : i32
    %c0_i32_0 = arith.constant 0 : i32
    %c0_i32_1 = arith.constant 0 : i32
    return %c0_i32, %c0_i32_0 : i32, i32
  }
  func.func @transform_6(%arg0: i32) -> (i32, i32) {
    %c0_i32 = arith.constant 0 : i32
    %c0_i32_0 = arith.constant 0 : i32
    return %arg0, %c0_i32 : i32, i32
  }
}

module attributes {stable_mosaic.version = 11 : i64} {
  func.func @_generic_kernel(%arg0: i32, %arg1: memref<8x32xf32, #tpu.memory_space<vmem>>, %arg2: memref<32x32xf32, #tpu.memory_space<vmem>>, %arg3: memref<32x32xf32, #tpu.memory_space<vmem>>, %arg4: memref<32x32xf32, #tpu.memory_space<vmem>>, %arg5: memref<1x32xf32, #tpu.memory_space<vmem>>, %arg6: memref<1x32xf32, #tpu.memory_space<vmem>>, %arg7: memref<8x64xf32, #tpu.memory_space<vmem>>) attributes {dimension_semantics = [#tpu.dimension_semantics<parallel>], iteration_bounds = array<i64: 2>, scalar_prefetch = 0 : i64, scratch_operands = 0 : i64, tpu.core_type = #tpu.core_type<tc>, window_params = [{transform_indices = @transform_0, window_bounds = array<i64: 8, 32>}, {pipeline_mode = #tpu.pipeline_mode<synchronous>, transform_indices = @transform_1, window_bounds = array<i64: 32, 32>}, {pipeline_mode = #tpu.pipeline_mode<synchronous>, transform_indices = @transform_2, window_bounds = array<i64: 32, 32>}, {pipeline_mode = #tpu.pipeline_mode<synchronous>, transform_indices = @transform_3, window_bounds = array<i64: 32, 32>}, {pipeline_mode = #tpu.pipeline_mode<synchronous>, transform_indices = @transform_4, window_bounds = array<i64: 1, 32>}, {pipeline_mode = #tpu.pipeline_mode<synchronous>, transform_indices = @transform_5, window_bounds = array<i64: 1, 32>}, {transform_indices = @transform_6, window_bounds = array<i64: 8, 64>}]} {
    %c0 = arith.constant 0 : index
    %c0_0 = arith.constant 0 : index
    %0 = vector.load %arg1[%c0, %c0_0] : memref<8x32xf32, #tpu.memory_space<vmem>>, vector<8x32xf32>
    %1 = vector.shape_cast %0 : vector<8x32xf32> to vector<8x32x1xf32>
    %2 = vector.shape_cast %0 : vector<8x32xf32> to vector<8x1x32xf32>
    %3 = vector.broadcast %1 : vector<8x32x1xf32> to vector<8x32x32xf32>
    %4 = vector.broadcast %2 : vector<8x1x32xf32> to vector<8x32x32xf32>
    %5 = arith.subf %3, %4 : vector<8x32x32xf32>
    %c0_1 = arith.constant 0 : index
    %c0_2 = arith.constant 0 : index
    %6 = vector.load %arg2[%c0_1, %c0_2] : memref<32x32xf32, #tpu.memory_space<vmem>>, vector<32x32xf32>
    %7 = vector.shape_cast %6 : vector<32x32xf32> to vector<1x32x32xf32>
    %8 = vector.broadcast %7 : vector<1x32x32xf32> to vector<8x32x32xf32>
    %9 = arith.mulf %5, %8 : vector<8x32x32xf32>
    %c0_3 = arith.constant 0 : index
    %c0_4 = arith.constant 0 : index
    %10 = vector.load %arg3[%c0_3, %c0_4] : memref<32x32xf32, #tpu.memory_space<vmem>>, vector<32x32xf32>
    %11 = vector.shape_cast %10 : vector<32x32xf32> to vector<1x32x32xf32>
    %12 = vector.broadcast %11 : vector<1x32x32xf32> to vector<8x32x32xf32>
    %13 = arith.addf %9, %12 : vector<8x32x32xf32>
    %cst = arith.constant dense<0xFF800000> : vector<8x32xf32>
    %14 = vector.multi_reduction <maximumf>, %13, %cst [2] : vector<8x32x32xf32> to vector<8x32xf32>
    %15 = vector.shape_cast %14 : vector<8x32xf32> to vector<8x32x1xf32>
    %16 = vector.broadcast %15 : vector<8x32x1xf32> to vector<8x32x32xf32>
    %17 = arith.subf %13, %16 : vector<8x32x32xf32>
    %18 = math.exp %17 : vector<8x32x32xf32>
    %cst_5 = arith.constant dense<0.000000e+00> : vector<8x32xf32>
    %19 = vector.multi_reduction <add>, %18, %cst_5 [2] : vector<8x32x32xf32> to vector<8x32xf32>
    %20 = vector.shape_cast %15 : vector<8x32x1xf32> to vector<8x32xf32>
    %21 = math.log %19 : vector<8x32xf32>
    %22 = arith.addf %20, %21 : vector<8x32xf32>
    %cst_6 = arith.constant 2.000000e-01 : f32
    %23 = vector.broadcast %cst_6 : f32 to vector<8x32xf32>
    %24 = arith.mulf %23, %22 : vector<8x32xf32>
    %c0_7 = arith.constant 0 : index
    %c0_8 = arith.constant 0 : index
    %25 = vector.load %arg5[%c0_7, %c0_8] : memref<1x32xf32, #tpu.memory_space<vmem>>, vector<1x32xf32>
    %26 = vector.broadcast %25 : vector<1x32xf32> to vector<8x32xf32>
    %27 = arith.mulf %0, %26 : vector<8x32xf32>
    %c0_9 = arith.constant 0 : index
    %c0_10 = arith.constant 0 : index
    %28 = vector.load %arg4[%c0_9, %c0_10] : memref<32x32xf32, #tpu.memory_space<vmem>>, vector<32x32xf32>
    %cst_11 = arith.constant dense<0.000000e+00> : vector<8x32xf32>
    %29 = tpu.matmul %0, %28, %cst_11 {dimension_numbers = #tpu.dot_dimension_numbers<[1], [0], [0], [1], [0, 0, 1, 1], [], []>} : vector<8x32xf32>, vector<32x32xf32>, vector<8x32xf32> -> vector<8x32xf32>
    %30 = arith.subf %27, %29 : vector<8x32xf32>
    %c0_12 = arith.constant 0 : index
    %c0_13 = arith.constant 0 : index
    %31 = vector.load %arg6[%c0_12, %c0_13] : memref<1x32xf32, #tpu.memory_space<vmem>>, vector<1x32xf32>
    %32 = vector.broadcast %31 : vector<1x32xf32> to vector<8x32xf32>
    %33 = arith.mulf %32, %24 : vector<8x32xf32>
    %cst_14 = arith.constant 1.000000e+00 : f32
    %34 = vector.broadcast %cst_14 : f32 to vector<1x32xf32>
    %35 = arith.subf %34, %31 : vector<1x32xf32>
    %36 = vector.broadcast %35 : vector<1x32xf32> to vector<8x32xf32>
    %37 = arith.mulf %36, %30 : vector<8x32xf32>
    %38 = arith.addf %33, %37 : vector<8x32xf32>
    %c0_15 = arith.constant 0 : index
    %c0_16 = arith.constant 0 : index
    %39 = vector.load %arg7[%c0_15, %c0_16] : memref<8x64xf32, #tpu.memory_space<vmem>>, vector<8x32xf32>
    tpu.vector_store %arg7[%c0_15, %c0_16], %0 {strides = array<i32>} : memref<8x64xf32, #tpu.memory_space<vmem>>, vector<8x32xf32>,
    %c0_17 = arith.constant 0 : index
    %c32 = arith.constant 32 : index
    %40 = vector.load %arg7[%c0_17, %c32] : memref<8x64xf32, #tpu.memory_space<vmem>>, vector<8x32xf32>
    tpu.vector_store %arg7[%c0_17, %c32], %38 {strides = array<i32>} : memref<8x64xf32, #tpu.memory_space<vmem>>, vector<8x32xf32>,
    return
  }
  func.func @transform_0(%arg0: i32) -> (i32, i32) {
    %c0_i32 = arith.constant 0 : i32
    %c0_i32_0 = arith.constant 0 : i32
    return %arg0, %c0_i32 : i32, i32
  }
  func.func @transform_1(%arg0: i32) -> (i32, i32) {
    %c0_i32 = arith.constant 0 : i32
    %c0_i32_0 = arith.constant 0 : i32
    %c0_i32_1 = arith.constant 0 : i32
    return %c0_i32, %c0_i32_0 : i32, i32
  }
  func.func @transform_2(%arg0: i32) -> (i32, i32) {
    %c0_i32 = arith.constant 0 : i32
    %c0_i32_0 = arith.constant 0 : i32
    %c0_i32_1 = arith.constant 0 : i32
    return %c0_i32, %c0_i32_0 : i32, i32
  }
  func.func @transform_3(%arg0: i32) -> (i32, i32) {
    %c0_i32 = arith.constant 0 : i32
    %c0_i32_0 = arith.constant 0 : i32
    %c0_i32_1 = arith.constant 0 : i32
    return %c0_i32, %c0_i32_0 : i32, i32
  }
  func.func @transform_4(%arg0: i32) -> (i32, i32) {
    %c0_i32 = arith.constant 0 : i32
    %c0_i32_0 = arith.constant 0 : i32
    %c0_i32_1 = arith.constant 0 : i32
    return %c0_i32, %c0_i32_0 : i32, i32
  }
  func.func @transform_5(%arg0: i32) -> (i32, i32) {
    %c0_i32 = arith.constant 0 : i32
    %c0_i32_0 = arith.constant 0 : i32
    %c0_i32_1 = arith.constant 0 : i32
    return %c0_i32, %c0_i32_0 : i32, i32
  }
  func.func @transform_6(%arg0: i32) -> (i32, i32) {
    %c0_i32 = arith.constant 0 : i32
    %c0_i32_0 = arith.constant 0 : i32
    return %arg0, %c0_i32 : i32, i32
  }
}

</mosaic_0001>

<bundles_post_ra>
// kernel: tpu_custom_call.1
= control target key start
LH: loop header
LB: loop body
LE: loop exit
PB: predicated region body
PF: predicated region fallthrough
CT: control target
= control target key end

     0   :  { %11 = vsyncpa [#allocation3], 0  ;;  %s2634_s0 = inlined_call_operand.hbm [shape: f32[16,32], index: 0, kind: input, shape index: {}]   ;;  %s2635_s1 = inlined_call_operand.hbm [shape: f32[32,32], index: 1, kind: input, shape index: {}]   ;;  %s2636_s2 = inlined_call_operand.hbm [shape: f32[32,32], index: 2, kind: input, shape index: {}]   ;;  %s2637_s3 = inlined_call_operand.hbm [shape: f32[32,32], index: 3, kind: input, shape index: {}]   ;;  %s2638_s4 = inlined_call_operand.vmem [shape: f32[1,32], index: 4, kind: input, shape index: {}]   ;;  %s2639_s5 = inlined_call_operand.vmem [shape: f32[1,32], index: 5, kind: input, shape index: {}]   ;;  %s2640_s6 = inlined_call_operand.hbm [shape: f32[16,64], index: 6, kind: output, shape index: {}]  }
   0x1   :  { %13 = vsyncpa [#allocation3 + $0x1], 0 }
   0x2   :  { %14 = vsyncpa [#allocation6], 0 }
   0x3   :  { %15 = vsyncpa [#allocation9], 0 }
   0x4   :  { %16 = vsyncpa [#allocation4], 0 }
   0x5   :  { %18 = vsyncpa [#allocation4 + $0x1], 0  ;;  %s1837_s21 = smov 0   ;;  %s1839_s22 = smov 0  }
   0x6   :  { %s1841_s23 = smov 0   ;;  %s1843_s24 = smov 0  }
   0x7 LB: > { %s197_s27 = sshll.u32 %s2635_s1, 4  ;;  %s1861_s28 = sadd.s32 4294967295, %s1794_s24   ;;  %s1794_s24 = sphi %s1843_s24, %s2651_s24   ;;  %s1790_s23 = sphi %s1841_s23, %s2650_s23   ;;  %s1786_s22 = sphi %s1839_s22, %s2649_s22   ;;  %s1782_s21 = sphi %s1837_s21, %s2648_s21   ;;  %s198_s27 = int_to_ptr.hbm [resolvable:$true] %s197_s27 }
   0x8   : > { %p1342_p0 = scmp.ge.s32.totalorder %s1794_s24, 1  ;;  %p45_p1 = scmp.eq.s32.totalorder %s1861_s28, 0 }
   0x9   : > { %p186_p2 = scmp.lt.s32.totalorder %s1794_s24, 3  ;;  %s1796_s30 = smov [#allocation5]  }
   0xa   : > { %s199_s7 = sshll.u32 %s1796_s30, 4  ;;  %s211_s10 = sshll.u32 %s2636_s2, 4  ;;  %s200_s7 = int_to_ptr.vmem [resolvable:$true] %s199_s7  ;;  %s212_s10 = int_to_ptr.hbm [resolvable:$true] %s211_s10 }
   0xb   : > { %p1866_p3 = pnand %p1342_p0, %p186_p2  ;;  %s225_s14 = sshll.u32 %s2637_s3, 4  ;;  %s226_s14 = int_to_ptr.hbm [resolvable:$true] %s225_s14 }
   0xc   : > { %s1797_s15 = smov [#allocation7]   ;;  %s1798_s17 = smov 128  }
   0xd   : > { %p1376_p4 = pneg %p1866_p3  ;;  %s213_s16 = sshll.u32 %s1797_s15, 4  ;;  %s214_s16 = int_to_ptr.vmem [resolvable:$true] %s213_s16 }
   0xe   : > { %s1799_s18 = smov 8   ;;  %s1800_s19 = smov [#allocation8]  }
   0xf   : > { %p1878_p6 = pnand %p1376_p4, %p45_p1  ;;  %s227_s20 = sshll.u32 %s1800_s19, 4  ;;  %s228_s20 = int_to_ptr.vmem [resolvable:$true] %s227_s20 }
  0x10   : > { %s1341_s25 = sadd.s32 4294967294, %s1794_s24   ;;  %s1893_s26 = sadd.s32 1, %s1794_s24  }
  0x11   : > { %1379 = dma.hbm_to_vmem [thread:$0]  (!%p1878_p6), %s198_s27, 512, %s200_s7, [#allocation6], %s1798_s17, %s1798_s17, %s1799_s18  }
  0x12   : > { %1382 = dma.hbm_to_vmem [thread:$0]  (!%p1878_p6), %s212_s10, 512, %s214_s16, [#allocation6], %s1798_s17, %s1798_s17, %s1799_s18  }
  0x13   : > { %1385 = dma.hbm_to_vmem [thread:$0]  (!%p1878_p6), %s226_s14, 512, %s228_s20, [#allocation9], %s1798_s17, %s1798_s17, %s1799_s18  }
  0x14   : > { %s31_s30 = sadd.s32 1, %s1790_s23  ;;  %s28_s27 = ssub.s32 %s1794_s24, %s1893_s26 }
  0x15   : > { %p38_p7 = scmp.ne.s32.totalorder %s1790_s23, %s1786_s22  ;;  %p29_p8 = scmp.eq.s32.totalorder %s28_s27, 0 }
  0x16   : > { %p39_p9 = scmp.eq.s32.totalorder %s1794_s24, 0  ;;  %p44_p10 = scmp.ne.s32.totalorder %s1786_s22, %s1782_s21 }
  0x17   : > { %p173_p11 = scmp.eq.s32.totalorder %s1861_s28, 1  ;;  %p179_p0 = scmp.eq.s32.totalorder %s1341_s25, 1 }
  0x18   : > { %s1905_s7 = scalar_select %p29_p8, %s1790_s23, %s31_s30  }
  0x19   : > { %p1909_p12 = por %p45_p1, %p44_p10  ;;  %p1913_p13 = por %p173_p11, %p38_p7 }
  0x1a   : > { %p40_p2 = por %p39_p9, %p38_p7  ;;  %s247_s10 = sand.u32 1, %s1790_s23  }
  0x1b   : > { %p1918_p4 = por %p179_p0, %p44_p10  ;;  %p1397_p6 = scmp.lt.s32.totalorder %s1794_s24, 2 }
  0x1c   : > { %s1347_s12 = sshll.u32 %s247_s10, 3  ;;  %s1348_s13 = sshll.u32 %s1794_s24, 3 }
  0x1d   : > { %s255_s16 = scalar_lea.hbm %s2634_s0, %s1348_s13  ;;  %s251_s18 = scalar_lea.vmem [#allocation2], %s1347_s12 }
  0x1e   : > { %s257_s17 = sshll.u32 %s255_s16, 4  ;;  %s259_s19 = sshll.u32 %s251_s18, 4  ;;  %s258_s17 = int_to_ptr.hbm [resolvable:$true] %s257_s17  ;;  %s260_s19 = int_to_ptr.vmem [resolvable:$true] %s259_s19 }
  0x1f   : > { %p1927_p8 = pnand %p1397_p6, %p40_p2  ;;  %s248_s25 = scalar_lea.sflag [#allocation3], %s247_s10 }
  0x20   : > { %s1690_s30 = sshra.s32 %s258_s17, 4  ;;  %s1697_s12 = scalar_lea.hbm %s2634_s0, 16  ;;  %s1691_s30 = int_to_ptr.hbm [resolvable:$true] %s1690_s30 }
  0x21   : > { %s1692_s27 = scalar_lea.hbm %s1691_s30, 8  ;;  %p1694_p9 = pneg %p1927_p8 }
  0x22   : > { %p1693_p7 = scmp.ne.s32.totalorder %s1691_s30, %s1692_s27  ;;  %p1698_p0 = scmp.lt.s32.totalorder %s1691_s30, %s2634_s0 }
  0x23   : > { %p1699_p2 = scmp.lt.s32.totalorder %s1697_s12, %s1692_s27 }
  0x24   : > { %p1695_p10 = pnand %p1694_p9, %p1693_p7 }
  0x25   : > { %p1700_p6 = por %p1699_p2, %p1698_p0 }
  0x26   : > { %p1696_p11 = pneg %p1695_p10 }
  0x28   : > { %p1701_p5 = pnand %p1700_p6, %p1696_p11 }
  0x2a   : > { %1704 = shalt.err (!%p1701_p5)
}
  0x2b   : > { %1389 = dma.hbm_to_vmem [thread:$0]  (!%p1927_p8), %s258_s17, 128, %s260_s19, %s248_s25  }
  0x2c   : > { %268 = sbr.rel (%p1866_p3) target bundleno = 759 (0x2f7), region = 44  ;;  %s1944_s10 = sand.u32 (!%p1866_p3), 1, %s1786_s22  }
  0x2d   : > { %s1350_s18 = sshll.u32 (!%p1866_p3), %s1944_s10, 3  ;;  %s271_s13 = scalar_lea.sflag (!%p1866_p3), [#allocation3], %s1944_s10 }
  0x2e   : > { %s274_s30 = scalar_lea.vmem (!%p1866_p3), [#allocation2], %s1350_s18 }
  0x31   : > { %1765 = dma.done.wait (%p1909_p12), %s271_s13, 128  }
  0x32   : > { %1767 = vsyncadd (%p1909_p12), %s271_s13, 4294967168 }
  0x33   : > { %1769 = dma.done.wait (%p45_p1), [#allocation6], 1024  }
  0x34   : > { %1771 = vsyncadd (%p45_p1), [#allocation6], 4294966272 }
  0x35   : > { %1773 = dma.done.wait (%p45_p1), [#allocation9], 512  }
  0x36   : > { %1775 = vsyncadd (%p45_p1), [#allocation9], 4294966784  ;;  %v321_v0 = vlaneseq  ;;  %v1974_v4 = vld [vmem:[%s274_s30] sm:$0xff]  ;;  %v2020_v18 = vld [vmem:[#allocation5 + $0x8] sm:$0xff]  ;;  %vm648_vm0 = vcmask 261120   ;;  %vm1138_vm1 = vcmask 130112  }
  0x37   : > { %v345_v5 = vperm.slane %v1974_v4, 1  ;;  %v1978_v6 = vperm.slane %v1974_v4, 0  ;;  %v395_v8 = vperm.slane %v1974_v4, 3  ;;  %v420_v9 = vperm.slane %v1974_v4, 4  ;;  %v2024_v22 = vld [vmem:[#allocation7 + $0x8] sm:$0xff]  ;;  %v2073_v47 = vld [vmem:[#allocation5] sm:$0xff] }
  0x38   : > { %v1963_v1 = vshrl.u32 %v321_v0, 7  ;;  %v445_v10 = vperm.slane %v1974_v4, 5  ;;  %v370_v11 = vperm.slane %v1974_v4, 2  ;;  %v2003_v12 = vperm.slane %v1974_v4, 7  ;;  %v2077_v50 = vld [vmem:[#allocation7] sm:$0xff]  ;;  %v2082_v52 = vld [vmem:[#allocation5 + $0x18] sm:$0xff] }
  0x39   : > { %v521_v13 = vrot.slane %v1974_v4, 1  ;;  %v470_v31 = vperm.slane %v1974_v4, 6  ;;  %v522_v36 = vrot.slane %v1974_v4, 2  ;;  %v2090_v56 = vld [vmem:[#allocation7 + $0x18] sm:$0xff]  ;;  %v523_v57 = vrot.slane %v1974_v4, 3  ;;  %s2547_s29 = scalar_lea.vmem [#allocation10], %s1350_s18 }
  0x3a   : > { %1441 = vset.pattern.permute.xlu2 %v1963_v1  ;;  %v1967_v2 = vadd.s32 16, %v1963_v1  ;;  %v1970_v3 = vadd.s32 8, %v1963_v1  ;;  %v1983_v7 = vadd.s32 24, %v1963_v1  ;;  %vm1142_vm2 = vcmask 195712   ;;  %1219 = vst.msk [vmem:[%s2547_s29] sm:$0xff] %vm648_vm0, %v1974_v4  ;;  %s1801_s14 = smov 32  }
  0x3b   : > { %v2010_v14 = vperm.slane %v521_v13, 0  ;;  %v2058_v37 = vperm.slane %v522_v36, 0  ;;  %v2097_v59 = vperm.slane %v523_v57, 0  ;;  %vm1146_vm3 = vcmask 261312   ;;  %s1357_s12 = sshll.u32 %s1861_s28, 3  ;;  %s1239_s13 = sshll.u32 %s2547_s29, 4  ;;  %s1240_s13 = int_to_ptr.vmem [resolvable:$true] %s1239_s13 }
  0x3c   : > { %1442 = vset.pattern.permute.xlu1 %v1967_v2  ;;  %1440 = vset.pattern.permute.xlu0 %v1970_v3  ;;  %vm1197_vm4 = vcmask 1041409   ;;  %vm1199_vm5 = vcmask 1042434   ;;  %vm1201_vm6 = vcmask 1043459   ;;  %vm1203_vm7 = vcmask 1044484   ;;  %s1237_s18 = scalar_lea.hbm %s2640_s6, %s1357_s12  ;;  %s1227_s8 = scalar_lea.sflag [#allocation4], %s1944_s10 }
  0x3d   : > { %vm1205_vm8 = vcmask 1045509   ;;  %vm1207_vm9 = vcmask 1046534   ;;  %vm1209_vm10 = vcmask 1047559   ;;  %s1241_s30 = sshll.u32 %s1237_s18, 4  ;;  %vm1224_vm11 = vcmask 523520   ;;  %s1740_s25 = scalar_lea.hbm %s2640_s6, 16  ;;  %s1242_s30 = int_to_ptr.hbm [resolvable:$true] %s1241_s30 }
  0x3e   : > { %s1734_s17 = sshra.s32 %s1242_s30, 4  ;;  %s1735_s17 = int_to_ptr.hbm [resolvable:$true] %s1734_s17 }
  0x3f   : > { %s1736_s19 = scalar_lea.hbm %s1735_s17, 8  ;;  %p1741_p12 = scmp.lt.s32.totalorder %s1735_s17, %s2640_s6 }
  0x40   : > { %p1737_p1 = scmp.ne.s32.totalorder %s1735_s17, %s1736_s19  ;;  %p1742_p8 = scmp.lt.s32.totalorder %s1740_s25, %s1736_s19 }
  0x42   : > { %350 = vperm.xlu2 %1441, %v345_v5   ;;  %p1738_p3 = pnand %p1737_p1, %p1913_p13  ;;  %p1743_p7 = por %p1742_p8, %p1741_p12 }
  0x44   : > { %337 = vperm.xlu1 %1442, %v1978_v6   ;;  %331 = vperm.xlu0 %1440, %v1978_v6   ;;  %p1739_p5 = pneg %p1738_p3 }
  0x46   : > { %p1744_p9 = pnand %p1743_p7, %p1739_p5 }
  0x4a   : > { %1444 = vset.pattern.permute.xlu2 %v1970_v3 }
  0x4c   : > { %1443 = vset.pattern.permute.xlu1 %v1983_v7  ;;  %406 = vperm.xlu0 %1440, %v395_v8  }
  0x52   : > { %356 = vperm.xlu2 %1444, %v345_v5  }
  0x54   : > { %343 = vperm.xlu1 %1443, %v1978_v6   ;;  %1455 = vset.pattern.permute.xlu0 %v1967_v2 }
  0x5a   : > { %1446 = vset.pattern.permute.xlu2 %v1983_v7 }
  0x5c   : > { %1445 = vset.pattern.permute.xlu1 %v1967_v2  ;;  %437 = vperm.xlu0 %1455, %v420_v9  }
  0x62   : > { %368 = vperm.xlu2 %1446, %v345_v5  }
  0x64   : > { %362 = vperm.xlu1 %1445, %v345_v5   ;;  %1460 = vset.pattern.permute.xlu0 %v1983_v7  ;;  %v2106_v5 = vld [vmem:[#allocation7 + $0x10] sm:$0xff] }
  0x6a   : > { %1448 = vset.pattern.permute.xlu2 %v1967_v2 }
  0x6c   : > { %1447 = vset.pattern.permute.xlu1 %v1970_v3  ;;  %468 = vperm.xlu0 %1460, %v445_v10  }
  0x72   : > { %387 = vperm.xlu2 %1448, %v370_v11  }
  0x74   : > { %381 = vperm.xlu1 %1447, %v370_v11   ;;  %1461 = vset.pattern.permute.xlu0 %v1963_v1 }
  0x7a   : > { %1450 = vset.pattern.permute.xlu2 %v1963_v1 }
  0x7c   : > { %1449 = vset.pattern.permute.xlu1 %v1983_v7  ;;  %325 = vperm.xlu0 %1461, %v1978_v6  }
  0x82   : > { %400 = vperm.xlu2 %1450, %v395_v8  }
  0x84   : > { %393 = vperm.xlu1 %1449, %v370_v11   ;;  %375 = vperm.xlu0 %1461, %v370_v11  }
  0x8a   : > { %1452 = vset.pattern.permute.xlu2 %v1983_v7 }
  0x8c   : > { %1451 = vset.pattern.permute.xlu1 %v1967_v2  ;;  %500 = vperm.xlu0 %1461, %v2003_v12  }
  0x92   : > { %418 = vperm.xlu2 %1452, %v395_v8  }
  0x94   : > { %412 = vperm.xlu1 %1451, %v395_v8   ;;  %1469 = vset.pattern.permute.xlu0 %v1983_v7 }
  0x9a   : > { %1454 = vset.pattern.permute.xlu2 %v1970_v3 }
  0x9c   : > { %1453 = vset.pattern.permute.xlu1 %v1963_v1  ;;  %v2014_v15 = vpop.permute.xlu2 %350 }
  0x9d   : > { %v548_v16 = vsub.f32 %v2014_v15, %v2010_v14 }
  0xa2   : > { %431 = vperm.xlu2 %1454, %v420_v9  }
  0xa4   : > { %425 = vperm.xlu1 %1453, %v420_v9  }
  0xaa   : > { %1457 = vset.pattern.permute.xlu2 %v1963_v1 }
  0xac   : > { %1456 = vset.pattern.permute.xlu1 %v1983_v7  ;;  %v357_v17 = vpop.permute.xlu2 %356 }
  0xad   : > { %v549_v21 = vsub.f32 %v357_v17, %v2010_v14 }
  0xaf   : > { %v585_v24 = vmul.f32 %v2020_v18, %v549_v21 }
  0xb1   : > { %v2036_v27 = vadd.f32 %v2024_v22, %v585_v24 }
  0xb2   : > { %450 = vperm.xlu2 %1457, %v445_v10  }
  0xb3   : > { %v664_v28 = vsel %vm648_vm0, %v2036_v27, -inf }
  0xb4   : > { %443 = vperm.xlu1 %1456, %v420_v9  }
  0xb6   : > { %v332_v19 = vpop.permute.xlu0 %331  ;;  %v2040_v29 = vpop.permute.xlu1 %337 }
  0xb7   : > { %v545_v20 = vsub.f32 %v332_v19, %v1978_v6  ;;  %v546_v24 = vsub.f32 %v2040_v29, %v1978_v6 }
  0xb9   : > { %v581_v23 = vmul.f32 %v2020_v18, %v545_v20 }
  0xba   : > { %1459 = vset.pattern.permute.xlu2 %v1967_v2 }
  0xbb   : > { %v2030_v25 = vadd.f32 %v2024_v22, %v581_v23 }
  0xbc   : > { %1458 = vset.pattern.permute.xlu1 %v1970_v3  ;;  %v369_v41 = vpop.permute.xlu2 %368 }
  0xbd   : > { %v652_v26 = vsel %vm648_vm0, %v2030_v25, -inf }
  0xbe   : > { %653 = vmax.xlane.f32.xlu0 %v652_v26  ;;  %v2047_v32 = vpop.permute.xlu0 %406  ;;  %v584_v26 = vmul.f32 %v2073_v47, %v548_v16 }
  0xc2   : > { %462 = vperm.xlu2 %1459, %v445_v10  }
  0xc4   : > { %456 = vperm.xlu1 %1458, %v445_v10  }
  0xc6   : > { %665 = vmax.xlane.f32.xlu0 %v664_v28  ;;  %v2044_v30 = vpop.permute.xlu1 %343 }
  0xc7   : > { %v547_v19 = vsub.f32 %v2044_v30, %v1978_v6 }
  0xc9   : > { %v583_v21 = vmul.f32 %v2082_v52, %v547_v19  ;;  %v526_v19 = vrot.slane %v1974_v4, 6 }
  0xca   : > { %1463 = vset.pattern.permute.xlu2 %v1970_v3 }
  0xcb   : > { %v2130_v23 = vadd.f32 %v2090_v56, %v583_v21 }
  0xcc   : > { %1462 = vset.pattern.permute.xlu1 %v1963_v1  ;;  %v2070_v43 = vpop.permute.xlu2 %387  ;;  %v2102_v1 = vld [vmem:[#allocation5 + $0x10] sm:$0xff] }
  0xcd   : > { %v658_v28 = vsel %vm648_vm0, %v2130_v23, -inf  ;;  %v582_v30 = vmul.f32 %v2102_v1, %v546_v24 }
  0xce   : > { %v2054_v35 = vpop.permute.xlu0 %437 }
  0xd2   : > { %481 = vperm.xlu2 %1463, %v470_v31  }
  0xd4   : > { %475 = vperm.xlu1 %1462, %v470_v31  }
  0xd6   : > { %v2049_v33 = vpop.permute.xlu1 %362 }
  0xd7   : > { %v550_v34 = vsub.f32 %v2049_v33, %v2010_v14 }
  0xd9   : > { %v586_v16 = vmul.f32 %v2102_v1, %v550_v34 }
  0xda   : > { %1465 = vset.pattern.permute.xlu2 %v1983_v7 }
  0xdc   : > { %1464 = vset.pattern.permute.xlu1 %v1967_v2  ;;  %v2088_v55 = vpop.permute.xlu2 %400 }
  0xde   : > { %v2060_v38 = vpop.permute.xlu0 %468 }
  0xe2   : > { %493 = vperm.xlu2 %1465, %v470_v31  }
  0xe4   : > { %487 = vperm.xlu1 %1464, %v470_v31   ;;  %v551_v31 = vsub.f32 %v369_v41, %v2010_v14  ;;  %v554_v41 = vsub.f32 %v2070_v43, %v2058_v37 }
  0xe6   : > { %v2062_v39 = vpop.permute.xlu1 %381  ;;  %v590_v14 = vmul.f32 %v2102_v1, %v554_v41 }
  0xe7   : > { %v553_v40 = vsub.f32 %v2062_v39, %v2058_v37  ;;  %v556_v39 = vsub.f32 %v2088_v55, %v2097_v59 }
  0xe9   : > { %v589_v34 = vmul.f32 %v2020_v18, %v553_v40 }
  0xea   : > { %1467 = vset.pattern.permute.xlu2 %v1967_v2 }
  0xec   : > { %1466 = vset.pattern.permute.xlu1 %v1970_v3  ;;  %v419_v62 = vpop.permute.xlu2 %418 }
  0xed   : > { %v559_v3 = vsub.f32 %v419_v62, %v2097_v59 }
  0xee   : > { %v326_v42 = vpop.permute.xlu0 %325 }
  0xef   : > { %v544_v8 = vsub.f32 %v326_v42, %v1978_v6  ;;  %v595_v9 = vmul.f32 %v2082_v52, %v559_v3  ;;  %v2143_v42 = vadd.f32 %v2077_v50, %v584_v26  ;;  %v587_v6 = vmul.f32 %v2082_v52, %v551_v31 }
  0xf1   : > { %v580_v11 = vmul.f32 %v2073_v47, %v544_v8  ;;  %v661_v15 = vsel %vm648_vm0, %v2143_v42, -inf }
  0xf2   : > { %512 = vperm.xlu2 %1467, %v2003_v12  }
  0xf3   : > { %v2120_v13 = vadd.f32 %v2077_v50, %v580_v11 }
  0xf4   : > { %506 = vperm.xlu1 %1466, %v2003_v12  }
  0xf5   : > { %v649_v20 = vsel %vm648_vm0, %v2120_v13, -inf }
  0xf6   : > { %v394_v44 = vpop.permute.xlu1 %393  ;;  %v376_v45 = vpop.permute.xlu0 %375 }
  0xf7   : > { %v552_v46 = vsub.f32 %v376_v45, %v2058_v37  ;;  %v555_v48 = vsub.f32 %v394_v44, %v2058_v37  ;;  %v2146_v44 = vadd.f32 %v2106_v5, %v582_v30  ;;  %v524_v37 = vrot.slane %v1974_v4, 4 }
  0xf9   : > { %v588_v49 = vmul.f32 %v2073_v47, %v552_v46  ;;  %v591_v53 = vmul.f32 %v2082_v52, %v555_v48  ;;  %v655_v29 = vsel %vm648_vm0, %v2146_v44, -inf  ;;  %v2162_v46 = vadd.f32 %v2090_v56, %v587_v6 }
  0xfa   : > { %v525_v48 = vrot.slane %v1974_v4, 5  ;;  %v532_v8 = vperm.slane %v524_v37, 0 }
  0xfb   : > { %v2080_v51 = vadd.f32 %v2077_v50, %v588_v49  ;;  %v2094_v58 = vadd.f32 %v2090_v56, %v591_v53  ;;  %v2166_v49 = vadd.f32 %v2106_v5, %v586_v16  ;;  %v670_v33 = vsel %vm648_vm0, %v2162_v46, -inf }
  0xfc   : > { %1468 = vset.pattern.permute.xlu1 %v1983_v7  ;;  %v2175_v43 = vperm.slane %v525_v48, 0  ;;  %v432_v57 = vpop.permute.xlu2 %431  ;;  %v562_v41 = vsub.f32 %v2054_v35, %v532_v8 }
  0xfd   : > { %v673_v54 = vsel %vm648_vm0, %v2080_v51, -inf  ;;  %v682_v60 = vsel %vm648_vm0, %v2094_v58, -inf  ;;  %v667_v53 = vsel %vm648_vm0, %v2166_v49, -inf }
  0xfe   : > { %674 = vmax.xlane.f32.xlu0 %v673_v54  ;;  %v557_v54 = vsub.f32 %v2047_v32, %v2097_v59 }
 0x100   : > { %v593_v32 = vmul.f32 %v2020_v18, %v557_v54  ;;  %v598_v54 = vmul.f32 %v2102_v1, %v562_v41 }
 0x104   : > { %518 = vperm.xlu1 %1468, %v2003_v12   ;;  %v2117_v12 = vadd.f32 %v2090_v56, %v595_v9  ;;  %v592_v9 = vmul.f32 %v2073_v47, %v556_v39 }
 0x106   : > { %v413_v61 = vpop.permute.xlu1 %412  ;;  %683 = vmax.xlane.f32.xlu0 %v682_v60  ;;  %v694_v17 = vsel %vm648_vm0, %v2117_v12, -inf  ;;  %v2208_v21 = vadd.f32 %v2077_v50, %v592_v9 }
 0x107   : > { %v558_v63 = vsub.f32 %v413_v61, %v2097_v59  ;;  %v2182_v61 = vadd.f32 %v2106_v5, %v590_v14 }
 0x108   : > { %v685_v31 = vsel %vm648_vm0, %v2208_v21, -inf }
 0x109   : > { %v594_v2 = vmul.f32 %v2102_v1, %v558_v63  ;;  %v2190_v63 = vadd.f32 %v2024_v22, %v589_v34 }
 0x10b   : > { %v2109_v7 = vadd.f32 %v2106_v5, %v594_v2  ;;  %v679_v2 = vsel %vm648_vm0, %v2182_v61, -inf  ;;  %v676_v55 = vsel %vm648_vm0, %v2190_v63, -inf }
 0x10c   : > { %v451_v11 = vpop.permute.xlu2 %450 }
 0x10d   : > { %v691_v10 = vsel %vm648_vm0, %v2109_v7, -inf  ;;  %v564_v6 = vsub.f32 %v451_v11, %v2175_v43 }
 0x10e   : > { %692 = vmax.xlane.f32.xlu0 %v691_v10  ;;  %v561_v10 = vsub.f32 %v432_v57, %v532_v8 }
 0x110   : > { %v597_v24 = vmul.f32 %v2020_v18, %v561_v10 }
 0x112   : > { %v2218_v16 = vadd.f32 %v2024_v22, %v597_v24 }
 0x114   : > { %v700_v34 = vsel %vm648_vm0, %v2218_v16, -inf }
 0x116   : > { %695 = vmax.xlane.f32.xlu0 %v694_v17  ;;  %v426_v36 = vpop.permute.xlu1 %425  ;;  %v2204_v17 = vadd.f32 %v2024_v22, %v593_v32 }
 0x118   : > { %v688_v26 = vsel %vm648_vm0, %v2204_v17, -inf }
 0x11b   : > { %650 = vmax.xlane.f32.xlu2 %v649_v20  ;;  %v560_v20 = vsub.f32 %v426_v36, %v532_v8 }
 0x11d   : > { %v596_v30 = vmul.f32 %v2073_v47, %v560_v20 }
 0x11f   : > { %v2223_v14 = vadd.f32 %v2077_v50, %v596_v30 }
 0x121   : > { %v697_v57 = vsel %vm648_vm0, %v2223_v14, -inf }
 0x123   : > { %659 = vmax.xlane.f32.xlu2 %v658_v28  ;;  %v534_v28 = vperm.slane %v526_v19, 0  ;;  %v527_v19 = vrot.slane %v1974_v4, 7 }
 0x126   : > { %v2159_v45 = vpop.permute.xlu1 %443 }
 0x127   : > { %v563_v39 = vsub.f32 %v2159_v45, %v532_v8 }
 0x129   : > { %v599_v9 = vmul.f32 %v2082_v52, %v563_v39 }
 0x12b   : > { %662 = vmax.xlane.f32.xlu2 %v661_v15  ;;  %v463_v15 = vpop.permute.xlu2 %462  ;;  %v2258_v30 = vadd.f32 %v2090_v56, %v599_v9 }
 0x12e   : > { %656 = vmax.xlane.f32.xlu1 %v655_v29 }
 0x133   : > { %671 = vmax.xlane.f32.xlu2 %v670_v33  ;;  %v600_v33 = vmul.f32 %v2073_v47, %v564_v6  ;;  %v535_v6 = vperm.slane %v527_v19, 0 }
 0x135   : > { %v2238_v37 = vadd.f32 %v2077_v50, %v600_v33 }
 0x136   : > { %668 = vmax.xlane.f32.xlu1 %v667_v53  ;;  %v457_v60 = vpop.permute.xlu1 %456 }
 0x137   : > { %v565_v62 = vsub.f32 %v457_v60, %v2175_v43  ;;  %v566_v60 = vsub.f32 %v463_v15, %v2175_v43 }
 0x139   : > { %v601_v40 = vmul.f32 %v2020_v18, %v565_v62  ;;  %v482_v62 = vpop.permute.xlu2 %481  ;;  %v602_v32 = vmul.f32 %v2102_v1, %v566_v60 }
 0x13a   : > { %v569_v20 = vsub.f32 %v482_v62, %v534_v28 }
 0x13b   : > { %680 = vmax.xlane.f32.xlu2 %v679_v2  ;;  %v2196_v3 = vadd.f32 %v2024_v22, %v601_v40  ;;  %v2242_v40 = vadd.f32 %v2106_v5, %v598_v54  ;;  %v709_v2 = vsel %vm648_vm0, %v2238_v37, -inf  ;;  %v2253_v8 = vadd.f32 %v2106_v5, %v602_v32 }
 0x13c   : > { %v605_v15 = vmul.f32 %v2020_v18, %v569_v20 }
 0x13d   : > { %v712_v59 = vsel %vm648_vm0, %v2196_v3, -inf }
 0x13e   : > { %677 = vmax.xlane.f32.xlu1 %v676_v55  ;;  %713 = vmax.xlane.f32.xlu0 %v712_v59  ;;  %v703_v55 = vsel %vm648_vm0, %v2242_v40, -inf  ;;  %v567_v59 = vsub.f32 %v2060_v38, %v2175_v43  ;;  %v715_v38 = vsel %vm648_vm0, %v2253_v8, -inf }
 0x141   : > { %v494_v45 = vpop.permute.xlu2 %493 }
 0x143   : > { %689 = vmax.xlane.f32.xlu2 %v688_v26  ;;  %v571_v26 = vsub.f32 %v494_v45, %v534_v28 }
 0x146   : > { %686 = vmax.xlane.f32.xlu1 %v685_v31  ;;  %v476_v36 = vpop.permute.xlu1 %475  ;;  %v603_v31 = vmul.f32 %v2082_v52, %v567_v59 }
 0x147   : > { %v568_v29 = vsub.f32 %v476_v36, %v534_v28  ;;  %v607_v36 = vmul.f32 %v2082_v52, %v571_v26 }
 0x148   : > { %v2273_v41 = vadd.f32 %v2090_v56, %v603_v31 }
 0x149   : > { %v604_v48 = vmul.f32 %v2073_v47, %v568_v29  ;;  %v2279_v54 = vadd.f32 %v2090_v56, %v607_v36 }
 0x14b   : > { %701 = vmax.xlane.f32.xlu2 %v700_v34  ;;  %v2229_v53 = vadd.f32 %v2077_v50, %v604_v48  ;;  %v501_v48 = vpop.permute.xlu0 %500  ;;  %v2276_v34 = vadd.f32 %v2024_v22, %v605_v15  ;;  %v730_v62 = vsel %vm648_vm0, %v2279_v54, -inf }
 0x14c   : > { %v572_v33 = vsub.f32 %v501_v48, %v535_v6  ;;  %v513_v32 = vpop.permute.xlu2 %512 }
 0x14d   : > { %v721_v35 = vsel %vm648_vm0, %v2229_v53, -inf  ;;  %v724_v60 = vsel %vm648_vm0, %v2276_v34, -inf  ;;  %v574_v59 = vsub.f32 %v513_v32, %v535_v6 }
 0x14e   : > { %698 = vmax.xlane.f32.xlu1 %v697_v57  ;;  %722 = vmax.xlane.f32.xlu0 %v721_v35  ;;  %v718_v57 = vsel %vm648_vm0, %v2273_v41, -inf  ;;  %v608_v35 = vmul.f32 %v2073_v47, %v572_v33 }
 0x153   : > { %710 = vmax.xlane.f32.xlu2 %v709_v2  ;;  %v2288_v9 = vpop.xlane.xlu0 %653 }
 0x154   : > { %v746_v45 = vsub.f32 %v2030_v25, %v2288_v9 }
 0x156   : > { %v488_v10 = vpop.permute.xlu1 %487  ;;  %704 = vmax.xlane.f32.xlu1 %v703_v55 }
 0x157   : > { %v570_v11 = vsub.f32 %v488_v10, %v534_v28  ;;  %v706_v28 = vsel %vm648_vm0, %v2258_v30, -inf  ;;  %v2292_v10 = vadd.f32 %v2077_v50, %v608_v35 }
 0x159   : > { %v606_v24 = vmul.f32 %v2102_v1, %v570_v11  ;;  %v610_v11 = vmul.f32 %v2102_v1, %v574_v59  ;;  %v733_v20 = vsel %vm648_vm0, %v2292_v10, -inf }
 0x15b   : > { %716 = vmax.xlane.f32.xlu2 %v715_v38  ;;  %v2264_v43 = vadd.f32 %v2106_v5, %v606_v24  ;;  %v2305_v50 = vadd.f32 %v2106_v5, %v610_v11  ;;  %v2316_v5 = vpop.xlane.xlu0 %665 }
 0x15d   : > { %v727_v29 = vsel %vm648_vm0, %v2264_v43, -inf }
 0x15e   : > { %707 = vmax.xlane.f32.xlu1 %v706_v28  ;;  %728 = vmax.xlane.f32.xlu0 %v727_v29 }
 0x163   : > { %719 = vmax.xlane.f32.xlu2 %v718_v57 }
 0x166   : > { %v507_v39 = vpop.permute.xlu1 %506  ;;  %725 = vmax.xlane.f32.xlu1 %v724_v60  ;;  %731 = vmax.xlane.f32.xlu0 %v730_v62 }
 0x167   : > { %v573_v2 = vsub.f32 %v507_v39, %v535_v6 }
 0x169   : > { %v609_v55 = vmul.f32 %v2020_v18, %v573_v2  ;;  %v779_v18 = vmul.f32 1.442695, %v746_v45 }
 0x16b   : > { %v2295_v47 = vadd.f32 %v2024_v22, %v609_v55  ;;  %1472 = vpow2.f32 %v779_v18  ;;  %v739_v22 = vsel %vm648_vm0, %v2305_v50, -inf }
 0x16d   : > { %v736_v19 = vsel %vm648_vm0, %v2295_v47, -inf }
 0x16e   : > { %737 = vmax.xlane.f32.xlu2 %v736_v19  ;;  %734 = vmax.xlane.f32.xlu1 %v733_v20 }
 0x171   : > { %v1473_v26 = vpop.eup %1472  ;;  %v2318_v36 = vpop.xlane.xlu0 %674 }
 0x172   : > { %v844_v15 = vsel %vm648_vm0, %v1473_v26, 0.0 }
 0x176   : > { %v519_v24 = vpop.permute.xlu1 %518  ;;  %740 = vmax.xlane.f32.xlu1 %v739_v22 }
 0x177   : > { %v575_v25 = vsub.f32 %v519_v24, %v535_v6 }
 0x179   : > { %v611_v1 = vmul.f32 %v2082_v52, %v575_v25 }
 0x17b   : > { %v2311_v31 = vadd.f32 %v2090_v56, %v611_v1  ;;  %v753_v56 = vsub.f32 %v2080_v51, %v2318_v36 }
 0x17d   : > { %v742_v38 = vsel %vm648_vm0, %v2311_v31, -inf  ;;  %v793_v29 = vmul.f32 1.442695, %v753_v56 }
 0x17e   : > { %743 = vmax.xlane.f32.xlu2 %v742_v38  ;;  %845 = vadd.xlane.f32.xlu1 %v844_v15  ;;  %v2356_v38 = vpop.xlane.xlu0 %683 }
 0x18e   : > { %v2320_v28 = vpop.xlane.xlu2 %650 }
 0x18f   : > { %v745_v52 = vsub.f32 %v2120_v13, %v2320_v28 }
 0x191   : > { %v777_v6 = vmul.f32 1.442695, %v745_v52 }
 0x193   : > { %1474 = vpow2.f32 %v777_v6 }
 0x194   : > { %1476 = vpow2.f32 %v793_v29 }
 0x196   : > { %v2326_v48 = vpop.xlane.xlu2 %659 }
 0x199   : > { %v1475_v33 = vpop.eup %1474 }
 0x19a   : > { %v841_v57 = vsel %vm648_vm0, %v1475_v33, 0.0  ;;  %v1477_v60 = vpop.eup %1476 }
 0x19b   : > { %842 = vadd.xlane.f32.xlu0 %v841_v57  ;;  %v865_v32 = vsel %vm648_vm0, %v1477_v60, 0.0 }
 0x19e   : > { %v2329_v35 = vpop.xlane.xlu2 %662 }
 0x19f   : > { %v749_v62 = vsub.f32 %v2143_v42, %v2329_v35 }
 0x1a1   : > { %v785_v13 = vmul.f32 1.442695, %v749_v62  ;;  %v2333_v39 = vpop.xlane.xlu1 %656 }
 0x1a2   : > { %v747_v51 = vsub.f32 %v2146_v44, %v2333_v39 }
 0x1a3   : > { %1478 = vpow2.f32 %v785_v13  ;;  %866 = vadd.xlane.f32.xlu0 %v865_v32 }
 0x1a4   : > { %v781_v2 = vmul.f32 1.442695, %v747_v51  ;;  %v2373_v51 = vpop.xlane.xlu0 %692 }
 0x1a6   : > { %1480 = vpow2.f32 %v781_v2  ;;  %v2338_v55 = vpop.xlane.xlu2 %671 }
 0x1a9   : > { %v1479_v59 = vpop.eup %1478  ;;  %v2340_v45 = vpop.xlane.xlu1 %668 }
 0x1aa   : > { %v853_v11 = vsel %vm648_vm0, %v1479_v59, 0.0  ;;  %v751_v56 = vsub.f32 %v2166_v49, %v2340_v45  ;;  %v750_v49 = vsub.f32 %v2036_v27, %v2316_v5 }
 0x1ab   : > { %854 = vadd.xlane.f32.xlu2 %v853_v11 }
 0x1ac   : > { %v1481_v42 = vpop.eup %1480  ;;  %v789_v33 = vmul.f32 1.442695, %v751_v56  ;;  %v787_v27 = vmul.f32 1.442695, %v750_v49 }
 0x1ad   : > { %v847_v19 = vsel %vm648_vm0, %v1481_v42, 0.0 }
 0x1ae   : > { %v2344_v20 = vpop.xlane.xlu2 %680  ;;  %848 = vadd.xlane.f32.xlu1 %v847_v19 }
 0x1af   : > { %v755_v22 = vsub.f32 %v2182_v61, %v2344_v20  ;;  %v756_v61 = vsub.f32 %v2094_v58, %v2356_v38  ;;  %v748_v58 = vsub.f32 %v2130_v23, %v2326_v48 }
 0x1b1   : > { %v2346_v44 = vpop.xlane.xlu1 %677  ;;  %v797_v1 = vmul.f32 1.442695, %v755_v22  ;;  %v799_v57 = vmul.f32 1.442695, %v756_v61  ;;  %v783_v42 = vmul.f32 1.442695, %v748_v58 }
 0x1b2   : > { %v754_v18 = vsub.f32 %v2190_v63, %v2346_v44 }
 0x1b4   : > { %v795_v24 = vmul.f32 1.442695, %v754_v18 }
 0x1b6   : > { %1482 = vpow2.f32 %v795_v24  ;;  %v2352_v25 = vpop.xlane.xlu2 %689 }
 0x1b7   : > { %1484 = vpow2.f32 %v797_v1  ;;  %v752_v1 = vsub.f32 %v2162_v46, %v2338_v55 }
 0x1b9   : > { %v2354_v26 = vpop.xlane.xlu1 %686 }
 0x1ba   : > { %v757_v15 = vsub.f32 %v2208_v21, %v2354_v26 }
 0x1bc   : > { %v1483_v52 = vpop.eup %1482  ;;  %v801_v63 = vmul.f32 1.442695, %v757_v15 }
 0x1bd   : > { %v868_v6 = vsel %vm648_vm0, %v1483_v52, 0.0  ;;  %v1485_v21 = vpop.eup %1484 }
 0x1be   : > { %1486 = vpow2.f32 %v801_v63  ;;  %v2365_v29 = vpop.xlane.xlu2 %701  ;;  %869 = vadd.xlane.f32.xlu1 %v868_v6  ;;  %v871_v11 = vsel %vm648_vm0, %v1485_v21, 0.0  ;;  %v2393_v63 = vpop.xlane.xlu0 %695  ;;  %v791_v6 = vmul.f32 1.442695, %v752_v1 }
 0x1bf   : > { %1488 = vpow2.f32 %v789_v33  ;;  %v762_v2 = vsub.f32 %v2218_v16, %v2365_v29  ;;  %v759_v16 = vsub.f32 %v2109_v7, %v2373_v51  ;;  %v760_v49 = vsub.f32 %v2117_v12, %v2393_v63 }
 0x1c0   : > { %1490 = vpow2.f32 %v799_v57 }
 0x1c1   : > { %v2367_v60 = vpop.xlane.xlu1 %698  ;;  %v811_v19 = vmul.f32 1.442695, %v762_v2  ;;  %v805_v7 = vmul.f32 1.442695, %v759_v16 }
 0x1c2   : > { %v761_v62 = vsub.f32 %v2223_v14, %v2367_v60 }
 0x1c4   : > { %v1487_v13 = vpop.eup %1486  ;;  %v809_v32 = vmul.f32 1.442695, %v761_v62 }
 0x1c5   : > { %v877_v59 = vsel %vm648_vm0, %v1487_v13, 0.0  ;;  %v1489_v23 = vpop.eup %1488  ;;  %v758_v13 = vsub.f32 %v2204_v17, %v2352_v25 }
 0x1c6   : > { %1492 = vpow2.f32 %v809_v32  ;;  %878 = vadd.xlane.f32.xlu2 %v877_v59  ;;  %v2381_v14 = vpop.xlane.xlu2 %710  ;;  %872 = vadd.xlane.f32.xlu1 %v871_v11  ;;  %v1491_v22 = vpop.eup %1490  ;;  %v859_v52 = vsel %vm648_vm0, %v1489_v23, 0.0 }
 0x1c7   : > { %1494 = vpow2.f32 %v787_v27  ;;  %v765_v15 = vsub.f32 %v2238_v37, %v2381_v14  ;;  %v874_v61 = vsel %vm648_vm0, %v1491_v22, 0.0  ;;  %v2408_v59 = vpop.xlane.xlu0 %713  ;;  %v807_v27 = vmul.f32 1.442695, %v760_v49 }
 0x1c8   : > { %1496 = vpow2.f32 %v783_v42  ;;  %v803_v12 = vmul.f32 1.442695, %v758_v13  ;;  %v766_v16 = vsub.f32 %v2196_v3, %v2408_v59 }
 0x1c9   : > { %v2383_v18 = vpop.xlane.xlu1 %704  ;;  %1498 = vpow2.f32 %v811_v19  ;;  %v817_v57 = vmul.f32 1.442695, %v765_v15 }
 0x1ca   : > { %1500 = vpow2.f32 %v805_v7  ;;  %v819_v7 = vmul.f32 1.442695, %v766_v16 }
 0x1cb   : > { %1502 = vpow2.f32 %v791_v6 }
 0x1cc   : > { %v1493_v24 = vpop.eup %1492  ;;  %1504 = vpow2.f32 %v817_v57 }
 0x1cd   : > { %v889_v56 = vsel %vm648_vm0, %v1493_v24, 0.0  ;;  %v1495_v46 = vpop.eup %1494  ;;  %1506 = vpow2.f32 %v807_v27  ;;  %v763_v24 = vsub.f32 %v2242_v40, %v2383_v18  ;;  %v1073_v27 = vld [vmem:[#allocation8 + $0x18] sm:$0xff] }
 0x1ce   : > { %860 = vadd.xlane.f32.xlu2 %v859_v52  ;;  %890 = vadd.xlane.f32.xlu0 %v889_v56  ;;  %v2396_v33 = vpop.xlane.xlu2 %716  ;;  %v1497_v37 = vpop.eup %1496  ;;  %v856_v2 = vsel %vm648_vm0, %v1495_v46, 0.0  ;;  %1508 = vpow2.f32 %v803_v12 }
 0x1cf   : > { %875 = vadd.xlane.f32.xlu1 %v874_v61  ;;  %v1499_v62 = vpop.eup %1498  ;;  %v767_v58 = vsub.f32 %v2253_v8, %v2396_v33  ;;  %v850_v32 = vsel %vm648_vm0, %v1497_v37, 0.0  ;;  %v2423_v56 = vpop.xlane.xlu0 %722  ;;  %v813_v3 = vmul.f32 1.442695, %v763_v24  ;;  %1088 = vmatpush.msra.mxu0 %v1073_v27 }
 0x1d0   : > { %v892_v11 = vsel %vm648_vm0, %v1499_v62, 0.0  ;;  %v1501_v42 = vpop.eup %1500  ;;  %v769_v62 = vsub.f32 %v2229_v53, %v2423_v56 }
 0x1d1   : > { %v2398_v21 = vpop.xlane.xlu1 %707  ;;  %v821_v19 = vmul.f32 1.442695, %v767_v58  ;;  %v1503_v23 = vpop.eup %1502  ;;  %v883_v52 = vsel %vm648_vm0, %v1501_v42, 0.0 }
 0x1d2   : > { %v1505_v8 = vpop.eup %1504  ;;  %v862_v15 = vsel %vm648_vm0, %v1503_v23, 0.0  ;;  %v764_v49 = vsub.f32 %v2258_v30, %v2398_v21  ;;  %v825_v53 = vmul.f32 1.442695, %v769_v62 }
 0x1d3   : > { %1510 = vpow2.f32 %v821_v19  ;;  %v901_v61 = vsel %vm648_vm0, %v1505_v8, 0.0  ;;  %v1507_v6 = vpop.eup %1506 }
 0x1d4   : > { %v1509_v57 = vpop.eup %1508  ;;  %1512 = vpow2.f32 %v819_v7  ;;  %v815_v12 = vmul.f32 1.442695, %v764_v49 }
 0x1d5   : > { %1514 = vpow2.f32 %v813_v3  ;;  %v880_v58 = vsel %vm648_vm0, %v1509_v57, 0.0 }
 0x1d6   : > { %851 = vadd.xlane.f32.xlu2 %v850_v32  ;;  %857 = vadd.xlane.f32.xlu0 %v856_v2  ;;  %v2413_v22 = vpop.xlane.xlu2 %719  ;;  %v886_v32 = vsel %vm648_vm0, %v1507_v6, 0.0 }
 0x1d7   : > { %893 = vadd.xlane.f32.xlu1 %v892_v11  ;;  %v768_v1 = vsub.f32 %v2273_v41, %v2413_v22  ;;  %v2438_v2 = vpop.xlane.xlu0 %728 }
 0x1d8   : > { %v771_v8 = vsub.f32 %v2264_v43, %v2438_v2 }
 0x1d9   : > { %v2411_v17 = vpop.xlane.xlu1 %725  ;;  %v823_v46 = vmul.f32 1.442695, %v768_v1  ;;  %v1511_v41 = vpop.eup %1510 }
 0x1da   : > { %v907_v11 = vsel %vm648_vm0, %v1511_v41, 0.0  ;;  %v1513_v30 = vpop.eup %1512  ;;  %v770_v16 = vsub.f32 %v2276_v34, %v2411_v17 }
 0x1db   : > { %1516 = vpow2.f32 %v823_v46  ;;  %v904_v1 = vsel %vm648_vm0, %v1513_v30, 0.0  ;;  %v1071_v46 = vld [vmem:[#allocation8 + $0x8] sm:$0xff] }
 0x1dc   : > { %1518 = vpow2.f32 %v825_v53  ;;  %v827_v7 = vmul.f32 1.442695, %v770_v16 }
 0x1dd   : > { %1520 = vpow2.f32 %v815_v12 }
 0x1de   : > { %863 = vadd.xlane.f32.xlu0 %v862_v15  ;;  %884 = vadd.xlane.f32.xlu2 %v883_v52  ;;  %v829_v52 = vmul.f32 1.442695, %v771_v8 }
 0x1df   : > { %902 = vadd.xlane.f32.xlu1 %v901_v61  ;;  %v1072_v61 = vld [vmem:[#allocation8 + $0x10] sm:$0xff]  ;;  %v2450_v3 = vpop.xlane.xlu0 %731 }
 0x1e0   : > { %1089 = vmatpush.msra.mxu0 %v1072_v61  ;;  %v772_v49 = vsub.f32 %v2279_v54, %v2450_v3  ;;  %v2466_v54 = vand.u32 127, %v321_v0 }
 0x1e1   : > { %v2426_v40 = vpop.xlane.xlu1 %734  ;;  %v2428_v37 = vpop.xlane.xlu2 %737 }
 0x1e2   : > { %v774_v13 = vsub.f32 %v2295_v47, %v2428_v37  ;;  %v1515_v47 = vpop.eup %1514  ;;  %1090 = vmatpush.msra.mxu0 %v1071_v46  ;;  %v831_v53 = vmul.f32 1.442695, %v772_v49 }
 0x1e3   : > { %v1517_v23 = vpop.eup %1516  ;;  %v895_v24 = vsel %vm648_vm0, %v1515_v47, 0.0 }
 0x1e4   : > { %v835_v42 = vmul.f32 1.442695, %v774_v13  ;;  %v910_v15 = vsel %vm648_vm0, %v1517_v23, 0.0  ;;  %v1519_v43 = vpop.eup %1518  ;;  %v1070_v13 = vld [vmem:[#allocation8] sm:$0xff]  ;;  %v2469_v23 = vadd.s32 4294967288, %v2466_v54 }
 0x1e5   : > { %v1521_v57 = vpop.eup %1520  ;;  %1091 = vmatpush.msra.mxu0 %v1070_v13  ;;  %v913_v27 = vsel %vm648_vm0, %v1519_v43, 0.0 }
 0x1e6   : > { %881 = vadd.xlane.f32.xlu0 %v880_v58  ;;  %887 = vadd.xlane.f32.xlu2 %v886_v32  ;;  %1522 = vpow2.f32 %v835_v42  ;;  %v773_v58 = vsub.f32 %v2292_v10, %v2426_v40 }
 0x1e7   : > { %908 = vadd.xlane.f32.xlu1 %v907_v11  ;;  %v898_v11 = vsel %vm648_vm0, %v1521_v57, 0.0  ;;  %1355 = vmatmul.msk.f32.vlgmr.msra.gmra.mxu0 %vm648_vm0, %v1974_v4 }
 0x1e8   : > { %v833_v12 = vmul.f32 1.442695, %v773_v58 }
 0x1e9   : > { %v2441_v19 = vpop.xlane.xlu1 %740 }
 0x1ec   : > { %v1523_v62 = vpop.eup %1522 }
 0x1ee   : > { %896 = vadd.xlane.f32.xlu0 %v895_v24  ;;  %905 = vadd.xlane.f32.xlu2 %v904_v1  ;;  %v775_v24 = vsub.f32 %v2305_v50, %v2441_v19 }
 0x1ef   : > { %911 = vadd.xlane.f32.xlu1 %v910_v15 }
 0x1f1   : > { %v2452_v6 = vpop.xlane.xlu2 %743  ;;  %v846_v34 = vpop.xlane.xlu1 %845 }
 0x1f2   : > { %v776_v41 = vsub.f32 %v2311_v31, %v2452_v6  ;;  %1524 = vlog2.f32 %v846_v34  ;;  %v928_v31 = vsel %vm648_vm0, %v1523_v62, 0.0 }
 0x1f3   : > { %1526 = vpow2.f32 %v829_v52 }
 0x1f4   : > { %1528 = vpow2.f32 %v827_v7  ;;  %v839_v32 = vmul.f32 1.442695, %v776_v41  ;;  %v837_v7 = vmul.f32 1.442695, %v775_v24 }
 0x1f6   : > { %1530 = vpow2.f32 %v839_v32  ;;  %899 = vadd.xlane.f32.xlu0 %v898_v11  ;;  %914 = vadd.xlane.f32.xlu2 %v913_v27 }
 0x1f7   : > { %929 = vadd.xlane.f32.xlu1 %v928_v31  ;;  %1532 = vpow2.f32 %v831_v53 }
 0x1f8   : > { %v1525_v10 = vpop.eup %1524  ;;  %1534 = vpow2.f32 %v833_v12 }
 0x1f9   : > { %v1527_v30 = vpop.eup %1526  ;;  %v940_v42 = vmul.f32 0.6931472, %v1525_v10  ;;  %1536 = vpow2.f32 %v837_v7 }
 0x1fa   : > { %v1529_v47 = vpop.eup %1528  ;;  %v919_v52 = vsel %vm648_vm0, %v1527_v30, 0.0 }
 0x1fb   : > { %v1002_v8 = vadd.f32 %v940_v42, %v2288_v9  ;;  %v916_v1 = vsel %vm648_vm0, %v1529_v47, 0.0 }
 0x1fc   : > { %v1531_v16 = vpop.eup %1530 }
 0x1fd   : > { %v1034_v0 = vmul.f32 0.2, %v1002_v8  ;;  %v934_v15 = vsel %vm648_vm0, %v1531_v16, 0.0  ;;  %v1533_v43 = vpop.eup %1532 }
 0x1fe   : > { %917 = vadd.xlane.f32.xlu0 %v916_v1  ;;  %920 = vadd.xlane.f32.xlu2 %v919_v52  ;;  %v1535_v9 = vpop.eup %1534  ;;  %v922_v50 = vsel %vm648_vm0, %v1533_v43, 0.0 }
 0x1ff   : > { %v1137_v61 = vperm.slane %v1034_v0, %v2469_v23  ;;  %935 = vadd.xlane.f32.xlu1 %v934_v15  ;;  %v925_v34 = vsel %vm648_vm0, %v1535_v9, 0.0  ;;  %v1537_v46 = vpop.eup %1536  ;;  %v2490_v15 = vadd.s32 4294967280, %v2466_v54 }
 0x200   : > { %v931_v57 = vsel %vm648_vm0, %v1537_v46, 0.0 }
 0x206   : > { %926 = vadd.xlane.f32.xlu0 %v925_v34  ;;  %923 = vadd.xlane.f32.xlu2 %v922_v50 }
 0x20e   : > { %932 = vadd.xlane.f32.xlu0 %v931_v57  ;;  %v843_v41 = vpop.xlane.xlu0 %842 }
 0x20f   : > { %1538 = vlog2.f32 %v843_v41 }
 0x215   : > { %v1539_v62 = vpop.eup %1538 }
 0x216   : > { %v938_v49 = vmul.f32 0.6931472, %v1539_v62  ;;  %v867_v13 = vpop.xlane.xlu0 %866 }
 0x217   : > { %1540 = vlog2.f32 %v867_v13 }
 0x218   : > { %v1001_v58 = vadd.f32 %v938_v49, %v2320_v28 }
 0x21a   : > { %v1033_v32 = vmul.f32 0.2, %v1001_v58 }
 0x21c   : > { %v1135_v11 = vperm.slane %v1033_v32, %v2466_v54 }
 0x21d   : > { %v1541_v27 = vpop.eup %1540 }
 0x21e   : > { %v1139_v31 = vsel %vm1138_vm1, %v1137_v61, %v1135_v11  ;;  %v954_v53 = vmul.f32 0.6931472, %v1541_v27  ;;  %v855_v10 = vpop.xlane.xlu2 %854 }
 0x21f   : > { %1542 = vlog2.f32 %v855_v10 }
 0x220   : > { %v1009_v12 = vadd.f32 %v954_v53, %v2318_v36 }
 0x221   : > { %v849_v30 = vpop.xlane.xlu1 %848 }
 0x222   : > { %v1041_v42 = vmul.f32 0.2, %v1009_v12  ;;  %1544 = vlog2.f32 %v849_v30 }
 0x224   : > { %v1155_v47 = vperm.slane %v1041_v42, %v2466_v54 }
 0x225   : > { %v1543_v8 = vpop.eup %1542 }
 0x226   : > { %v946_v16 = vmul.f32 0.6931472, %v1543_v8 }
 0x228   : > { %v1545_v28 = vpop.eup %1544  ;;  %v1005_v24 = vadd.f32 %v946_v16, %v2329_v35  ;;  %v2504_v16 = vadd.s32 4294967272, %v2466_v54 }
 0x229   : > { %v942_v0 = vmul.f32 0.6931472, %v1545_v28 }
 0x22a   : > { %v2487_v1 = vmul.f32 0.2, %v1005_v24 }
 0x22b   : > { %v1003_v52 = vadd.f32 %v942_v0, %v2333_v39 }
 0x22c   : > { %v1148_v36 = vperm.slane %v2487_v1, %v2466_v54 }
 0x22d   : > { %v1035_v61 = vmul.f32 0.2, %v1003_v52 }
 0x22f   : > { %v1141_v7 = vperm.slane %v1035_v61, %v2490_v15 }
 0x231   : > { %v1143_v43 = vsel %vm1142_vm2, %v1141_v7, %v1139_v31  ;;  %v870_v9 = vpop.xlane.xlu1 %869 }
 0x232   : > { %1546 = vlog2.f32 %v870_v9 }
 0x238   : > { %v1547_v35 = vpop.eup %1546 }
 0x239   : > { %v956_v34 = vmul.f32 0.6931472, %v1547_v35  ;;  %v879_v50 = vpop.xlane.xlu2 %878  ;;  %v873_v46 = vpop.xlane.xlu1 %872 }
 0x23a   : > { %1548 = vlog2.f32 %v873_v46 }
 0x23b   : > { %v1010_v57 = vadd.f32 %v956_v34, %v2346_v44 }
 0x23d   : > { %v1042_v41 = vmul.f32 0.2, %v1010_v57 }
 0x23f   : > { %v1156_v39 = vperm.slane %v1042_v41, %v2469_v23 }
 0x240   : > { %v1549_v62 = vpop.eup %1548 }
 0x241   : > { %v1157_v49 = vsel %vm1138_vm1, %v1156_v39, %v1155_v47  ;;  %v861_v13 = vpop.xlane.xlu2 %860  ;;  %v891_v58 = vpop.xlane.xlu0 %890  ;;  %v958_v32 = vmul.f32 0.6931472, %v1549_v62 }
 0x242   : > { %v876_v11 = vpop.xlane.xlu1 %875 }
 0x243   : > { %1550 = vlog2.f32 %v876_v11  ;;  %v1011_v27 = vadd.f32 %v958_v32, %v2344_v20 }
 0x244   : > { %1552 = vlog2.f32 %v861_v13 }
 0x245   : > { %v1043_v31 = vmul.f32 0.2, %v1011_v27 }
 0x247   : > { %v1158_v53 = vperm.slane %v1043_v31, %v2490_v15 }
 0x249   : > { %v1551_v10 = vpop.eup %1550  ;;  %v852_v44 = vpop.xlane.xlu2 %851  ;;  %v1159_v30 = vsel %vm1142_vm2, %v1158_v53, %v1157_v49 }
 0x24a   : > { %v858_v12 = vpop.xlane.xlu0 %857  ;;  %v960_v42 = vmul.f32 0.6931472, %v1551_v10  ;;  %1554 = vlog2.f32 %v852_v44  ;;  %v894_v8 = vpop.xlane.xlu1 %893 }
 0x24b   : > { %v1553_v47 = vpop.eup %1552  ;;  %1556 = vlog2.f32 %v858_v12 }
 0x24c   : > { %v1012_v28 = vadd.f32 %v960_v42, %v2356_v38  ;;  %v950_v20 = vmul.f32 0.6931472, %v1553_v47  ;;  %1558 = vlog2.f32 %v879_v50 }
 0x24e   : > { %v1044_v24 = vmul.f32 0.2, %v1012_v28  ;;  %v1007_v34 = vadd.f32 %v950_v20, %v2340_v45 }
 0x250   : > { %v1555_v0 = vpop.eup %1554  ;;  %v1160_v52 = vperm.slane %v1044_v24, %v2504_v16  ;;  %v1039_v49 = vmul.f32 0.2, %v1007_v34 }
 0x251   : > { %v944_v61 = vmul.f32 0.6931472, %v1555_v0  ;;  %v885_v7 = vpop.xlane.xlu2 %884  ;;  %v1557_v35 = vpop.eup %1556 }
 0x252   : > { %v864_v9 = vpop.xlane.xlu0 %863  ;;  %v1161_v46 = vsel %vm1146_vm3, %v1160_v52, %v1159_v30  ;;  %v903_v57 = vpop.xlane.xlu1 %902  ;;  %v948_v38 = vmul.f32 0.6931472, %v1557_v35 }
 0x253   : > { %v1004_v41 = vadd.f32 %v944_v61, %v2326_v48  ;;  %1560 = vlog2.f32 %v864_v9  ;;  %v1559_v11 = vpop.eup %1558  ;;  %v1151_v48 = vperm.slane %v1039_v49, %v2490_v15 }
 0x254   : > { %v1006_v62 = vadd.f32 %v948_v38, %v2316_v5  ;;  %1562 = vlog2.f32 %v885_v7 }
 0x255   : > { %v1036_v39 = vmul.f32 0.2, %v1004_v41 }
 0x256   : > { %v1038_v32 = vmul.f32 0.2, %v1006_v62 }
 0x257   : > { %v1145_v13 = vperm.slane %v1036_v39, %v2504_v16 }
 0x258   : > { %v1149_v45 = vperm.slane %v1038_v32, %v2469_v23 }
 0x259   : > { %v1147_v27 = vsel %vm1146_vm3, %v1145_v13, %v1143_v43  ;;  %v888_v31 = vpop.xlane.xlu2 %887  ;;  %v1561_v50 = vpop.eup %1560  ;;  %v962_v43 = vmul.f32 0.6931472, %v1559_v11 }
 0x25a   : > { %v882_v53 = vpop.xlane.xlu0 %881  ;;  %v909_v10 = vpop.xlane.xlu1 %908  ;;  %1564 = vlog2.f32 %v888_v31  ;;  %v1150_v5 = vsel %vm1138_vm1, %v1149_v45, %v1148_v36  ;;  %v952_v12 = vmul.f32 0.6931472, %v1561_v50 }
 0x25b   : > { %v1563_v44 = vpop.eup %1562  ;;  %v1152_v30 = vsel %vm1142_vm2, %v1151_v48, %v1150_v5  ;;  %1566 = vlog2.f32 %v882_v53  ;;  %v1013_v24 = vadd.f32 %v962_v43, %v2354_v26 }
 0x25c   : > { %v1008_v42 = vadd.f32 %v952_v12, %v2338_v55  ;;  %1568 = vlog2.f32 %v894_v8  ;;  %v966_v47 = vmul.f32 0.6931472, %v1563_v44 }
 0x25d   : > { %1570 = vlog2.f32 %v903_v57  ;;  %v1045_v57 = vmul.f32 0.2, %v1013_v24 }
 0x25e   : > { %v1040_v28 = vmul.f32 0.2, %v1008_v42  ;;  %1572 = vlog2.f32 %v891_v58  ;;  %v1015_v7 = vadd.f32 %v966_v47, %v2373_v51 }
 0x25f   : > { %1574 = vlog2.f32 %v909_v10  ;;  %v1162_v31 = vperm.slane %v1045_v57, %v2466_v54 }
 0x260   : > { %v1565_v20 = vpop.eup %1564  ;;  %v1153_v1 = vperm.slane %v1040_v28, %v2504_v16  ;;  %v1047_v51 = vmul.f32 0.2, %v1015_v7 }
 0x261   : > { %v968_v36 = vmul.f32 0.6931472, %v1565_v20  ;;  %v906_v0 = vpop.xlane.xlu2 %905  ;;  %v1567_v61 = vpop.eup %1566 }
 0x262   : > { %v897_v52 = vpop.xlane.xlu0 %896  ;;  %v912_v55 = vpop.xlane.xlu1 %911  ;;  %1576 = vlog2.f32 %v906_v0  ;;  %v1154_v8 = vsel %vm1146_vm3, %v1153_v1, %v1152_v30  ;;  %v964_v58 = vmul.f32 0.6931472, %v1567_v61 }
 0x263   : > { %v1016_v9 = vadd.f32 %v968_v36, %v2393_v63  ;;  %1578 = vlog2.f32 %v912_v55  ;;  %v1569_v35 = vpop.eup %1568  ;;  %v1198_v26 = vsel %vm1197_vm4, %v1154_v8, %v1147_v27 }
 0x264   : > { %1580 = vlog2.f32 %v897_v52  ;;  %v1571_v34 = vpop.eup %1570  ;;  %v1200_v41 = vsel %vm1199_vm5, %v1161_v46, %v1198_v26  ;;  %v1014_v38 = vadd.f32 %v964_v58, %v2352_v25  ;;  %v972_v11 = vmul.f32 0.6931472, %v1569_v35 }
 0x265   : > { %v1573_v39 = vpop.eup %1572  ;;  %v1048_v49 = vmul.f32 0.2, %v1016_v9  ;;  %v978_v45 = vmul.f32 0.6931472, %v1571_v34  ;;  %v1165_v25 = vperm.slane %v1047_v51, %v2490_v15 }
 0x266   : > { %v1575_v62 = vpop.eup %1574  ;;  %v1046_v13 = vmul.f32 0.2, %v1014_v38  ;;  %v970_v53 = vmul.f32 0.6931472, %v1573_v39  ;;  %v1018_v42 = vadd.f32 %v972_v11, %v2365_v29 }
 0x267   : > { %v982_v44 = vmul.f32 0.6931472, %v1575_v62  ;;  %v1167_v5 = vperm.slane %v1048_v49, %v2504_v16  ;;  %v1021_v47 = vadd.f32 %v978_v45, %v2381_v14 }
 0x268   : > { %v1577_v32 = vpop.eup %1576  ;;  %v1163_v27 = vperm.slane %v1046_v13, %v2469_v23  ;;  %v1017_v24 = vadd.f32 %v970_v53, %v2367_v60  ;;  %v1050_v61 = vmul.f32 0.2, %v1018_v42 }
 0x269   : > { %v1579_v63 = vpop.eup %1578  ;;  %v980_v50 = vmul.f32 0.6931472, %v1577_v32  ;;  %v915_v48 = vpop.xlane.xlu2 %914  ;;  %v1023_v29 = vadd.f32 %v982_v44, %v2396_v33  ;;  %v1053_v14 = vmul.f32 0.2, %v1021_v47 }
 0x26a   : > { %v900_v10 = vpop.xlane.xlu0 %899  ;;  %v1581_v46 = vpop.eup %1580  ;;  %v1164_v12 = vsel %vm1138_vm1, %v1163_v27, %v1162_v31  ;;  %v984_v36 = vmul.f32 0.6931472, %v1579_v63  ;;  %v1049_v7 = vmul.f32 0.2, %v1017_v24  ;;  %v1170_v34 = vperm.slane %v1050_v61, %v2469_v23 }
 0x26b   : > { %v1022_v30 = vadd.f32 %v980_v50, %v2408_v59  ;;  %v974_v43 = vmul.f32 0.6931472, %v1581_v46  ;;  %v1166_v28 = vsel %vm1142_vm2, %v1165_v25, %v1164_v12  ;;  %v930_v20 = vpop.xlane.xlu1 %929  ;;  %1582 = vlog2.f32 %v900_v10 }
 0x26c   : > { %v1168_v1 = vsel %vm1146_vm3, %v1167_v5, %v1166_v28  ;;  %1584 = vlog2.f32 %v915_v48  ;;  %v1024_v60 = vadd.f32 %v984_v36, %v2413_v22  ;;  %v1055_v26 = vmul.f32 0.2, %v1023_v29 }
 0x26d   : > { %v1054_v0 = vmul.f32 0.2, %v1022_v30  ;;  %v1019_v52 = vadd.f32 %v974_v43, %v2383_v18  ;;  %v1202_v59 = vsel %vm1201_vm6, %v1168_v1, %v1200_v41  ;;  %v1176_v57 = vperm.slane %v1053_v14, %v2466_v54 }
 0x26e   : > { %v1169_v41 = vperm.slane %v1049_v7, %v2466_v54  ;;  %v1056_v38 = vmul.f32 0.2, %v1024_v60  ;;  %v1179_v49 = vperm.slane %v1055_v26, %v2490_v15 }
 0x26f   : > { %v1177_v58 = vperm.slane %v1054_v0, %v2469_v23  ;;  %v1051_v35 = vmul.f32 0.2, %v1019_v52 }
 0x270   : > { %v1171_v45 = vsel %vm1138_vm1, %v1170_v34, %v1169_v41  ;;  %v1181_v48 = vperm.slane %v1056_v38, %v2504_v16 }
 0x271   : > { %v921_v55 = vpop.xlane.xlu2 %920  ;;  %v1583_v9 = vpop.eup %1582  ;;  %v1178_v39 = vsel %vm1138_vm1, %v1177_v58, %v1176_v57  ;;  %v1172_v51 = vperm.slane %v1051_v35, %v2490_v15  ;;  %v1470_v58 = vld [vmem:[%s2638_s4] ss:$0 sm:$0xff] }
 0x272   : > { %v918_v8 = vpop.xlane.xlu0 %917  ;;  %1586 = vlog2.f32 %v921_v55  ;;  %v976_v18 = vmul.f32 0.6931472, %v1583_v9  ;;  %v1585_v33 = vpop.eup %1584  ;;  %v1180_v63 = vsel %vm1142_vm2, %v1179_v49, %v1178_v39 }
 0x273   : > { %1588 = vlog2.f32 %v918_v8  ;;  %v936_v62 = vpop.xlane.xlu1 %935  ;;  %v986_v13 = vmul.f32 0.6931472, %v1585_v33  ;;  %v1173_v10 = vsel %vm1142_vm2, %v1172_v51, %v1171_v45  ;;  %v1182_v30 = vsel %vm1146_vm3, %v1181_v48, %v1180_v63  ;;  %v1093_v51 = vpop.f32.mrf.mxu0 }
 0x274   : > { %v1020_v22 = vadd.f32 %v976_v18, %v2398_v21  ;;  %1590 = vlog2.f32 %v930_v20 }
 0x275   : > { %1592 = vlog2.f32 %v936_v62  ;;  %v1025_v46 = vadd.f32 %v986_v13, %v2423_v56 }
 0x276   : > { %v1052_v32 = vmul.f32 0.2, %v1020_v22  ;;  %v1069_v22 = vmul.f32 %v1470_v58, %v1974_v4 }
 0x277   : > { %v1057_v20 = vmul.f32 0.2, %v1025_v46 }
 0x278   : > { %v1587_v11 = vpop.eup %1586  ;;  %v1174_v21 = vperm.slane %v1052_v32, %v2504_v16  ;;  %v1096_v32 = vsub.f32 %v1069_v22, %v1093_v51 }
 0x279   : > { %v990_v31 = vmul.f32 0.6931472, %v1587_v11  ;;  %v924_v53 = vpop.xlane.xlu2 %923  ;;  %v1589_v50 = vpop.eup %1588 }
 0x27a   : > { %v927_v27 = vpop.xlane.xlu0 %926  ;;  %1594 = vlog2.f32 %v924_v53  ;;  %v1175_v25 = vsel %vm1146_vm3, %v1174_v21, %v1173_v10  ;;  %v988_v44 = vmul.f32 0.6931472, %v1589_v50  ;;  %v1591_v47 = vpop.eup %1590 }
 0x27b   : > { %1596 = vlog2.f32 %v927_v27  ;;  %v1204_v5 = vsel %vm1203_vm7, %v1175_v25, %v1202_v59  ;;  %v1027_v12 = vadd.f32 %v990_v31, %v2438_v2  ;;  %v1593_v28 = vpop.eup %1592  ;;  %v996_v61 = vmul.f32 0.6931472, %v1591_v47 }
 0x27c   : > { %v1026_v43 = vadd.f32 %v988_v44, %v2411_v17  ;;  %v1206_v42 = vsel %vm1205_vm8, %v1182_v30, %v1204_v5  ;;  %v1183_v2 = vperm.slane %v1057_v20, %v2466_v54  ;;  %v1000_v17 = vmul.f32 0.6931472, %v1593_v28 }
 0x27d   : > { %v1059_v36 = vmul.f32 0.2, %v1027_v12  ;;  %v1030_v60 = vadd.f32 %v996_v61, %v2428_v37 }
 0x27e   : > { %v1058_v24 = vmul.f32 0.2, %v1026_v43  ;;  %v1032_v18 = vadd.f32 %v1000_v17, %v2452_v6 }
 0x27f   : > { %v1186_v7 = vperm.slane %v1059_v36, %v2490_v15  ;;  %v1062_v57 = vmul.f32 0.2, %v1030_v60 }
 0x280   : > { %v1595_v1 = vpop.eup %1594  ;;  %v1184_v0 = vperm.slane %v1058_v24, %v2469_v23  ;;  %v1064_v62 = vmul.f32 0.2, %v1032_v18 }
 0x281   : > { %v1597_v56 = vpop.eup %1596  ;;  %v992_v52 = vmul.f32 0.6931472, %v1595_v1  ;;  %v1191_v6 = vperm.slane %v1062_v57, %v2469_v23 }
 0x282   : > { %v933_v29 = vpop.xlane.xlu0 %932  ;;  %v994_v59 = vmul.f32 0.6931472, %v1597_v56  ;;  %v1185_v8 = vsel %vm1138_vm1, %v1184_v0, %v1183_v2  ;;  %v1195_v63 = vperm.slane %v1064_v62, %v2504_v16 }
 0x283   : > { %1598 = vlog2.f32 %v933_v29  ;;  %v1028_v14 = vadd.f32 %v992_v52, %v2450_v3  ;;  %v1097_v3 = vld [vmem:[%s2639_s5] sm:$0x1] }
 0x284   : > { %v1029_v55 = vadd.f32 %v994_v59, %v2426_v40  ;;  %v1187_v40 = vsel %vm1142_vm2, %v1186_v7, %v1185_v8  ;;  %v1213_v41 = vsub.f32 1.0, %v1097_v3 }
 0x285   : > { %v1060_v9 = vmul.f32 0.2, %v1028_v14 }
 0x286   : > { %v1061_v33 = vmul.f32 0.2, %v1029_v55  ;;  %v1215_v11 = vperm.slane %v1213_v41, 0 }
 0x287   : > { %v1188_v35 = vperm.slane %v1060_v9, %v2504_v16 }
 0x288   : > { %v1190_v49 = vperm.slane %v1061_v33, %v2466_v54  ;;  %v1217_v21 = vmul.f32 %v1215_v11, %v1096_v32 }
 0x289   : > { %v1599_v26 = vpop.eup %1598  ;;  %v1189_v34 = vsel %vm1146_vm3, %v1188_v35, %v1187_v40 }
 0x28a   : > { %v998_v37 = vmul.f32 0.6931472, %v1599_v26  ;;  %v1208_v38 = vsel %vm1207_vm9, %v1189_v34, %v1206_v42  ;;  %v1192_v4 = vsel %vm1138_vm1, %v1191_v6, %v1190_v49 }
 0x28c   : > { %v1031_v39 = vadd.f32 %v998_v37, %v2441_v19  ;;  %v1471_v19 = vld [vmem:[%s2639_s5] ss:$0 sm:$0xff] }
 0x28e   : > { %v1063_v13 = vmul.f32 0.2, %v1031_v39 }
 0x290   : > { %v1193_v45 = vperm.slane %v1063_v13, %v2490_v15 }
 0x292   : > { %v1194_v54 = vsel %vm1142_vm2, %v1193_v45, %v1192_v4 }
 0x293   : > { %v1196_v23 = vsel %vm1146_vm3, %v1195_v63, %v1194_v54 }
 0x294   : > { %v1210_v31 = vsel %vm1209_vm10, %v1196_v23, %v1208_v38 }
 0x295   : > { %v1212_v53 = vmul.f32 %v1471_v19, %v1210_v31 }
 0x297   : > { %v1218_v27 = vadd.f32 %v1217_v21, %v1212_v53 }
 0x299   : > { %1221 = vrot.lane.b32.xlu2 %v1218_v27, %s1801_s14 }
 0x2f3   : > { %v1222_v15 = vpop.permute.xlu2 %1221 }
 0x2f4   : > { %1225 = vst.msk [vmem:[%s2547_s29] sm:$0xff] %vm1224_vm11, %v1222_v15 }
 0x2f5   : > { %1747 = shalt.err (!%p1744_p9)
}
 0x2f6   : > { %1374 = dma.vmem_to_hbm [thread:$0]  (%p1913_p13), %s1240_s13, 128, %s1242_s30, %s1227_s8  }
 0x2f7 PF: > { %s1253_s10 = sand.u32 1, %s1782_s21   ;;  %p2647_p10 = scmp.ge.s32.totalorder %s1794_s24, 2 }
 0x2f8   : > { %s1254_s29 = scalar_lea.sflag [#allocation4], %s1253_s10 }
 0x2f9   : > { %p1391_p11 = pnand %p2647_p10, %p1918_p4 }
 0x2fb   : > { %p1392_p0 = pneg %p1391_p11 }
 0x2fd   : > { %1777 = dma.done.wait (%p1392_p0), %s1254_s29, 128  }
 0x2fe   : > { %1779 = vsyncadd (%p1392_p0), %s1254_s29, 4294967168  ;;  %p21_p2 = scmp.ge.s32.totalorder %s1893_s26, 4   ;;  %s2648_s21 = smov %s1786_s22 }
 0x2ff   : > { %s2649_s22 = smov %s1790_s23  ;;  %s2650_s23 = smov %s1905_s7 }
 0x300   : > { %s2651_s24 = smov %s1893_s26  ;;  %23 = sbr.rel (!%p21_p2) target bundleno = 7 (0x7), region = 101 }
 0x305   :  { %1260 = vsyncpa [#allocation3], 1 }
 0x306   :  { %1262 = vsyncpa [#allocation3 + $0x1], 1 }
 0x307   :  { %1263 = vsyncpa [#allocation6], 1 }
 0x308   :  { %1264 = vsyncpa [#allocation9], 1 }
 0x309   :  { %1265 = vsyncpa [#allocation4], 1 }
 0x30a   :  { %1267 = vsyncpa [#allocation4 + $0x1], 1 }

// kernel: tpu_custom_call.1
= control target key start
LH: loop header
LB: loop body
LE: loop exit
PB: predicated region body
PF: predicated region fallthrough
CT: control target
= control target key end

     0   :  { %11 = vsyncpa [#allocation3], 0  ;;  %s2634_s0 = inlined_call_operand.hbm [shape: f32[16,32], index: 0, kind: input, shape index: {}]   ;;  %s2635_s1 = inlined_call_operand.hbm [shape: f32[32,32], index: 1, kind: input, shape index: {}]   ;;  %s2636_s2 = inlined_call_operand.hbm [shape: f32[32,32], index: 2, kind: input, shape index: {}]   ;;  %s2637_s3 = inlined_call_operand.hbm [shape: f32[32,32], index: 3, kind: input, shape index: {}]   ;;  %s2638_s4 = inlined_call_operand.vmem [shape: f32[1,32], index: 4, kind: input, shape index: {}]   ;;  %s2639_s5 = inlined_call_operand.vmem [shape: f32[1,32], index: 5, kind: input, shape index: {}]   ;;  %s2640_s6 = inlined_call_operand.hbm [shape: f32[16,64], index: 6, kind: output, shape index: {}]  }
   0x1   :  { %13 = vsyncpa [#allocation3 + $0x1], 0 }
   0x2   :  { %14 = vsyncpa [#allocation6], 0 }
   0x3   :  { %15 = vsyncpa [#allocation9], 0 }
   0x4   :  { %16 = vsyncpa [#allocation4], 0 }
   0x5   :  { %18 = vsyncpa [#allocation4 + $0x1], 0  ;;  %s1837_s21 = smov 0   ;;  %s1839_s22 = smov 0  }
   0x6   :  { %s1841_s23 = smov 0   ;;  %s1843_s24 = smov 0  }
   0x7 LB: > { %s197_s27 = sshll.u32 %s2635_s1, 4  ;;  %s1861_s28 = sadd.s32 4294967295, %s1794_s24   ;;  %s1794_s24 = sphi %s1843_s24, %s2651_s24   ;;  %s1790_s23 = sphi %s1841_s23, %s2650_s23   ;;  %s1786_s22 = sphi %s1839_s22, %s2649_s22   ;;  %s1782_s21 = sphi %s1837_s21, %s2648_s21   ;;  %s198_s27 = int_to_ptr.hbm [resolvable:$true] %s197_s27 }
   0x8   : > { %p1342_p0 = scmp.ge.s32.totalorder %s1794_s24, 1  ;;  %p45_p1 = scmp.eq.s32.totalorder %s1861_s28, 0 }
   0x9   : > { %p186_p2 = scmp.lt.s32.totalorder %s1794_s24, 3  ;;  %s1796_s30 = smov [#allocation5]  }
   0xa   : > { %s199_s7 = sshll.u32 %s1796_s30, 4  ;;  %s211_s10 = sshll.u32 %s2636_s2, 4  ;;  %s200_s7 = int_to_ptr.vmem [resolvable:$true] %s199_s7  ;;  %s212_s10 = int_to_ptr.hbm [resolvable:$true] %s211_s10 }
   0xb   : > { %p1866_p3 = pnand %p1342_p0, %p186_p2  ;;  %s225_s14 = sshll.u32 %s2637_s3, 4  ;;  %s226_s14 = int_to_ptr.hbm [resolvable:$true] %s225_s14 }
   0xc   : > { %s1797_s15 = smov [#allocation7]   ;;  %s1798_s17 = smov 128  }
   0xd   : > { %p1376_p4 = pneg %p1866_p3  ;;  %s213_s16 = sshll.u32 %s1797_s15, 4  ;;  %s214_s16 = int_to_ptr.vmem [resolvable:$true] %s213_s16 }
   0xe   : > { %s1799_s18 = smov 8   ;;  %s1800_s19 = smov [#allocation8]  }
   0xf   : > { %p1878_p6 = pnand %p1376_p4, %p45_p1  ;;  %s227_s20 = sshll.u32 %s1800_s19, 4  ;;  %s228_s20 = int_to_ptr.vmem [resolvable:$true] %s227_s20 }
  0x10   : > { %s1341_s25 = sadd.s32 4294967294, %s1794_s24   ;;  %s1893_s26 = sadd.s32 1, %s1794_s24  }
  0x11   : > { %1379 = dma.hbm_to_vmem [thread:$0]  (!%p1878_p6), %s198_s27, 512, %s200_s7, [#allocation6], %s1798_s17, %s1798_s17, %s1799_s18  }
  0x12   : > { %1382 = dma.hbm_to_vmem [thread:$0]  (!%p1878_p6), %s212_s10, 512, %s214_s16, [#allocation6], %s1798_s17, %s1798_s17, %s1799_s18  }
  0x13   : > { %1385 = dma.hbm_to_vmem [thread:$0]  (!%p1878_p6), %s226_s14, 512, %s228_s20, [#allocation9], %s1798_s17, %s1798_s17, %s1799_s18  }
  0x14   : > { %s31_s30 = sadd.s32 1, %s1790_s23  ;;  %s28_s27 = ssub.s32 %s1794_s24, %s1893_s26 }
  0x15   : > { %p38_p7 = scmp.ne.s32.totalorder %s1790_s23, %s1786_s22  ;;  %p29_p8 = scmp.eq.s32.totalorder %s28_s27, 0 }
  0x16   : > { %p39_p9 = scmp.eq.s32.totalorder %s1794_s24, 0  ;;  %p44_p10 = scmp.ne.s32.totalorder %s1786_s22, %s1782_s21 }
  0x17   : > { %p173_p11 = scmp.eq.s32.totalorder %s1861_s28, 1  ;;  %p179_p0 = scmp.eq.s32.totalorder %s1341_s25, 1 }
  0x18   : > { %s1905_s7 = scalar_select %p29_p8, %s1790_s23, %s31_s30  }
  0x19   : > { %p1909_p12 = por %p45_p1, %p44_p10  ;;  %p1913_p13 = por %p173_p11, %p38_p7 }
  0x1a   : > { %p40_p2 = por %p39_p9, %p38_p7  ;;  %s247_s10 = sand.u32 1, %s1790_s23  }
  0x1b   : > { %p1918_p4 = por %p179_p0, %p44_p10  ;;  %p1397_p6 = scmp.lt.s32.totalorder %s1794_s24, 2 }
  0x1c   : > { %s1347_s12 = sshll.u32 %s247_s10, 3  ;;  %s1348_s13 = sshll.u32 %s1794_s24, 3 }
  0x1d   : > { %s255_s16 = scalar_lea.hbm %s2634_s0, %s1348_s13  ;;  %s251_s18 = scalar_lea.vmem [#allocation2], %s1347_s12 }
  0x1e   : > { %s257_s17 = sshll.u32 %s255_s16, 4  ;;  %s259_s19 = sshll.u32 %s251_s18, 4  ;;  %s258_s17 = int_to_ptr.hbm [resolvable:$true] %s257_s17  ;;  %s260_s19 = int_to_ptr.vmem [resolvable:$true] %s259_s19 }
  0x1f   : > { %p1927_p8 = pnand %p1397_p6, %p40_p2  ;;  %s248_s25 = scalar_lea.sflag [#allocation3], %s247_s10 }
  0x20   : > { %s1690_s30 = sshra.s32 %s258_s17, 4  ;;  %s1697_s12 = scalar_lea.hbm %s2634_s0, 16  ;;  %s1691_s30 = int_to_ptr.hbm [resolvable:$true] %s1690_s30 }
  0x21   : > { %s1692_s27 = scalar_lea.hbm %s1691_s30, 8  ;;  %p1694_p9 = pneg %p1927_p8 }
  0x22   : > { %p1693_p7 = scmp.ne.s32.totalorder %s1691_s30, %s1692_s27  ;;  %p1698_p0 = scmp.lt.s32.totalorder %s1691_s30, %s2634_s0 }
  0x23   : > { %p1699_p2 = scmp.lt.s32.totalorder %s1697_s12, %s1692_s27 }
  0x24   : > { %p1695_p10 = pnand %p1694_p9, %p1693_p7 }
  0x25   : > { %p1700_p6 = por %p1699_p2, %p1698_p0 }
  0x26   : > { %p1696_p11 = pneg %p1695_p10 }
  0x28   : > { %p1701_p5 = pnand %p1700_p6, %p1696_p11 }
  0x2a   : > { %1704 = shalt.err (!%p1701_p5)
}
  0x2b   : > { %1389 = dma.hbm_to_vmem [thread:$0]  (!%p1927_p8), %s258_s17, 128, %s260_s19, %s248_s25  }
  0x2c   : > { %268 = sbr.rel (%p1866_p3) target bundleno = 759 (0x2f7), region = 44  ;;  %s1944_s10 = sand.u32 (!%p1866_p3), 1, %s1786_s22  }
  0x2d   : > { %s1350_s18 = sshll.u32 (!%p1866_p3), %s1944_s10, 3  ;;  %s271_s13 = scalar_lea.sflag (!%p1866_p3), [#allocation3], %s1944_s10 }
  0x2e   : > { %s274_s30 = scalar_lea.vmem (!%p1866_p3), [#allocation2], %s1350_s18 }
  0x31   : > { %1765 = dma.done.wait (%p1909_p12), %s271_s13, 128  }
  0x32   : > { %1767 = vsyncadd (%p1909_p12), %s271_s13, 4294967168 }
  0x33   : > { %1769 = dma.done.wait (%p45_p1), [#allocation6], 1024  }
  0x34   : > { %1771 = vsyncadd (%p45_p1), [#allocation6], 4294966272 }
  0x35   : > { %1773 = dma.done.wait (%p45_p1), [#allocation9], 512  }
  0x36   : > { %1775 = vsyncadd (%p45_p1), [#allocation9], 4294966784  ;;  %v321_v0 = vlaneseq  ;;  %v1974_v4 = vld [vmem:[%s274_s30] sm:$0xff]  ;;  %v2020_v18 = vld [vmem:[#allocation5 + $0x8] sm:$0xff]  ;;  %vm648_vm0 = vcmask 261120   ;;  %vm1138_vm1 = vcmask 130112  }
  0x37   : > { %v345_v5 = vperm.slane %v1974_v4, 1  ;;  %v1978_v6 = vperm.slane %v1974_v4, 0  ;;  %v395_v8 = vperm.slane %v1974_v4, 3  ;;  %v420_v9 = vperm.slane %v1974_v4, 4  ;;  %v2024_v22 = vld [vmem:[#allocation7 + $0x8] sm:$0xff]  ;;  %v2073_v47 = vld [vmem:[#allocation5] sm:$0xff] }
  0x38   : > { %v1963_v1 = vshrl.u32 %v321_v0, 7  ;;  %v445_v10 = vperm.slane %v1974_v4, 5  ;;  %v370_v11 = vperm.slane %v1974_v4, 2  ;;  %v2003_v12 = vperm.slane %v1974_v4, 7  ;;  %v2077_v50 = vld [vmem:[#allocation7] sm:$0xff]  ;;  %v2082_v52 = vld [vmem:[#allocation5 + $0x18] sm:$0xff] }
  0x39   : > { %v521_v13 = vrot.slane %v1974_v4, 1  ;;  %v470_v31 = vperm.slane %v1974_v4, 6  ;;  %v522_v36 = vrot.slane %v1974_v4, 2  ;;  %v2090_v56 = vld [vmem:[#allocation7 + $0x18] sm:$0xff]  ;;  %v523_v57 = vrot.slane %v1974_v4, 3  ;;  %s2547_s29 = scalar_lea.vmem [#allocation10], %s1350_s18 }
  0x3a   : > { %1441 = vset.pattern.permute.xlu2 %v1963_v1  ;;  %v1967_v2 = vadd.s32 16, %v1963_v1  ;;  %v1970_v3 = vadd.s32 8, %v1963_v1  ;;  %v1983_v7 = vadd.s32 24, %v1963_v1  ;;  %vm1142_vm2 = vcmask 195712   ;;  %1219 = vst.msk [vmem:[%s2547_s29] sm:$0xff] %vm648_vm0, %v1974_v4  ;;  %s1801_s14 = smov 32  }
  0x3b   : > { %v2010_v14 = vperm.slane %v521_v13, 0  ;;  %v2058_v37 = vperm.slane %v522_v36, 0  ;;  %v2097_v59 = vperm.slane %v523_v57, 0  ;;  %vm1146_vm3 = vcmask 261312   ;;  %s1357_s12 = sshll.u32 %s1861_s28, 3  ;;  %s1239_s13 = sshll.u32 %s2547_s29, 4  ;;  %s1240_s13 = int_to_ptr.vmem [resolvable:$true] %s1239_s13 }
  0x3c   : > { %1442 = vset.pattern.permute.xlu1 %v1967_v2  ;;  %1440 = vset.pattern.permute.xlu0 %v1970_v3  ;;  %vm1197_vm4 = vcmask 1041409   ;;  %vm1199_vm5 = vcmask 1042434   ;;  %vm1201_vm6 = vcmask 1043459   ;;  %vm1203_vm7 = vcmask 1044484   ;;  %s1237_s18 = scalar_lea.hbm %s2640_s6, %s1357_s12  ;;  %s1227_s8 = scalar_lea.sflag [#allocation4], %s1944_s10 }
  0x3d   : > { %vm1205_vm8 = vcmask 1045509   ;;  %vm1207_vm9 = vcmask 1046534   ;;  %vm1209_vm10 = vcmask 1047559   ;;  %s1241_s30 = sshll.u32 %s1237_s18, 4  ;;  %vm1224_vm11 = vcmask 523520   ;;  %s1740_s25 = scalar_lea.hbm %s2640_s6, 16  ;;  %s1242_s30 = int_to_ptr.hbm [resolvable:$true] %s1241_s30 }
  0x3e   : > { %s1734_s17 = sshra.s32 %s1242_s30, 4  ;;  %s1735_s17 = int_to_ptr.hbm [resolvable:$true] %s1734_s17 }
  0x3f   : > { %s1736_s19 = scalar_lea.hbm %s1735_s17, 8  ;;  %p1741_p12 = scmp.lt.s32.totalorder %s1735_s17, %s2640_s6 }
  0x40   : > { %p1737_p1 = scmp.ne.s32.totalorder %s1735_s17, %s1736_s19  ;;  %p1742_p8 = scmp.lt.s32.totalorder %s1740_s25, %s1736_s19 }
  0x42   : > { %350 = vperm.xlu2 %1441, %v345_v5   ;;  %p1738_p3 = pnand %p1737_p1, %p1913_p13  ;;  %p1743_p7 = por %p1742_p8, %p1741_p12 }
  0x44   : > { %337 = vperm.xlu1 %1442, %v1978_v6   ;;  %331 = vperm.xlu0 %1440, %v1978_v6   ;;  %p1739_p5 = pneg %p1738_p3 }
  0x46   : > { %p1744_p9 = pnand %p1743_p7, %p1739_p5 }
  0x4a   : > { %1444 = vset.pattern.permute.xlu2 %v1970_v3 }
  0x4c   : > { %1443 = vset.pattern.permute.xlu1 %v1983_v7  ;;  %406 = vperm.xlu0 %1440, %v395_v8  }
  0x52   : > { %356 = vperm.xlu2 %1444, %v345_v5  }
  0x54   : > { %343 = vperm.xlu1 %1443, %v1978_v6   ;;  %1455 = vset.pattern.permute.xlu0 %v1967_v2 }
  0x5a   : > { %1446 = vset.pattern.permute.xlu2 %v1983_v7 }
  0x5c   : > { %1445 = vset.pattern.permute.xlu1 %v1967_v2  ;;  %437 = vperm.xlu0 %1455, %v420_v9  }
  0x62   : > { %368 = vperm.xlu2 %1446, %v345_v5  }
  0x64   : > { %362 = vperm.xlu1 %1445, %v345_v5   ;;  %1460 = vset.pattern.permute.xlu0 %v1983_v7  ;;  %v2106_v5 = vld [vmem:[#allocation7 + $0x10] sm:$0xff] }
  0x6a   : > { %1448 = vset.pattern.permute.xlu2 %v1967_v2 }
  0x6c   : > { %1447 = vset.pattern.permute.xlu1 %v1970_v3  ;;  %468 = vperm.xlu0 %1460, %v445_v10  }
  0x72   : > { %387 = vperm.xlu2 %1448, %v370_v11  }
  0x74   : > { %381 = vperm.xlu1 %1447, %v370_v11   ;;  %1461 = vset.pattern.permute.xlu0 %v1963_v1 }
  0x7a   : > { %1450 = vset.pattern.permute.xlu2 %v1963_v1 }
  0x7c   : > { %1449 = vset.pattern.permute.xlu1 %v1983_v7  ;;  %325 = vperm.xlu0 %1461, %v1978_v6  }
  0x82   : > { %400 = vperm.xlu2 %1450, %v395_v8  }
  0x84   : > { %393 = vperm.xlu1 %1449, %v370_v11   ;;  %375 = vperm.xlu0 %1461, %v370_v11  }
  0x8a   : > { %1452 = vset.pattern.permute.xlu2 %v1983_v7 }
  0x8c   : > { %1451 = vset.pattern.permute.xlu1 %v1967_v2  ;;  %500 = vperm.xlu0 %1461, %v2003_v12  }
  0x92   : > { %418 = vperm.xlu2 %1452, %v395_v8  }
  0x94   : > { %412 = vperm.xlu1 %1451, %v395_v8   ;;  %1469 = vset.pattern.permute.xlu0 %v1983_v7 }
  0x9a   : > { %1454 = vset.pattern.permute.xlu2 %v1970_v3 }
  0x9c   : > { %1453 = vset.pattern.permute.xlu1 %v1963_v1  ;;  %v2014_v15 = vpop.permute.xlu2 %350 }
  0x9d   : > { %v548_v16 = vsub.f32 %v2014_v15, %v2010_v14 }
  0xa2   : > { %431 = vperm.xlu2 %1454, %v420_v9  }
  0xa4   : > { %425 = vperm.xlu1 %1453, %v420_v9  }
  0xaa   : > { %1457 = vset.pattern.permute.xlu2 %v1963_v1 }
  0xac   : > { %1456 = vset.pattern.permute.xlu1 %v1983_v7  ;;  %v357_v17 = vpop.permute.xlu2 %356 }
  0xad   : > { %v549_v21 = vsub.f32 %v357_v17, %v2010_v14 }
  0xaf   : > { %v585_v24 = vmul.f32 %v2020_v18, %v549_v21 }
  0xb1   : > { %v2036_v27 = vadd.f32 %v2024_v22, %v585_v24 }
  0xb2   : > { %450 = vperm.xlu2 %1457, %v445_v10  }
  0xb3   : > { %v664_v28 = vsel %vm648_vm0, %v2036_v27, -inf }
  0xb4   : > { %443 = vperm.xlu1 %1456, %v420_v9  }
  0xb6   : > { %v332_v19 = vpop.permute.xlu0 %331  ;;  %v2040_v29 = vpop.permute.xlu1 %337 }
  0xb7   : > { %v545_v20 = vsub.f32 %v332_v19, %v1978_v6  ;;  %v546_v24 = vsub.f32 %v2040_v29, %v1978_v6 }
  0xb9   : > { %v581_v23 = vmul.f32 %v2020_v18, %v545_v20 }
  0xba   : > { %1459 = vset.pattern.permute.xlu2 %v1967_v2 }
  0xbb   : > { %v2030_v25 = vadd.f32 %v2024_v22, %v581_v23 }
  0xbc   : > { %1458 = vset.pattern.permute.xlu1 %v1970_v3  ;;  %v369_v41 = vpop.permute.xlu2 %368 }
  0xbd   : > { %v652_v26 = vsel %vm648_vm0, %v2030_v25, -inf }
  0xbe   : > { %653 = vmax.xlane.f32.xlu0 %v652_v26  ;;  %v2047_v32 = vpop.permute.xlu0 %406  ;;  %v584_v26 = vmul.f32 %v2073_v47, %v548_v16 }
  0xc2   : > { %462 = vperm.xlu2 %1459, %v445_v10  }
  0xc4   : > { %456 = vperm.xlu1 %1458, %v445_v10  }
  0xc6   : > { %665 = vmax.xlane.f32.xlu0 %v664_v28  ;;  %v2044_v30 = vpop.permute.xlu1 %343 }
  0xc7   : > { %v547_v19 = vsub.f32 %v2044_v30, %v1978_v6 }
  0xc9   : > { %v583_v21 = vmul.f32 %v2082_v52, %v547_v19  ;;  %v526_v19 = vrot.slane %v1974_v4, 6 }
  0xca   : > { %1463 = vset.pattern.permute.xlu2 %v1970_v3 }
  0xcb   : > { %v2130_v23 = vadd.f32 %v2090_v56, %v583_v21 }
  0xcc   : > { %1462 = vset.pattern.permute.xlu1 %v1963_v1  ;;  %v2070_v43 = vpop.permute.xlu2 %387  ;;  %v2102_v1 = vld [vmem:[#allocation5 + $0x10] sm:$0xff] }
  0xcd   : > { %v658_v28 = vsel %vm648_vm0, %v2130_v23, -inf  ;;  %v582_v30 = vmul.f32 %v2102_v1, %v546_v24 }
  0xce   : > { %v2054_v35 = vpop.permute.xlu0 %437 }
  0xd2   : > { %481 = vperm.xlu2 %1463, %v470_v31  }
  0xd4   : > { %475 = vperm.xlu1 %1462, %v470_v31  }
  0xd6   : > { %v2049_v33 = vpop.permute.xlu1 %362 }
  0xd7   : > { %v550_v34 = vsub.f32 %v2049_v33, %v2010_v14 }
  0xd9   : > { %v586_v16 = vmul.f32 %v2102_v1, %v550_v34 }
  0xda   : > { %1465 = vset.pattern.permute.xlu2 %v1983_v7 }
  0xdc   : > { %1464 = vset.pattern.permute.xlu1 %v1967_v2  ;;  %v2088_v55 = vpop.permute.xlu2 %400 }
  0xde   : > { %v2060_v38 = vpop.permute.xlu0 %468 }
  0xe2   : > { %493 = vperm.xlu2 %1465, %v470_v31  }
  0xe4   : > { %487 = vperm.xlu1 %1464, %v470_v31   ;;  %v551_v31 = vsub.f32 %v369_v41, %v2010_v14  ;;  %v554_v41 = vsub.f32 %v2070_v43, %v2058_v37 }
  0xe6   : > { %v2062_v39 = vpop.permute.xlu1 %381  ;;  %v590_v14 = vmul.f32 %v2102_v1, %v554_v41 }
  0xe7   : > { %v553_v40 = vsub.f32 %v2062_v39, %v2058_v37  ;;  %v556_v39 = vsub.f32 %v2088_v55, %v2097_v59 }
  0xe9   : > { %v589_v34 = vmul.f32 %v2020_v18, %v553_v40 }
  0xea   : > { %1467 = vset.pattern.permute.xlu2 %v1967_v2 }
  0xec   : > { %1466 = vset.pattern.permute.xlu1 %v1970_v3  ;;  %v419_v62 = vpop.permute.xlu2 %418 }
  0xed   : > { %v559_v3 = vsub.f32 %v419_v62, %v2097_v59 }
  0xee   : > { %v326_v42 = vpop.permute.xlu0 %325 }
  0xef   : > { %v544_v8 = vsub.f32 %v326_v42, %v1978_v6  ;;  %v595_v9 = vmul.f32 %v2082_v52, %v559_v3  ;;  %v2143_v42 = vadd.f32 %v2077_v50, %v584_v26  ;;  %v587_v6 = vmul.f32 %v2082_v52, %v551_v31 }
  0xf1   : > { %v580_v11 = vmul.f32 %v2073_v47, %v544_v8  ;;  %v661_v15 = vsel %vm648_vm0, %v2143_v42, -inf }
  0xf2   : > { %512 = vperm.xlu2 %1467, %v2003_v12  }
  0xf3   : > { %v2120_v13 = vadd.f32 %v2077_v50, %v580_v11 }
  0xf4   : > { %506 = vperm.xlu1 %1466, %v2003_v12  }
  0xf5   : > { %v649_v20 = vsel %vm648_vm0, %v2120_v13, -inf }
  0xf6   : > { %v394_v44 = vpop.permute.xlu1 %393  ;;  %v376_v45 = vpop.permute.xlu0 %375 }
  0xf7   : > { %v552_v46 = vsub.f32 %v376_v45, %v2058_v37  ;;  %v555_v48 = vsub.f32 %v394_v44, %v2058_v37  ;;  %v2146_v44 = vadd.f32 %v2106_v5, %v582_v30  ;;  %v524_v37 = vrot.slane %v1974_v4, 4 }
  0xf9   : > { %v588_v49 = vmul.f32 %v2073_v47, %v552_v46  ;;  %v591_v53 = vmul.f32 %v2082_v52, %v555_v48  ;;  %v655_v29 = vsel %vm648_vm0, %v2146_v44, -inf  ;;  %v2162_v46 = vadd.f32 %v2090_v56, %v587_v6 }
  0xfa   : > { %v525_v48 = vrot.slane %v1974_v4, 5  ;;  %v532_v8 = vperm.slane %v524_v37, 0 }
  0xfb   : > { %v2080_v51 = vadd.f32 %v2077_v50, %v588_v49  ;;  %v2094_v58 = vadd.f32 %v2090_v56, %v591_v53  ;;  %v2166_v49 = vadd.f32 %v2106_v5, %v586_v16  ;;  %v670_v33 = vsel %vm648_vm0, %v2162_v46, -inf }
  0xfc   : > { %1468 = vset.pattern.permute.xlu1 %v1983_v7  ;;  %v2175_v43 = vperm.slane %v525_v48, 0  ;;  %v432_v57 = vpop.permute.xlu2 %431  ;;  %v562_v41 = vsub.f32 %v2054_v35, %v532_v8 }
  0xfd   : > { %v673_v54 = vsel %vm648_vm0, %v2080_v51, -inf  ;;  %v682_v60 = vsel %vm648_vm0, %v2094_v58, -inf  ;;  %v667_v53 = vsel %vm648_vm0, %v2166_v49, -inf }
  0xfe   : > { %674 = vmax.xlane.f32.xlu0 %v673_v54  ;;  %v557_v54 = vsub.f32 %v2047_v32, %v2097_v59 }
 0x100   : > { %v593_v32 = vmul.f32 %v2020_v18, %v557_v54  ;;  %v598_v54 = vmul.f32 %v2102_v1, %v562_v41 }
 0x104   : > { %518 = vperm.xlu1 %1468, %v2003_v12   ;;  %v2117_v12 = vadd.f32 %v2090_v56, %v595_v9  ;;  %v592_v9 = vmul.f32 %v2073_v47, %v556_v39 }
 0x106   : > { %v413_v61 = vpop.permute.xlu1 %412  ;;  %683 = vmax.xlane.f32.xlu0 %v682_v60  ;;  %v694_v17 = vsel %vm648_vm0, %v2117_v12, -inf  ;;  %v2208_v21 = vadd.f32 %v2077_v50, %v592_v9 }
 0x107   : > { %v558_v63 = vsub.f32 %v413_v61, %v2097_v59  ;;  %v2182_v61 = vadd.f32 %v2106_v5, %v590_v14 }
 0x108   : > { %v685_v31 = vsel %vm648_vm0, %v2208_v21, -inf }
 0x109   : > { %v594_v2 = vmul.f32 %v2102_v1, %v558_v63  ;;  %v2190_v63 = vadd.f32 %v2024_v22, %v589_v34 }
 0x10b   : > { %v2109_v7 = vadd.f32 %v2106_v5, %v594_v2  ;;  %v679_v2 = vsel %vm648_vm0, %v2182_v61, -inf  ;;  %v676_v55 = vsel %vm648_vm0, %v2190_v63, -inf }
 0x10c   : > { %v451_v11 = vpop.permute.xlu2 %450 }
 0x10d   : > { %v691_v10 = vsel %vm648_vm0, %v2109_v7, -inf  ;;  %v564_v6 = vsub.f32 %v451_v11, %v2175_v43 }
 0x10e   : > { %692 = vmax.xlane.f32.xlu0 %v691_v10  ;;  %v561_v10 = vsub.f32 %v432_v57, %v532_v8 }
 0x110   : > { %v597_v24 = vmul.f32 %v2020_v18, %v561_v10 }
 0x112   : > { %v2218_v16 = vadd.f32 %v2024_v22, %v597_v24 }
 0x114   : > { %v700_v34 = vsel %vm648_vm0, %v2218_v16, -inf }
 0x116   : > { %695 = vmax.xlane.f32.xlu0 %v694_v17  ;;  %v426_v36 = vpop.permute.xlu1 %425  ;;  %v2204_v17 = vadd.f32 %v2024_v22, %v593_v32 }
 0x118   : > { %v688_v26 = vsel %vm648_vm0, %v2204_v17, -inf }
 0x11b   : > { %650 = vmax.xlane.f32.xlu2 %v649_v20  ;;  %v560_v20 = vsub.f32 %v426_v36, %v532_v8 }
 0x11d   : > { %v596_v30 = vmul.f32 %v2073_v47, %v560_v20 }
 0x11f   : > { %v2223_v14 = vadd.f32 %v2077_v50, %v596_v30 }
 0x121   : > { %v697_v57 = vsel %vm648_vm0, %v2223_v14, -inf }
 0x123   : > { %659 = vmax.xlane.f32.xlu2 %v658_v28  ;;  %v534_v28 = vperm.slane %v526_v19, 0  ;;  %v527_v19 = vrot.slane %v1974_v4, 7 }
 0x126   : > { %v2159_v45 = vpop.permute.xlu1 %443 }
 0x127   : > { %v563_v39 = vsub.f32 %v2159_v45, %v532_v8 }
 0x129   : > { %v599_v9 = vmul.f32 %v2082_v52, %v563_v39 }
 0x12b   : > { %662 = vmax.xlane.f32.xlu2 %v661_v15  ;;  %v463_v15 = vpop.permute.xlu2 %462  ;;  %v2258_v30 = vadd.f32 %v2090_v56, %v599_v9 }
 0x12e   : > { %656 = vmax.xlane.f32.xlu1 %v655_v29 }
 0x133   : > { %671 = vmax.xlane.f32.xlu2 %v670_v33  ;;  %v600_v33 = vmul.f32 %v2073_v47, %v564_v6  ;;  %v535_v6 = vperm.slane %v527_v19, 0 }
 0x135   : > { %v2238_v37 = vadd.f32 %v2077_v50, %v600_v33 }
 0x136   : > { %668 = vmax.xlane.f32.xlu1 %v667_v53  ;;  %v457_v60 = vpop.permute.xlu1 %456 }
 0x137   : > { %v565_v62 = vsub.f32 %v457_v60, %v2175_v43  ;;  %v566_v60 = vsub.f32 %v463_v15, %v2175_v43 }
 0x139   : > { %v601_v40 = vmul.f32 %v2020_v18, %v565_v62  ;;  %v482_v62 = vpop.permute.xlu2 %481  ;;  %v602_v32 = vmul.f32 %v2102_v1, %v566_v60 }
 0x13a   : > { %v569_v20 = vsub.f32 %v482_v62, %v534_v28 }
 0x13b   : > { %680 = vmax.xlane.f32.xlu2 %v679_v2  ;;  %v2196_v3 = vadd.f32 %v2024_v22, %v601_v40  ;;  %v2242_v40 = vadd.f32 %v2106_v5, %v598_v54  ;;  %v709_v2 = vsel %vm648_vm0, %v2238_v37, -inf  ;;  %v2253_v8 = vadd.f32 %v2106_v5, %v602_v32 }
 0x13c   : > { %v605_v15 = vmul.f32 %v2020_v18, %v569_v20 }
 0x13d   : > { %v712_v59 = vsel %vm648_vm0, %v2196_v3, -inf }
 0x13e   : > { %677 = vmax.xlane.f32.xlu1 %v676_v55  ;;  %713 = vmax.xlane.f32.xlu0 %v712_v59  ;;  %v703_v55 = vsel %vm648_vm0, %v2242_v40, -inf  ;;  %v567_v59 = vsub.f32 %v2060_v38, %v2175_v43  ;;  %v715_v38 = vsel %vm648_vm0, %v2253_v8, -inf }
 0x141   : > { %v494_v45 = vpop.permute.xlu2 %493 }
 0x143   : > { %689 = vmax.xlane.f32.xlu2 %v688_v26  ;;  %v571_v26 = vsub.f32 %v494_v45, %v534_v28 }
 0x146   : > { %686 = vmax.xlane.f32.xlu1 %v685_v31  ;;  %v476_v36 = vpop.permute.xlu1 %475  ;;  %v603_v31 = vmul.f32 %v2082_v52, %v567_v59 }
 0x147   : > { %v568_v29 = vsub.f32 %v476_v36, %v534_v28  ;;  %v607_v36 = vmul.f32 %v2082_v52, %v571_v26 }
 0x148   : > { %v2273_v41 = vadd.f32 %v2090_v56, %v603_v31 }
 0x149   : > { %v604_v48 = vmul.f32 %v2073_v47, %v568_v29  ;;  %v2279_v54 = vadd.f32 %v2090_v56, %v607_v36 }
 0x14b   : > { %701 = vmax.xlane.f32.xlu2 %v700_v34  ;;  %v2229_v53 = vadd.f32 %v2077_v50, %v604_v48  ;;  %v501_v48 = vpop.permute.xlu0 %500  ;;  %v2276_v34 = vadd.f32 %v2024_v22, %v605_v15  ;;  %v730_v62 = vsel %vm648_vm0, %v2279_v54, -inf }
 0x14c   : > { %v572_v33 = vsub.f32 %v501_v48, %v535_v6  ;;  %v513_v32 = vpop.permute.xlu2 %512 }
 0x14d   : > { %v721_v35 = vsel %vm648_vm0, %v2229_v53, -inf  ;;  %v724_v60 = vsel %vm648_vm0, %v2276_v34, -inf  ;;  %v574_v59 = vsub.f32 %v513_v32, %v535_v6 }
 0x14e   : > { %698 = vmax.xlane.f32.xlu1 %v697_v57  ;;  %722 = vmax.xlane.f32.xlu0 %v721_v35  ;;  %v718_v57 = vsel %vm648_vm0, %v2273_v41, -inf  ;;  %v608_v35 = vmul.f32 %v2073_v47, %v572_v33 }
 0x153   : > { %710 = vmax.xlane.f32.xlu2 %v709_v2  ;;  %v2288_v9 = vpop.xlane.xlu0 %653 }
 0x154   : > { %v746_v45 = vsub.f32 %v2030_v25, %v2288_v9 }
 0x156   : > { %v488_v10 = vpop.permute.xlu1 %487  ;;  %704 = vmax.xlane.f32.xlu1 %v703_v55 }
 0x157   : > { %v570_v11 = vsub.f32 %v488_v10, %v534_v28  ;;  %v706_v28 = vsel %vm648_vm0, %v2258_v30, -inf  ;;  %v2292_v10 = vadd.f32 %v2077_v50, %v608_v35 }
 0x159   : > { %v606_v24 = vmul.f32 %v2102_v1, %v570_v11  ;;  %v610_v11 = vmul.f32 %v2102_v1, %v574_v59  ;;  %v733_v20 = vsel %vm648_vm0, %v2292_v10, -inf }
 0x15b   : > { %716 = vmax.xlane.f32.xlu2 %v715_v38  ;;  %v2264_v43 = vadd.f32 %v2106_v5, %v606_v24  ;;  %v2305_v50 = vadd.f32 %v2106_v5, %v610_v11  ;;  %v2316_v5 = vpop.xlane.xlu0 %665 }
 0x15d   : > { %v727_v29 = vsel %vm648_vm0, %v2264_v43, -inf }
 0x15e   : > { %707 = vmax.xlane.f32.xlu1 %v706_v28  ;;  %728 = vmax.xlane.f32.xlu0 %v727_v29 }
 0x163   : > { %719 = vmax.xlane.f32.xlu2 %v718_v57 }
 0x166   : > { %v507_v39 = vpop.permute.xlu1 %506  ;;  %725 = vmax.xlane.f32.xlu1 %v724_v60  ;;  %731 = vmax.xlane.f32.xlu0 %v730_v62 }
 0x167   : > { %v573_v2 = vsub.f32 %v507_v39, %v535_v6 }
 0x169   : > { %v609_v55 = vmul.f32 %v2020_v18, %v573_v2  ;;  %v779_v18 = vmul.f32 1.442695, %v746_v45 }
 0x16b   : > { %v2295_v47 = vadd.f32 %v2024_v22, %v609_v55  ;;  %1472 = vpow2.f32 %v779_v18  ;;  %v739_v22 = vsel %vm648_vm0, %v2305_v50, -inf }
 0x16d   : > { %v736_v19 = vsel %vm648_vm0, %v2295_v47, -inf }
 0x16e   : > { %737 = vmax.xlane.f32.xlu2 %v736_v19  ;;  %734 = vmax.xlane.f32.xlu1 %v733_v20 }
 0x171   : > { %v1473_v26 = vpop.eup %1472  ;;  %v2318_v36 = vpop.xlane.xlu0 %674 }
 0x172   : > { %v844_v15 = vsel %vm648_vm0, %v1473_v26, 0.0 }
 0x176   : > { %v519_v24 = vpop.permute.xlu1 %518  ;;  %740 = vmax.xlane.f32.xlu1 %v739_v22 }
 0x177   : > { %v575_v25 = vsub.f32 %v519_v24, %v535_v6 }
 0x179   : > { %v611_v1 = vmul.f32 %v2082_v52, %v575_v25 }
 0x17b   : > { %v2311_v31 = vadd.f32 %v2090_v56, %v611_v1  ;;  %v753_v56 = vsub.f32 %v2080_v51, %v2318_v36 }
 0x17d   : > { %v742_v38 = vsel %vm648_vm0, %v2311_v31, -inf  ;;  %v793_v29 = vmul.f32 1.442695, %v753_v56 }
 0x17e   : > { %743 = vmax.xlane.f32.xlu2 %v742_v38  ;;  %845 = vadd.xlane.f32.xlu1 %v844_v15  ;;  %v2356_v38 = vpop.xlane.xlu0 %683 }
 0x18e   : > { %v2320_v28 = vpop.xlane.xlu2 %650 }
 0x18f   : > { %v745_v52 = vsub.f32 %v2120_v13, %v2320_v28 }
 0x191   : > { %v777_v6 = vmul.f32 1.442695, %v745_v52 }
 0x193   : > { %1474 = vpow2.f32 %v777_v6 }
 0x194   : > { %1476 = vpow2.f32 %v793_v29 }
 0x196   : > { %v2326_v48 = vpop.xlane.xlu2 %659 }
 0x199   : > { %v1475_v33 = vpop.eup %1474 }
 0x19a   : > { %v841_v57 = vsel %vm648_vm0, %v1475_v33, 0.0  ;;  %v1477_v60 = vpop.eup %1476 }
 0x19b   : > { %842 = vadd.xlane.f32.xlu0 %v841_v57  ;;  %v865_v32 = vsel %vm648_vm0, %v1477_v60, 0.0 }
 0x19e   : > { %v2329_v35 = vpop.xlane.xlu2 %662 }
 0x19f   : > { %v749_v62 = vsub.f32 %v2143_v42, %v2329_v35 }
 0x1a1   : > { %v785_v13 = vmul.f32 1.442695, %v749_v62  ;;  %v2333_v39 = vpop.xlane.xlu1 %656 }
 0x1a2   : > { %v747_v51 = vsub.f32 %v2146_v44, %v2333_v39 }
 0x1a3   : > { %1478 = vpow2.f32 %v785_v13  ;;  %866 = vadd.xlane.f32.xlu0 %v865_v32 }
 0x1a4   : > { %v781_v2 = vmul.f32 1.442695, %v747_v51  ;;  %v2373_v51 = vpop.xlane.xlu0 %692 }
 0x1a6   : > { %1480 = vpow2.f32 %v781_v2  ;;  %v2338_v55 = vpop.xlane.xlu2 %671 }
 0x1a9   : > { %v1479_v59 = vpop.eup %1478  ;;  %v2340_v45 = vpop.xlane.xlu1 %668 }
 0x1aa   : > { %v853_v11 = vsel %vm648_vm0, %v1479_v59, 0.0  ;;  %v751_v56 = vsub.f32 %v2166_v49, %v2340_v45  ;;  %v750_v49 = vsub.f32 %v2036_v27, %v2316_v5 }
 0x1ab   : > { %854 = vadd.xlane.f32.xlu2 %v853_v11 }
 0x1ac   : > { %v1481_v42 = vpop.eup %1480  ;;  %v789_v33 = vmul.f32 1.442695, %v751_v56  ;;  %v787_v27 = vmul.f32 1.442695, %v750_v49 }
 0x1ad   : > { %v847_v19 = vsel %vm648_vm0, %v1481_v42, 0.0 }
 0x1ae   : > { %v2344_v20 = vpop.xlane.xlu2 %680  ;;  %848 = vadd.xlane.f32.xlu1 %v847_v19 }
 0x1af   : > { %v755_v22 = vsub.f32 %v2182_v61, %v2344_v20  ;;  %v756_v61 = vsub.f32 %v2094_v58, %v2356_v38  ;;  %v748_v58 = vsub.f32 %v2130_v23, %v2326_v48 }
 0x1b1   : > { %v2346_v44 = vpop.xlane.xlu1 %677  ;;  %v797_v1 = vmul.f32 1.442695, %v755_v22  ;;  %v799_v57 = vmul.f32 1.442695, %v756_v61  ;;  %v783_v42 = vmul.f32 1.442695, %v748_v58 }
 0x1b2   : > { %v754_v18 = vsub.f32 %v2190_v63, %v2346_v44 }
 0x1b4   : > { %v795_v24 = vmul.f32 1.442695, %v754_v18 }
 0x1b6   : > { %1482 = vpow2.f32 %v795_v24  ;;  %v2352_v25 = vpop.xlane.xlu2 %689 }
 0x1b7   : > { %1484 = vpow2.f32 %v797_v1  ;;  %v752_v1 = vsub.f32 %v2162_v46, %v2338_v55 }
 0x1b9   : > { %v2354_v26 = vpop.xlane.xlu1 %686 }
 0x1ba   : > { %v757_v15 = vsub.f32 %v2208_v21, %v2354_v26 }
 0x1bc   : > { %v1483_v52 = vpop.eup %1482  ;;  %v801_v63 = vmul.f32 1.442695, %v757_v15 }
 0x1bd   : > { %v868_v6 = vsel %vm648_vm0, %v1483_v52, 0.0  ;;  %v1485_v21 = vpop.eup %1484 }
 0x1be   : > { %1486 = vpow2.f32 %v801_v63  ;;  %v2365_v29 = vpop.xlane.xlu2 %701  ;;  %869 = vadd.xlane.f32.xlu1 %v868_v6  ;;  %v871_v11 = vsel %vm648_vm0, %v1485_v21, 0.0  ;;  %v2393_v63 = vpop.xlane.xlu0 %695  ;;  %v791_v6 = vmul.f32 1.442695, %v752_v1 }
 0x1bf   : > { %1488 = vpow2.f32 %v789_v33  ;;  %v762_v2 = vsub.f32 %v2218_v16, %v2365_v29  ;;  %v759_v16 = vsub.f32 %v2109_v7, %v2373_v51  ;;  %v760_v49 = vsub.f32 %v2117_v12, %v2393_v63 }
 0x1c0   : > { %1490 = vpow2.f32 %v799_v57 }
 0x1c1   : > { %v2367_v60 = vpop.xlane.xlu1 %698  ;;  %v811_v19 = vmul.f32 1.442695, %v762_v2  ;;  %v805_v7 = vmul.f32 1.442695, %v759_v16 }
 0x1c2   : > { %v761_v62 = vsub.f32 %v2223_v14, %v2367_v60 }
 0x1c4   : > { %v1487_v13 = vpop.eup %1486  ;;  %v809_v32 = vmul.f32 1.442695, %v761_v62 }
 0x1c5   : > { %v877_v59 = vsel %vm648_vm0, %v1487_v13, 0.0  ;;  %v1489_v23 = vpop.eup %1488  ;;  %v758_v13 = vsub.f32 %v2204_v17, %v2352_v25 }
 0x1c6   : > { %1492 = vpow2.f32 %v809_v32  ;;  %878 = vadd.xlane.f32.xlu2 %v877_v59  ;;  %v2381_v14 = vpop.xlane.xlu2 %710  ;;  %872 = vadd.xlane.f32.xlu1 %v871_v11  ;;  %v1491_v22 = vpop.eup %1490  ;;  %v859_v52 = vsel %vm648_vm0, %v1489_v23, 0.0 }
 0x1c7   : > { %1494 = vpow2.f32 %v787_v27  ;;  %v765_v15 = vsub.f32 %v2238_v37, %v2381_v14  ;;  %v874_v61 = vsel %vm648_vm0, %v1491_v22, 0.0  ;;  %v2408_v59 = vpop.xlane.xlu0 %713  ;;  %v807_v27 = vmul.f32 1.442695, %v760_v49 }
 0x1c8   : > { %1496 = vpow2.f32 %v783_v42  ;;  %v803_v12 = vmul.f32 1.442695, %v758_v13  ;;  %v766_v16 = vsub.f32 %v2196_v3, %v2408_v59 }
 0x1c9   : > { %v2383_v18 = vpop.xlane.xlu1 %704  ;;  %1498 = vpow2.f32 %v811_v19  ;;  %v817_v57 = vmul.f32 1.442695, %v765_v15 }
 0x1ca   : > { %1500 = vpow2.f32 %v805_v7  ;;  %v819_v7 = vmul.f32 1.442695, %v766_v16 }
 0x1cb   : > { %1502 = vpow2.f32 %v791_v6 }
 0x1cc   : > { %v1493_v24 = vpop.eup %1492  ;;  %1504 = vpow2.f32 %v817_v57 }
 0x1cd   : > { %v889_v56 = vsel %vm648_vm0, %v1493_v24, 0.0  ;;  %v1495_v46 = vpop.eup %1494  ;;  %1506 = vpow2.f32 %v807_v27  ;;  %v763_v24 = vsub.f32 %v2242_v40, %v2383_v18  ;;  %v1073_v27 = vld [vmem:[#allocation8 + $0x18] sm:$0xff] }
 0x1ce   : > { %860 = vadd.xlane.f32.xlu2 %v859_v52  ;;  %890 = vadd.xlane.f32.xlu0 %v889_v56  ;;  %v2396_v33 = vpop.xlane.xlu2 %716  ;;  %v1497_v37 = vpop.eup %1496  ;;  %v856_v2 = vsel %vm648_vm0, %v1495_v46, 0.0  ;;  %1508 = vpow2.f32 %v803_v12 }
 0x1cf   : > { %875 = vadd.xlane.f32.xlu1 %v874_v61  ;;  %v1499_v62 = vpop.eup %1498  ;;  %v767_v58 = vsub.f32 %v2253_v8, %v2396_v33  ;;  %v850_v32 = vsel %vm648_vm0, %v1497_v37, 0.0  ;;  %v2423_v56 = vpop.xlane.xlu0 %722  ;;  %v813_v3 = vmul.f32 1.442695, %v763_v24  ;;  %1088 = vmatpush.msra.mxu0 %v1073_v27 }
 0x1d0   : > { %v892_v11 = vsel %vm648_vm0, %v1499_v62, 0.0  ;;  %v1501_v42 = vpop.eup %1500  ;;  %v769_v62 = vsub.f32 %v2229_v53, %v2423_v56 }
 0x1d1   : > { %v2398_v21 = vpop.xlane.xlu1 %707  ;;  %v821_v19 = vmul.f32 1.442695, %v767_v58  ;;  %v1503_v23 = vpop.eup %1502  ;;  %v883_v52 = vsel %vm648_vm0, %v1501_v42, 0.0 }
 0x1d2   : > { %v1505_v8 = vpop.eup %1504  ;;  %v862_v15 = vsel %vm648_vm0, %v1503_v23, 0.0  ;;  %v764_v49 = vsub.f32 %v2258_v30, %v2398_v21  ;;  %v825_v53 = vmul.f32 1.442695, %v769_v62 }
 0x1d3   : > { %1510 = vpow2.f32 %v821_v19  ;;  %v901_v61 = vsel %vm648_vm0, %v1505_v8, 0.0  ;;  %v1507_v6 = vpop.eup %1506 }
 0x1d4   : > { %v1509_v57 = vpop.eup %1508  ;;  %1512 = vpow2.f32 %v819_v7  ;;  %v815_v12 = vmul.f32 1.442695, %v764_v49 }
 0x1d5   : > { %1514 = vpow2.f32 %v813_v3  ;;  %v880_v58 = vsel %vm648_vm0, %v1509_v57, 0.0 }
 0x1d6   : > { %851 = vadd.xlane.f32.xlu2 %v850_v32  ;;  %857 = vadd.xlane.f32.xlu0 %v856_v2  ;;  %v2413_v22 = vpop.xlane.xlu2 %719  ;;  %v886_v32 = vsel %vm648_vm0, %v1507_v6, 0.0 }
 0x1d7   : > { %893 = vadd.xlane.f32.xlu1 %v892_v11  ;;  %v768_v1 = vsub.f32 %v2273_v41, %v2413_v22  ;;  %v2438_v2 = vpop.xlane.xlu0 %728 }
 0x1d8   : > { %v771_v8 = vsub.f32 %v2264_v43, %v2438_v2 }
 0x1d9   : > { %v2411_v17 = vpop.xlane.xlu1 %725  ;;  %v823_v46 = vmul.f32 1.442695, %v768_v1  ;;  %v1511_v41 = vpop.eup %1510 }
 0x1da   : > { %v907_v11 = vsel %vm648_vm0, %v1511_v41, 0.0  ;;  %v1513_v30 = vpop.eup %1512  ;;  %v770_v16 = vsub.f32 %v2276_v34, %v2411_v17 }
 0x1db   : > { %1516 = vpow2.f32 %v823_v46  ;;  %v904_v1 = vsel %vm648_vm0, %v1513_v30, 0.0  ;;  %v1071_v46 = vld [vmem:[#allocation8 + $0x8] sm:$0xff] }
 0x1dc   : > { %1518 = vpow2.f32 %v825_v53  ;;  %v827_v7 = vmul.f32 1.442695, %v770_v16 }
 0x1dd   : > { %1520 = vpow2.f32 %v815_v12 }
 0x1de   : > { %863 = vadd.xlane.f32.xlu0 %v862_v15  ;;  %884 = vadd.xlane.f32.xlu2 %v883_v52  ;;  %v829_v52 = vmul.f32 1.442695, %v771_v8 }
 0x1df   : > { %902 = vadd.xlane.f32.xlu1 %v901_v61  ;;  %v1072_v61 = vld [vmem:[#allocation8 + $0x10] sm:$0xff]  ;;  %v2450_v3 = vpop.xlane.xlu0 %731 }
 0x1e0   : > { %1089 = vmatpush.msra.mxu0 %v1072_v61  ;;  %v772_v49 = vsub.f32 %v2279_v54, %v2450_v3  ;;  %v2466_v54 = vand.u32 127, %v321_v0 }
 0x1e1   : > { %v2426_v40 = vpop.xlane.xlu1 %734  ;;  %v2428_v37 = vpop.xlane.xlu2 %737 }
 0x1e2   : > { %v774_v13 = vsub.f32 %v2295_v47, %v2428_v37  ;;  %v1515_v47 = vpop.eup %1514  ;;  %1090 = vmatpush.msra.mxu0 %v1071_v46  ;;  %v831_v53 = vmul.f32 1.442695, %v772_v49 }
 0x1e3   : > { %v1517_v23 = vpop.eup %1516  ;;  %v895_v24 = vsel %vm648_vm0, %v1515_v47, 0.0 }
 0x1e4   : > { %v835_v42 = vmul.f32 1.442695, %v774_v13  ;;  %v910_v15 = vsel %vm648_vm0, %v1517_v23, 0.0  ;;  %v1519_v43 = vpop.eup %1518  ;;  %v1070_v13 = vld [vmem:[#allocation8] sm:$0xff]  ;;  %v2469_v23 = vadd.s32 4294967288, %v2466_v54 }
 0x1e5   : > { %v1521_v57 = vpop.eup %1520  ;;  %1091 = vmatpush.msra.mxu0 %v1070_v13  ;;  %v913_v27 = vsel %vm648_vm0, %v1519_v43, 0.0 }
 0x1e6   : > { %881 = vadd.xlane.f32.xlu0 %v880_v58  ;;  %887 = vadd.xlane.f32.xlu2 %v886_v32  ;;  %1522 = vpow2.f32 %v835_v42  ;;  %v773_v58 = vsub.f32 %v2292_v10, %v2426_v40 }
 0x1e7   : > { %908 = vadd.xlane.f32.xlu1 %v907_v11  ;;  %v898_v11 = vsel %vm648_vm0, %v1521_v57, 0.0  ;;  %1355 = vmatmul.msk.f32.vlgmr.msra.gmra.mxu0 %vm648_vm0, %v1974_v4 }
 0x1e8   : > { %v833_v12 = vmul.f32 1.442695, %v773_v58 }
 0x1e9   : > { %v2441_v19 = vpop.xlane.xlu1 %740 }
 0x1ec   : > { %v1523_v62 = vpop.eup %1522 }
 0x1ee   : > { %896 = vadd.xlane.f32.xlu0 %v895_v24  ;;  %905 = vadd.xlane.f32.xlu2 %v904_v1  ;;  %v775_v24 = vsub.f32 %v2305_v50, %v2441_v19 }
 0x1ef   : > { %911 = vadd.xlane.f32.xlu1 %v910_v15 }
 0x1f1   : > { %v2452_v6 = vpop.xlane.xlu2 %743  ;;  %v846_v34 = vpop.xlane.xlu1 %845 }
 0x1f2   : > { %v776_v41 = vsub.f32 %v2311_v31, %v2452_v6  ;;  %1524 = vlog2.f32 %v846_v34  ;;  %v928_v31 = vsel %vm648_vm0, %v1523_v62, 0.0 }
 0x1f3   : > { %1526 = vpow2.f32 %v829_v52 }
 0x1f4   : > { %1528 = vpow2.f32 %v827_v7  ;;  %v839_v32 = vmul.f32 1.442695, %v776_v41  ;;  %v837_v7 = vmul.f32 1.442695, %v775_v24 }
 0x1f6   : > { %1530 = vpow2.f32 %v839_v32  ;;  %899 = vadd.xlane.f32.xlu0 %v898_v11  ;;  %914 = vadd.xlane.f32.xlu2 %v913_v27 }
 0x1f7   : > { %929 = vadd.xlane.f32.xlu1 %v928_v31  ;;  %1532 = vpow2.f32 %v831_v53 }
 0x1f8   : > { %v1525_v10 = vpop.eup %1524  ;;  %1534 = vpow2.f32 %v833_v12 }
 0x1f9   : > { %v1527_v30 = vpop.eup %1526  ;;  %v940_v42 = vmul.f32 0.6931472, %v1525_v10  ;;  %1536 = vpow2.f32 %v837_v7 }
 0x1fa   : > { %v1529_v47 = vpop.eup %1528  ;;  %v919_v52 = vsel %vm648_vm0, %v1527_v30, 0.0 }
 0x1fb   : > { %v1002_v8 = vadd.f32 %v940_v42, %v2288_v9  ;;  %v916_v1 = vsel %vm648_vm0, %v1529_v47, 0.0 }
 0x1fc   : > { %v1531_v16 = vpop.eup %1530 }
 0x1fd   : > { %v1034_v0 = vmul.f32 0.2, %v1002_v8  ;;  %v934_v15 = vsel %vm648_vm0, %v1531_v16, 0.0  ;;  %v1533_v43 = vpop.eup %1532 }
 0x1fe   : > { %917 = vadd.xlane.f32.xlu0 %v916_v1  ;;  %920 = vadd.xlane.f32.xlu2 %v919_v52  ;;  %v1535_v9 = vpop.eup %1534  ;;  %v922_v50 = vsel %vm648_vm0, %v1533_v43, 0.0 }
 0x1ff   : > { %v1137_v61 = vperm.slane %v1034_v0, %v2469_v23  ;;  %935 = vadd.xlane.f32.xlu1 %v934_v15  ;;  %v925_v34 = vsel %vm648_vm0, %v1535_v9, 0.0  ;;  %v1537_v46 = vpop.eup %1536  ;;  %v2490_v15 = vadd.s32 4294967280, %v2466_v54 }
 0x200   : > { %v931_v57 = vsel %vm648_vm0, %v1537_v46, 0.0 }
 0x206   : > { %926 = vadd.xlane.f32.xlu0 %v925_v34  ;;  %923 = vadd.xlane.f32.xlu2 %v922_v50 }
 0x20e   : > { %932 = vadd.xlane.f32.xlu0 %v931_v57  ;;  %v843_v41 = vpop.xlane.xlu0 %842 }
 0x20f   : > { %1538 = vlog2.f32 %v843_v41 }
 0x215   : > { %v1539_v62 = vpop.eup %1538 }
 0x216   : > { %v938_v49 = vmul.f32 0.6931472, %v1539_v62  ;;  %v867_v13 = vpop.xlane.xlu0 %866 }
 0x217   : > { %1540 = vlog2.f32 %v867_v13 }
 0x218   : > { %v1001_v58 = vadd.f32 %v938_v49, %v2320_v28 }
 0x21a   : > { %v1033_v32 = vmul.f32 0.2, %v1001_v58 }
 0x21c   : > { %v1135_v11 = vperm.slane %v1033_v32, %v2466_v54 }
 0x21d   : > { %v1541_v27 = vpop.eup %1540 }
 0x21e   : > { %v1139_v31 = vsel %vm1138_vm1, %v1137_v61, %v1135_v11  ;;  %v954_v53 = vmul.f32 0.6931472, %v1541_v27  ;;  %v855_v10 = vpop.xlane.xlu2 %854 }
 0x21f   : > { %1542 = vlog2.f32 %v855_v10 }
 0x220   : > { %v1009_v12 = vadd.f32 %v954_v53, %v2318_v36 }
 0x221   : > { %v849_v30 = vpop.xlane.xlu1 %848 }
 0x222   : > { %v1041_v42 = vmul.f32 0.2, %v1009_v12  ;;  %1544 = vlog2.f32 %v849_v30 }
 0x224   : > { %v1155_v47 = vperm.slane %v1041_v42, %v2466_v54 }
 0x225   : > { %v1543_v8 = vpop.eup %1542 }
 0x226   : > { %v946_v16 = vmul.f32 0.6931472, %v1543_v8 }
 0x228   : > { %v1545_v28 = vpop.eup %1544  ;;  %v1005_v24 = vadd.f32 %v946_v16, %v2329_v35  ;;  %v2504_v16 = vadd.s32 4294967272, %v2466_v54 }
 0x229   : > { %v942_v0 = vmul.f32 0.6931472, %v1545_v28 }
 0x22a   : > { %v2487_v1 = vmul.f32 0.2, %v1005_v24 }
 0x22b   : > { %v1003_v52 = vadd.f32 %v942_v0, %v2333_v39 }
 0x22c   : > { %v1148_v36 = vperm.slane %v2487_v1, %v2466_v54 }
 0x22d   : > { %v1035_v61 = vmul.f32 0.2, %v1003_v52 }
 0x22f   : > { %v1141_v7 = vperm.slane %v1035_v61, %v2490_v15 }
 0x231   : > { %v1143_v43 = vsel %vm1142_vm2, %v1141_v7, %v1139_v31  ;;  %v870_v9 = vpop.xlane.xlu1 %869 }
 0x232   : > { %1546 = vlog2.f32 %v870_v9 }
 0x238   : > { %v1547_v35 = vpop.eup %1546 }
 0x239   : > { %v956_v34 = vmul.f32 0.6931472, %v1547_v35  ;;  %v879_v50 = vpop.xlane.xlu2 %878  ;;  %v873_v46 = vpop.xlane.xlu1 %872 }
 0x23a   : > { %1548 = vlog2.f32 %v873_v46 }
 0x23b   : > { %v1010_v57 = vadd.f32 %v956_v34, %v2346_v44 }
 0x23d   : > { %v1042_v41 = vmul.f32 0.2, %v1010_v57 }
 0x23f   : > { %v1156_v39 = vperm.slane %v1042_v41, %v2469_v23 }
 0x240   : > { %v1549_v62 = vpop.eup %1548 }
 0x241   : > { %v1157_v49 = vsel %vm1138_vm1, %v1156_v39, %v1155_v47  ;;  %v861_v13 = vpop.xlane.xlu2 %860  ;;  %v891_v58 = vpop.xlane.xlu0 %890  ;;  %v958_v32 = vmul.f32 0.6931472, %v1549_v62 }
 0x242   : > { %v876_v11 = vpop.xlane.xlu1 %875 }
 0x243   : > { %1550 = vlog2.f32 %v876_v11  ;;  %v1011_v27 = vadd.f32 %v958_v32, %v2344_v20 }
 0x244   : > { %1552 = vlog2.f32 %v861_v13 }
 0x245   : > { %v1043_v31 = vmul.f32 0.2, %v1011_v27 }
 0x247   : > { %v1158_v53 = vperm.slane %v1043_v31, %v2490_v15 }
 0x249   : > { %v1551_v10 = vpop.eup %1550  ;;  %v852_v44 = vpop.xlane.xlu2 %851  ;;  %v1159_v30 = vsel %vm1142_vm2, %v1158_v53, %v1157_v49 }
 0x24a   : > { %v858_v12 = vpop.xlane.xlu0 %857  ;;  %v960_v42 = vmul.f32 0.6931472, %v1551_v10  ;;  %1554 = vlog2.f32 %v852_v44  ;;  %v894_v8 = vpop.xlane.xlu1 %893 }
 0x24b   : > { %v1553_v47 = vpop.eup %1552  ;;  %1556 = vlog2.f32 %v858_v12 }
 0x24c   : > { %v1012_v28 = vadd.f32 %v960_v42, %v2356_v38  ;;  %v950_v20 = vmul.f32 0.6931472, %v1553_v47  ;;  %1558 = vlog2.f32 %v879_v50 }
 0x24e   : > { %v1044_v24 = vmul.f32 0.2, %v1012_v28  ;;  %v1007_v34 = vadd.f32 %v950_v20, %v2340_v45 }
 0x250   : > { %v1555_v0 = vpop.eup %1554  ;;  %v1160_v52 = vperm.slane %v1044_v24, %v2504_v16  ;;  %v1039_v49 = vmul.f32 0.2, %v1007_v34 }
 0x251   : > { %v944_v61 = vmul.f32 0.6931472, %v1555_v0  ;;  %v885_v7 = vpop.xlane.xlu2 %884  ;;  %v1557_v35 = vpop.eup %1556 }
 0x252   : > { %v864_v9 = vpop.xlane.xlu0 %863  ;;  %v1161_v46 = vsel %vm1146_vm3, %v1160_v52, %v1159_v30  ;;  %v903_v57 = vpop.xlane.xlu1 %902  ;;  %v948_v38 = vmul.f32 0.6931472, %v1557_v35 }
 0x253   : > { %v1004_v41 = vadd.f32 %v944_v61, %v2326_v48  ;;  %1560 = vlog2.f32 %v864_v9  ;;  %v1559_v11 = vpop.eup %1558  ;;  %v1151_v48 = vperm.slane %v1039_v49, %v2490_v15 }
 0x254   : > { %v1006_v62 = vadd.f32 %v948_v38, %v2316_v5  ;;  %1562 = vlog2.f32 %v885_v7 }
 0x255   : > { %v1036_v39 = vmul.f32 0.2, %v1004_v41 }
 0x256   : > { %v1038_v32 = vmul.f32 0.2, %v1006_v62 }
 0x257   : > { %v1145_v13 = vperm.slane %v1036_v39, %v2504_v16 }
 0x258   : > { %v1149_v45 = vperm.slane %v1038_v32, %v2469_v23 }
 0x259   : > { %v1147_v27 = vsel %vm1146_vm3, %v1145_v13, %v1143_v43  ;;  %v888_v31 = vpop.xlane.xlu2 %887  ;;  %v1561_v50 = vpop.eup %1560  ;;  %v962_v43 = vmul.f32 0.6931472, %v1559_v11 }
 0x25a   : > { %v882_v53 = vpop.xlane.xlu0 %881  ;;  %v909_v10 = vpop.xlane.xlu1 %908  ;;  %1564 = vlog2.f32 %v888_v31  ;;  %v1150_v5 = vsel %vm1138_vm1, %v1149_v45, %v1148_v36  ;;  %v952_v12 = vmul.f32 0.6931472, %v1561_v50 }
 0x25b   : > { %v1563_v44 = vpop.eup %1562  ;;  %v1152_v30 = vsel %vm1142_vm2, %v1151_v48, %v1150_v5  ;;  %1566 = vlog2.f32 %v882_v53  ;;  %v1013_v24 = vadd.f32 %v962_v43, %v2354_v26 }
 0x25c   : > { %v1008_v42 = vadd.f32 %v952_v12, %v2338_v55  ;;  %1568 = vlog2.f32 %v894_v8  ;;  %v966_v47 = vmul.f32 0.6931472, %v1563_v44 }
 0x25d   : > { %1570 = vlog2.f32 %v903_v57  ;;  %v1045_v57 = vmul.f32 0.2, %v1013_v24 }
 0x25e   : > { %v1040_v28 = vmul.f32 0.2, %v1008_v42  ;;  %1572 = vlog2.f32 %v891_v58  ;;  %v1015_v7 = vadd.f32 %v966_v47, %v2373_v51 }
 0x25f   : > { %1574 = vlog2.f32 %v909_v10  ;;  %v1162_v31 = vperm.slane %v1045_v57, %v2466_v54 }
 0x260   : > { %v1565_v20 = vpop.eup %1564  ;;  %v1153_v1 = vperm.slane %v1040_v28, %v2504_v16  ;;  %v1047_v51 = vmul.f32 0.2, %v1015_v7 }
 0x261   : > { %v968_v36 = vmul.f32 0.6931472, %v1565_v20  ;;  %v906_v0 = vpop.xlane.xlu2 %905  ;;  %v1567_v61 = vpop.eup %1566 }
 0x262   : > { %v897_v52 = vpop.xlane.xlu0 %896  ;;  %v912_v55 = vpop.xlane.xlu1 %911  ;;  %1576 = vlog2.f32 %v906_v0  ;;  %v1154_v8 = vsel %vm1146_vm3, %v1153_v1, %v1152_v30  ;;  %v964_v58 = vmul.f32 0.6931472, %v1567_v61 }
 0x263   : > { %v1016_v9 = vadd.f32 %v968_v36, %v2393_v63  ;;  %1578 = vlog2.f32 %v912_v55  ;;  %v1569_v35 = vpop.eup %1568  ;;  %v1198_v26 = vsel %vm1197_vm4, %v1154_v8, %v1147_v27 }
 0x264   : > { %1580 = vlog2.f32 %v897_v52  ;;  %v1571_v34 = vpop.eup %1570  ;;  %v1200_v41 = vsel %vm1199_vm5, %v1161_v46, %v1198_v26  ;;  %v1014_v38 = vadd.f32 %v964_v58, %v2352_v25  ;;  %v972_v11 = vmul.f32 0.6931472, %v1569_v35 }
 0x265   : > { %v1573_v39 = vpop.eup %1572  ;;  %v1048_v49 = vmul.f32 0.2, %v1016_v9  ;;  %v978_v45 = vmul.f32 0.6931472, %v1571_v34  ;;  %v1165_v25 = vperm.slane %v1047_v51, %v2490_v15 }
 0x266   : > { %v1575_v62 = vpop.eup %1574  ;;  %v1046_v13 = vmul.f32 0.2, %v1014_v38  ;;  %v970_v53 = vmul.f32 0.6931472, %v1573_v39  ;;  %v1018_v42 = vadd.f32 %v972_v11, %v2365_v29 }
 0x267   : > { %v982_v44 = vmul.f32 0.6931472, %v1575_v62  ;;  %v1167_v5 = vperm.slane %v1048_v49, %v2504_v16  ;;  %v1021_v47 = vadd.f32 %v978_v45, %v2381_v14 }
 0x268   : > { %v1577_v32 = vpop.eup %1576  ;;  %v1163_v27 = vperm.slane %v1046_v13, %v2469_v23  ;;  %v1017_v24 = vadd.f32 %v970_v53, %v2367_v60  ;;  %v1050_v61 = vmul.f32 0.2, %v1018_v42 }
 0x269   : > { %v1579_v63 = vpop.eup %1578  ;;  %v980_v50 = vmul.f32 0.6931472, %v1577_v32  ;;  %v915_v48 = vpop.xlane.xlu2 %914  ;;  %v1023_v29 = vadd.f32 %v982_v44, %v2396_v33  ;;  %v1053_v14 = vmul.f32 0.2, %v1021_v47 }
 0x26a   : > { %v900_v10 = vpop.xlane.xlu0 %899  ;;  %v1581_v46 = vpop.eup %1580  ;;  %v1164_v12 = vsel %vm1138_vm1, %v1163_v27, %v1162_v31  ;;  %v984_v36 = vmul.f32 0.6931472, %v1579_v63  ;;  %v1049_v7 = vmul.f32 0.2, %v1017_v24  ;;  %v1170_v34 = vperm.slane %v1050_v61, %v2469_v23 }
 0x26b   : > { %v1022_v30 = vadd.f32 %v980_v50, %v2408_v59  ;;  %v974_v43 = vmul.f32 0.6931472, %v1581_v46  ;;  %v1166_v28 = vsel %vm1142_vm2, %v1165_v25, %v1164_v12  ;;  %v930_v20 = vpop.xlane.xlu1 %929  ;;  %1582 = vlog2.f32 %v900_v10 }
 0x26c   : > { %v1168_v1 = vsel %vm1146_vm3, %v1167_v5, %v1166_v28  ;;  %1584 = vlog2.f32 %v915_v48  ;;  %v1024_v60 = vadd.f32 %v984_v36, %v2413_v22  ;;  %v1055_v26 = vmul.f32 0.2, %v1023_v29 }
 0x26d   : > { %v1054_v0 = vmul.f32 0.2, %v1022_v30  ;;  %v1019_v52 = vadd.f32 %v974_v43, %v2383_v18  ;;  %v1202_v59 = vsel %vm1201_vm6, %v1168_v1, %v1200_v41  ;;  %v1176_v57 = vperm.slane %v1053_v14, %v2466_v54 }
 0x26e   : > { %v1169_v41 = vperm.slane %v1049_v7, %v2466_v54  ;;  %v1056_v38 = vmul.f32 0.2, %v1024_v60  ;;  %v1179_v49 = vperm.slane %v1055_v26, %v2490_v15 }
 0x26f   : > { %v1177_v58 = vperm.slane %v1054_v0, %v2469_v23  ;;  %v1051_v35 = vmul.f32 0.2, %v1019_v52 }
 0x270   : > { %v1171_v45 = vsel %vm1138_vm1, %v1170_v34, %v1169_v41  ;;  %v1181_v48 = vperm.slane %v1056_v38, %v2504_v16 }
 0x271   : > { %v921_v55 = vpop.xlane.xlu2 %920  ;;  %v1583_v9 = vpop.eup %1582  ;;  %v1178_v39 = vsel %vm1138_vm1, %v1177_v58, %v1176_v57  ;;  %v1172_v51 = vperm.slane %v1051_v35, %v2490_v15  ;;  %v1470_v58 = vld [vmem:[%s2638_s4] ss:$0 sm:$0xff] }
 0x272   : > { %v918_v8 = vpop.xlane.xlu0 %917  ;;  %1586 = vlog2.f32 %v921_v55  ;;  %v976_v18 = vmul.f32 0.6931472, %v1583_v9  ;;  %v1585_v33 = vpop.eup %1584  ;;  %v1180_v63 = vsel %vm1142_vm2, %v1179_v49, %v1178_v39 }
 0x273   : > { %1588 = vlog2.f32 %v918_v8  ;;  %v936_v62 = vpop.xlane.xlu1 %935  ;;  %v986_v13 = vmul.f32 0.6931472, %v1585_v33  ;;  %v1173_v10 = vsel %vm1142_vm2, %v1172_v51, %v1171_v45  ;;  %v1182_v30 = vsel %vm1146_vm3, %v1181_v48, %v1180_v63  ;;  %v1093_v51 = vpop.f32.mrf.mxu0 }
 0x274   : > { %v1020_v22 = vadd.f32 %v976_v18, %v2398_v21  ;;  %1590 = vlog2.f32 %v930_v20 }
 0x275   : > { %1592 = vlog2.f32 %v936_v62  ;;  %v1025_v46 = vadd.f32 %v986_v13, %v2423_v56 }
 0x276   : > { %v1052_v32 = vmul.f32 0.2, %v1020_v22  ;;  %v1069_v22 = vmul.f32 %v1470_v58, %v1974_v4 }
 0x277   : > { %v1057_v20 = vmul.f32 0.2, %v1025_v46 }
 0x278   : > { %v1587_v11 = vpop.eup %1586  ;;  %v1174_v21 = vperm.slane %v1052_v32, %v2504_v16  ;;  %v1096_v32 = vsub.f32 %v1069_v22, %v1093_v51 }
 0x279   : > { %v990_v31 = vmul.f32 0.6931472, %v1587_v11  ;;  %v924_v53 = vpop.xlane.xlu2 %923  ;;  %v1589_v50 = vpop.eup %1588 }
 0x27a   : > { %v927_v27 = vpop.xlane.xlu0 %926  ;;  %1594 = vlog2.f32 %v924_v53  ;;  %v1175_v25 = vsel %vm1146_vm3, %v1174_v21, %v1173_v10  ;;  %v988_v44 = vmul.f32 0.6931472, %v1589_v50  ;;  %v1591_v47 = vpop.eup %1590 }
 0x27b   : > { %1596 = vlog2.f32 %v927_v27  ;;  %v1204_v5 = vsel %vm1203_vm7, %v1175_v25, %v1202_v59  ;;  %v1027_v12 = vadd.f32 %v990_v31, %v2438_v2  ;;  %v1593_v28 = vpop.eup %1592  ;;  %v996_v61 = vmul.f32 0.6931472, %v1591_v47 }
 0x27c   : > { %v1026_v43 = vadd.f32 %v988_v44, %v2411_v17  ;;  %v1206_v42 = vsel %vm1205_vm8, %v1182_v30, %v1204_v5  ;;  %v1183_v2 = vperm.slane %v1057_v20, %v2466_v54  ;;  %v1000_v17 = vmul.f32 0.6931472, %v1593_v28 }
 0x27d   : > { %v1059_v36 = vmul.f32 0.2, %v1027_v12  ;;  %v1030_v60 = vadd.f32 %v996_v61, %v2428_v37 }
 0x27e   : > { %v1058_v24 = vmul.f32 0.2, %v1026_v43  ;;  %v1032_v18 = vadd.f32 %v1000_v17, %v2452_v6 }
 0x27f   : > { %v1186_v7 = vperm.slane %v1059_v36, %v2490_v15  ;;  %v1062_v57 = vmul.f32 0.2, %v1030_v60 }
 0x280   : > { %v1595_v1 = vpop.eup %1594  ;;  %v1184_v0 = vperm.slane %v1058_v24, %v2469_v23  ;;  %v1064_v62 = vmul.f32 0.2, %v1032_v18 }
 0x281   : > { %v1597_v56 = vpop.eup %1596  ;;  %v992_v52 = vmul.f32 0.6931472, %v1595_v1  ;;  %v1191_v6 = vperm.slane %v1062_v57, %v2469_v23 }
 0x282   : > { %v933_v29 = vpop.xlane.xlu0 %932  ;;  %v994_v59 = vmul.f32 0.6931472, %v1597_v56  ;;  %v1185_v8 = vsel %vm1138_vm1, %v1184_v0, %v1183_v2  ;;  %v1195_v63 = vperm.slane %v1064_v62, %v2504_v16 }
 0x283   : > { %1598 = vlog2.f32 %v933_v29  ;;  %v1028_v14 = vadd.f32 %v992_v52, %v2450_v3  ;;  %v1097_v3 = vld [vmem:[%s2639_s5] sm:$0x1] }
 0x284   : > { %v1029_v55 = vadd.f32 %v994_v59, %v2426_v40  ;;  %v1187_v40 = vsel %vm1142_vm2, %v1186_v7, %v1185_v8  ;;  %v1213_v41 = vsub.f32 1.0, %v1097_v3 }
 0x285   : > { %v1060_v9 = vmul.f32 0.2, %v1028_v14 }
 0x286   : > { %v1061_v33 = vmul.f32 0.2, %v1029_v55  ;;  %v1215_v11 = vperm.slane %v1213_v41, 0 }
 0x287   : > { %v1188_v35 = vperm.slane %v1060_v9, %v2504_v16 }
 0x288   : > { %v1190_v49 = vperm.slane %v1061_v33, %v2466_v54  ;;  %v1217_v21 = vmul.f32 %v1215_v11, %v1096_v32 }
 0x289   : > { %v1599_v26 = vpop.eup %1598  ;;  %v1189_v34 = vsel %vm1146_vm3, %v1188_v35, %v1187_v40 }
 0x28a   : > { %v998_v37 = vmul.f32 0.6931472, %v1599_v26  ;;  %v1208_v38 = vsel %vm1207_vm9, %v1189_v34, %v1206_v42  ;;  %v1192_v4 = vsel %vm1138_vm1, %v1191_v6, %v1190_v49 }
 0x28c   : > { %v1031_v39 = vadd.f32 %v998_v37, %v2441_v19  ;;  %v1471_v19 = vld [vmem:[%s2639_s5] ss:$0 sm:$0xff] }
 0x28e   : > { %v1063_v13 = vmul.f32 0.2, %v1031_v39 }
 0x290   : > { %v1193_v45 = vperm.slane %v1063_v13, %v2490_v15 }
 0x292   : > { %v1194_v54 = vsel %vm1142_vm2, %v1193_v45, %v1192_v4 }
 0x293   : > { %v1196_v23 = vsel %vm1146_vm3, %v1195_v63, %v1194_v54 }
 0x294   : > { %v1210_v31 = vsel %vm1209_vm10, %v1196_v23, %v1208_v38 }
 0x295   : > { %v1212_v53 = vmul.f32 %v1471_v19, %v1210_v31 }
 0x297   : > { %v1218_v27 = vadd.f32 %v1217_v21, %v1212_v53 }
 0x299   : > { %1221 = vrot.lane.b32.xlu2 %v1218_v27, %s1801_s14 }
 0x2f3   : > { %v1222_v15 = vpop.permute.xlu2 %1221 }
 0x2f4   : > { %1225 = vst.msk [vmem:[%s2547_s29] sm:$0xff] %vm1224_vm11, %v1222_v15 }
 0x2f5   : > { %1747 = shalt.err (!%p1744_p9)
}
 0x2f6   : > { %1374 = dma.vmem_to_hbm [thread:$0]  (%p1913_p13), %s1240_s13, 128, %s1242_s30, %s1227_s8  }
 0x2f7 PF: > { %s1253_s10 = sand.u32 1, %s1782_s21   ;;  %p2647_p10 = scmp.ge.s32.totalorder %s1794_s24, 2 }
 0x2f8   : > { %s1254_s29 = scalar_lea.sflag [#allocation4], %s1253_s10 }
 0x2f9   : > { %p1391_p11 = pnand %p2647_p10, %p1918_p4 }
 0x2fb   : > { %p1392_p0 = pneg %p1391_p11 }
 0x2fd   : > { %1777 = dma.done.wait (%p1392_p0), %s1254_s29, 128  }
 0x2fe   : > { %1779 = vsyncadd (%p1392_p0), %s1254_s29, 4294967168  ;;  %p21_p2 = scmp.ge.s32.totalorder %s1893_s26, 4   ;;  %s2648_s21 = smov %s1786_s22 }
 0x2ff   : > { %s2649_s22 = smov %s1790_s23  ;;  %s2650_s23 = smov %s1905_s7 }
 0x300   : > { %s2651_s24 = smov %s1893_s26  ;;  %23 = sbr.rel (!%p21_p2) target bundleno = 7 (0x7), region = 101 }
 0x305   :  { %1260 = vsyncpa [#allocation3], 1 }
 0x306   :  { %1262 = vsyncpa [#allocation3 + $0x1], 1 }
 0x307   :  { %1263 = vsyncpa [#allocation6], 1 }
 0x308   :  { %1264 = vsyncpa [#allocation9], 1 }
 0x309   :  { %1265 = vsyncpa [#allocation4], 1 }
 0x30a   :  { %1267 = vsyncpa [#allocation4 + $0x1], 1 }

</bundles_post_ra>
